<compile_context>
chip_gen: v6e
topology: v6e:2x2x1
jax: 0.10.0
libtpu: 0.0.40
codegen_flags: <defaults>
</compile_context>

<pallas_src>
import functools

import numpy as np

import jax
import jax.numpy as jnp
from jax.experimental import pallas as pl
from jax.experimental.pallas import tpu as pltpu

EPS = 1e-5  # PyTorch InstanceNorm3d default eps


# ----------------------------- weight preparation ------------------------------
def build_banded_weights(w, H, W, C):
    """Fold the (kh, kw, Cin->Cout) part of a 3x3x3 zero-padded conv into a
    block-banded matrix per kd tap.

      wb[kd, hi*W*C + wi*C + ci, ho*W*C + wo*C + co] = w[kd, hi-ho+1, wi-wo+1, ci, co]
      (zero where the offset is outside [0, 2]; this also encodes the zero
       padding along H and W).

    Returns (3, H*W*C, H*W*C) float32.  Host-side, done once per weight set.
    """
    w_np = np.asarray(w, dtype=np.float32)                  # (3, 3, 3, Cin, Cout)
    HWC = H * W * C
    wb = np.zeros((3, H, W, C, H, W, C), np.float32)
    for kd in range(3):
        for kh in range(3):
            for kw in range(3):
                for ho in range(H):
                    hi = ho + kh - 1
                    if hi < 0 or hi >= H:
                        continue
                    for wo in range(W):
                        wi = wo + kw - 1
                        if wi < 0 or wi >= W:
                            continue
                        wb[kd, hi, wi, :, ho, wo, :] = w_np[kd, kh, kw]
    return jnp.asarray(wb.reshape(3, HWC, HWC))


# ---------------------------------- kernel --------------------------------------
def _resnet_block_kernel(x_ref, wb1_ref, wb2_ref, out_ref, *, D, HWC, C):
    """One batch element.

    x_ref   : (D, H*W*C)        bf16, lane-dense, unpadded
    wb*_ref : (3, H*W*C, H*W*C) bf16 block-banded conv weights (one per kd tap)
    out_ref : (D, H*W*C)        f32
    """
    HW = HWC // C
    x_bf = x_ref[...]                                        # (D, HWC) bf16
    zero_row = jnp.zeros((1, HWC), jnp.bfloat16)

    def conv3x3x3(h_bf, wb_ref):
        # out[d] = sum_kd  h[d + kd - 1] @ wb[kd]  (zero rows off both ends of D).
        h_dn = jnp.concatenate([zero_row, h_bf[:D - 1]], axis=0)   # h[d-1]
        h_up = jnp.concatenate([h_bf[1:], zero_row], axis=0)       # h[d+1]
        return (jnp.dot(h_dn, wb_ref[0], preferred_element_type=jnp.float32)
                + jnp.dot(h_bf, wb_ref[1], preferred_element_type=jnp.float32)
                + jnp.dot(h_up, wb_ref[2], preferred_element_type=jnp.float32))

    def channel_sum(v):
        # v: (1, HWC).  Channel c lives at lanes j with j % C == c.  Log-step
        # rotate-and-add over the lane axis leaves every lane holding the sum
        # of its whole residue class (requires HW to be a power of two).
        shift = C
        while shift < HWC:
            v = v + pltpu.roll(v, shift, axis=1)
            shift *= 2
        return v

    def instance_norm(y):
        # Affine-free InstanceNorm3d, biased variance, single pass over y.
        n = jnp.float32(D * HW)
        s1 = channel_sum(jnp.sum(y, axis=0, keepdims=True))        # (1, HWC)
        s2 = channel_sum(jnp.sum(y * y, axis=0, keepdims=True))    # (1, HWC)
        mean = s1 / n
        var = s2 / n - mean * mean
        inv = jax.lax.rsqrt(var + EPS)
        return (y - mean) * inv

    # Conv biases are omitted on purpose: a per-channel bias followed by an
    # affine-free InstanceNorm is a mathematical no-op.
    h = instance_norm(conv3x3x3(x_bf, wb1_ref))                    # f32
    h = jnp.maximum(h, 0.0)                                        # ReLU
    h2 = instance_norm(conv3x3x3(h.astype(jnp.bfloat16), wb2_ref))
    out_ref[...] = x_bf.astype(jnp.float32) + h2                   # residual, f32


# --------------------------------- wrapper ---------------------------------------
def resnet_block(x_ncdhw, wb1, wb2):
    """x_ncdhw: (N, C, D, H, W) f32; wb*: (3, H*W*C, H*W*C) banded conv weights."""
    N, C, D, H, W = x_ncdhw.shape
    HWC = H * W * C
    HW = H * W
    assert wb1.shape == (3, HWC, HWC) and wb2.shape == (3, HWC, HWC)
    assert (HW & (HW - 1)) == 0, "this toy kernel assumes H*W is a power of two"

    # NCDHW -> NDHWC -> lane-dense (N, D, H*W*C).  No HBM-side padding.
    # bf16 storage for activations/weights; accumulation & stats stay f32.
    x = jnp.transpose(x_ncdhw, (0, 2, 3, 4, 1)).reshape(N, D, HWC)
    x_bf = x.astype(jnp.bfloat16)
    wb1_bf = wb1.astype(jnp.bfloat16)
    wb2_bf = wb2.astype(jnp.bfloat16)

    kernel = functools.partial(_resnet_block_kernel, D=D, HWC=HWC, C=C)

    # TODO(synk): for production shapes (large C / D / H / W) this whole-volume-
    # per-step design must be re-tiled into D-slabs with a two-pass InstanceNorm
    # (partial sum / sum-of-squares, then normalize); for C >= 32 replace the
    # block-banded weights with a true (27*C, C) im2col matmul, and on v7x make
    # the slab axis (not the batch axis) the megacore-parallel grid axis.
    out = pl.pallas_call(
        kernel,
        out_shape=jax.ShapeDtypeStruct((N, D, HWC), jnp.float32),
        grid_spec=pltpu.PrefetchScalarGridSpec(
            num_scalar_prefetch=0,
            grid=(N,),
            in_specs=[
                pl.BlockSpec((None, D, HWC), lambda n: (n, 0, 0)),
                pl.BlockSpec((3, HWC, HWC), lambda n: (0, 0, 0)),
                pl.BlockSpec((3, HWC, HWC), lambda n: (0, 0, 0)),
            ],
            out_specs=pl.BlockSpec((None, D, HWC), lambda n: (n, 0, 0)),
        ),
        compiler_params=pltpu.CompilerParams(
            dimension_semantics=("parallel",),
            vmem_limit_bytes=32 * 1024 * 1024,
        ),
    )(x_bf, wb1_bf, wb2_bf)

    out = out.reshape(N, D, H, W, C)
    return jnp.transpose(out, (0, 4, 1, 2, 3))                     # back to NCDHW


# ---------------------------- pure-JAX reference -----------------------------------
def _reference(x_ncdhw, w1, b1, w2, b2, *, bf16_inputs=False):
    """f32 reference: x + IN(conv(ReLU(IN(conv(x))))), biases INCLUDED.
    With bf16_inputs=True the conv inputs / weights / residual source are
    rounded to bf16 first, mirroring the kernel's mixed-precision storage."""
    def rnd(a):
        return a.astype(jnp.bfloat16).astype(jnp.float32) if bf16_inputs else a

    x = jnp.transpose(x_ncdhw, (0, 2, 3, 4, 1))                    # NDHWC

    def conv(h, w, b):
        y = jax.lax.conv_general_dilated(
            rnd(h), rnd(w), window_strides=(1, 1, 1), padding="SAME",
            dimension_numbers=("NDHWC", "DHWIO", "NDHWC"),
            precision=jax.lax.Precision.HIGHEST)
        return y + b.reshape(1, 1, 1, 1, -1)

    def inorm(h):
        m = jnp.mean(h, axis=(1, 2, 3), keepdims=True)
        v = jnp.mean((h - m) ** 2, axis=(1, 2, 3), keepdims=True)
        return (h - m) * jax.lax.rsqrt(v + EPS)

    h = jnp.maximum(inorm(conv(x, w1, b1)), 0.0)
    h = inorm(conv(h, w2, b2))
    out = rnd(x) + h
    return jnp.transpose(out, (0, 4, 1, 2, 3))


if __name__ == "__main__":
    # Small shapes consistent with the module: dim (channels) = 8, N=2, D=H=W=8.
    N, C, D, H, W = 2, 8, 8, 8, 8
    key = jax.random.PRNGKey(0)
    kx, kw1, kb1, kw2, kb2 = jax.random.split(key, 5)

    x = jax.random.normal(kx, (N, C, D, H, W), dtype=jnp.float32)

    # PyTorch-like Conv3d init; weights as (kd, kh, kw, Cin, Cout).
    bound = 1.0 / jnp.sqrt(jnp.float32(C * 27))
    w1 = jax.random.uniform(kw1, (3, 3, 3, C, C), jnp.float32, -bound, bound)
    b1 = jax.random.uniform(kb1, (1, C), jnp.float32, -bound, bound)
    w2 = jax.random.uniform(kw2, (3, 3, 3, C, C), jnp.float32, -bound, bound)
    b2 = jax.random.uniform(kb2, (1, C), jnp.float32, -bound, bound)

    # Kernel path: banded weights, biases dropped (cancelled exactly by the
    # affine-free InstanceNorm that follows each conv).
    wb1 = build_banded_weights(w1, H, W, C)
    wb2 = build_banded_weights(w2, H, W, C)
    out = jax.block_until_ready(resnet_block(x, wb1, wb2))
    assert out.shape == (N, C, D, H, W)

    # Check 1: precision-matched reference (same bf16-rounded inputs, biases
    # kept) — tightly validates the kernel math incl. the bias cancellation.
    ref_bf = jax.block_until_ready(_reference(x, w1, b1, w2, b2, bf16_inputs=True))
    err_bf = float(jnp.max(jnp.abs(out - ref_bf)))
    assert err_bf < 5e-3, f"precision-matched mismatch: {err_bf}"

    # Check 2: pure-f32 reference — bounds the end-to-end error introduced by
    # the bf16 activation/weight storage (expected ~1e-2).
    ref_f32 = jax.block_until_ready(_reference(x, w1, b1, w2, b2))
    err_f32 = float(jnp.max(jnp.abs(out - ref_f32)))
    assert err_f32 < 5e-2, f"f32 reference mismatch: {err_f32}"

    print("KERNEL_OK")
</pallas_src>

<mosaic_0001>
module attributes {stable_mosaic.version = 11 : i64} {
  func.func @_resnet_block_kernel(%arg0: i32, %arg1: memref<1x8x512xbf16, #tpu.memory_space<vmem>>, %arg2: memref<3x512x512xbf16, #tpu.memory_space<vmem>>, %arg3: memref<3x512x512xbf16, #tpu.memory_space<vmem>>, %arg4: memref<1x8x512xf32, #tpu.memory_space<vmem>>) attributes {dimension_semantics = [#tpu.dimension_semantics<parallel>], iteration_bounds = array<i64: 2>, scalar_prefetch = 0 : i64, scratch_operands = 0 : i64, tpu.core_type = #tpu.core_type<tc>, window_params = [{transform_indices = @transform_0, window_bounds = array<i64: 1, 8, 512>}, {pipeline_mode = #tpu.pipeline_mode<synchronous>, transform_indices = @transform_1, window_bounds = array<i64: 3, 512, 512>}, {pipeline_mode = #tpu.pipeline_mode<synchronous>, transform_indices = @transform_2, window_bounds = array<i64: 3, 512, 512>}, {transform_indices = @transform_3, window_bounds = array<i64: 1, 8, 512>}]} {
    %c0 = arith.constant 0 : index
    %c0_0 = arith.constant 0 : index
    %c0_1 = arith.constant 0 : index
    %0 = vector.load %arg1[%c0, %c0_0, %c0_1] : memref<1x8x512xbf16, #tpu.memory_space<vmem>>, vector<1x8x512xbf16>
    %1 = vector.shape_cast %0 : vector<1x8x512xbf16> to vector<8x512xbf16>
    %cst = arith.constant 0.000000e+00 : bf16
    %2 = vector.broadcast %cst : bf16 to vector<1x512xbf16>
    %3 = vector.extract_strided_slice %1 {offsets = [0, 0], sizes = [7, 512], strides = [1, 1]} : vector<8x512xbf16> to vector<7x512xbf16>
    %4 = tpu.concatenate %2, %3 in 0 : vector<1x512xbf16>, vector<7x512xbf16> -> vector<8x512xbf16>
    %5 = vector.extract_strided_slice %1 {offsets = [1, 0], sizes = [7, 512], strides = [1, 1]} : vector<8x512xbf16> to vector<7x512xbf16>
    %6 = tpu.concatenate %5, %2 in 0 : vector<7x512xbf16>, vector<1x512xbf16> -> vector<8x512xbf16>
    %c0_2 = arith.constant 0 : index
    %c0_3 = arith.constant 0 : index
    %c0_4 = arith.constant 0 : index
    %7 = vector.load %arg2[%c0_2, %c0_3, %c0_4] : memref<3x512x512xbf16, #tpu.memory_space<vmem>>, vector<1x512x512xbf16>
    %8 = vector.shape_cast %7 : vector<1x512x512xbf16> to vector<512x512xbf16>
    %cst_5 = arith.constant dense<0.000000e+00> : vector<8x512xf32>
    %9 = tpu.matmul %4, %8, %cst_5 {dimension_numbers = #tpu.dot_dimension_numbers<[1], [0], [0], [1], [0, 0, 1, 1], [], []>} : vector<8x512xbf16>, vector<512x512xbf16>, vector<8x512xf32> -> vector<8x512xf32>
    %c1 = arith.constant 1 : index
    %c0_6 = arith.constant 0 : index
    %c0_7 = arith.constant 0 : index
    %10 = vector.load %arg2[%c1, %c0_6, %c0_7] : memref<3x512x512xbf16, #tpu.memory_space<vmem>>, vector<1x512x512xbf16>
    %11 = vector.shape_cast %10 : vector<1x512x512xbf16> to vector<512x512xbf16>
    %cst_8 = arith.constant dense<0.000000e+00> : vector<8x512xf32>
    %12 = tpu.matmul %1, %11, %cst_8 {dimension_numbers = #tpu.dot_dimension_numbers<[1], [0], [0], [1], [0, 0, 1, 1], [], []>} : vector<8x512xbf16>, vector<512x512xbf16>, vector<8x512xf32> -> vector<8x512xf32>
    %13 = arith.addf %9, %12 : vector<8x512xf32>
    %c2 = arith.constant 2 : index
    %c0_9 = arith.constant 0 : index
    %c0_10 = arith.constant 0 : index
    %14 = vector.load %arg2[%c2, %c0_9, %c0_10] : memref<3x512x512xbf16, #tpu.memory_space<vmem>>, vector<1x512x512xbf16>
    %15 = vector.shape_cast %14 : vector<1x512x512xbf16> to vector<512x512xbf16>
    %cst_11 = arith.constant dense<0.000000e+00> : vector<8x512xf32>
    %16 = tpu.matmul %6, %15, %cst_11 {dimension_numbers = #tpu.dot_dimension_numbers<[1], [0], [0], [1], [0, 0, 1, 1], [], []>} : vector<8x512xbf16>, vector<512x512xbf16>, vector<8x512xf32> -> vector<8x512xf32>
    %17 = arith.addf %13, %16 : vector<8x512xf32>
    %cst_12 = arith.constant dense<0.000000e+00> : vector<512xf32>
    %18 = vector.multi_reduction <add>, %17, %cst_12 [0] : vector<8x512xf32> to vector<512xf32>
    %19 = vector.shape_cast %18 : vector<512xf32> to vector<1x512xf32>
    %c8_i32 = arith.constant 8 : i32
    %20 = tpu.dynamic_rotate %19 by %c8_i32 dim 1 : vector<1x512xf32>, i32 -> vector<1x512xf32>
    %21 = arith.addf %19, %20 : vector<1x512xf32>
    %c16_i32 = arith.constant 16 : i32
    %22 = tpu.dynamic_rotate %21 by %c16_i32 dim 1 : vector<1x512xf32>, i32 -> vector<1x512xf32>
    %23 = arith.addf %21, %22 : vector<1x512xf32>
    %c32_i32 = arith.constant 32 : i32
    %24 = tpu.dynamic_rotate %23 by %c32_i32 dim 1 : vector<1x512xf32>, i32 -> vector<1x512xf32>
    %25 = arith.addf %23, %24 : vector<1x512xf32>
    %c64_i32 = arith.constant 64 : i32
    %26 = tpu.dynamic_rotate %25 by %c64_i32 dim 1 : vector<1x512xf32>, i32 -> vector<1x512xf32>
    %27 = arith.addf %25, %26 : vector<1x512xf32>
    %c128_i32 = arith.constant 128 : i32
    %28 = tpu.dynamic_rotate %27 by %c128_i32 dim 1 : vector<1x512xf32>, i32 -> vector<1x512xf32>
    %29 = arith.addf %27, %28 : vector<1x512xf32>
    %c256_i32 = arith.constant 256 : i32
    %30 = tpu.dynamic_rotate %29 by %c256_i32 dim 1 : vector<1x512xf32>, i32 -> vector<1x512xf32>
    %31 = arith.addf %29, %30 : vector<1x512xf32>
    %32 = arith.mulf %17, %17 : vector<8x512xf32>
    %cst_13 = arith.constant dense<0.000000e+00> : vector<512xf32>
    %33 = vector.multi_reduction <add>, %32, %cst_13 [0] : vector<8x512xf32> to vector<512xf32>
    %34 = vector.shape_cast %33 : vector<512xf32> to vector<1x512xf32>
    %c8_i32_14 = arith.constant 8 : i32
    %35 = tpu.dynamic_rotate %34 by %c8_i32_14 dim 1 : vector<1x512xf32>, i32 -> vector<1x512xf32>
    %36 = arith.addf %34, %35 : vector<1x512xf32>
    %c16_i32_15 = arith.constant 16 : i32
    %37 = tpu.dynamic_rotate %36 by %c16_i32_15 dim 1 : vector<1x512xf32>, i32 -> vector<1x512xf32>
    %38 = arith.addf %36, %37 : vector<1x512xf32>
    %c32_i32_16 = arith.constant 32 : i32
    %39 = tpu.dynamic_rotate %38 by %c32_i32_16 dim 1 : vector<1x512xf32>, i32 -> vector<1x512xf32>
    %40 = arith.addf %38, %39 : vector<1x512xf32>
    %c64_i32_17 = arith.constant 64 : i32
    %41 = tpu.dynamic_rotate %40 by %c64_i32_17 dim 1 : vector<1x512xf32>, i32 -> vector<1x512xf32>
    %42 = arith.addf %40, %41 : vector<1x512xf32>
    %c128_i32_18 = arith.constant 128 : i32
    %43 = tpu.dynamic_rotate %42 by %c128_i32_18 dim 1 : vector<1x512xf32>, i32 -> vector<1x512xf32>
    %44 = arith.addf %42, %43 : vector<1x512xf32>
    %c256_i32_19 = arith.constant 256 : i32
    %45 = tpu.dynamic_rotate %44 by %c256_i32_19 dim 1 : vector<1x512xf32>, i32 -> vector<1x512xf32>
    %46 = arith.addf %44, %45 : vector<1x512xf32>
    %cst_20 = arith.constant 5.120000e+02 : f32
    %47 = vector.broadcast %cst_20 : f32 to vector<1x512xf32>
    %48 = arith.divf %31, %47 : vector<1x512xf32>
    %cst_21 = arith.constant 5.120000e+02 : f32
    %49 = vector.broadcast %cst_21 : f32 to vector<1x512xf32>
    %50 = arith.divf %46, %49 : vector<1x512xf32>
    %51 = arith.mulf %48, %48 : vector<1x512xf32>
    %52 = arith.subf %50, %51 : vector<1x512xf32>
    %cst_22 = arith.constant 9.99999974E-6 : f32
    %53 = vector.broadcast %cst_22 : f32 to vector<1x512xf32>
    %54 = arith.addf %52, %53 : vector<1x512xf32>
    %55 = math.rsqrt %54 : vector<1x512xf32>
    %56 = vector.broadcast %48 : vector<1x512xf32> to vector<8x512xf32>
    %57 = arith.subf %17, %56 : vector<8x512xf32>
    %58 = vector.broadcast %55 : vector<1x512xf32> to vector<8x512xf32>
    %59 = arith.mulf %57, %58 : vector<8x512xf32>
    %cst_23 = arith.constant 0.000000e+00 : f32
    %60 = vector.broadcast %cst_23 : f32 to vector<8x512xf32>
    %61 = arith.maximumf %59, %60 : vector<8x512xf32>
    %62 = arith.truncf %61 : vector<8x512xf32> to vector<8x512xbf16>
    %63 = vector.extract_strided_slice %62 {offsets = [0, 0], sizes = [7, 512], strides = [1, 1]} : vector<8x512xbf16> to vector<7x512xbf16>
    %64 = tpu.concatenate %2, %63 in 0 : vector<1x512xbf16>, vector<7x512xbf16> -> vector<8x512xbf16>
    %65 = vector.extract_strided_slice %62 {offsets = [1, 0], sizes = [7, 512], strides = [1, 1]} : vector<8x512xbf16> to vector<7x512xbf16>
    %66 = tpu.concatenate %65, %2 in 0 : vector<7x512xbf16>, vector<1x512xbf16> -> vector<8x512xbf16>
    %c0_24 = arith.constant 0 : index
    %c0_25 = arith.constant 0 : index
    %c0_26 = arith.constant 0 : index
    %67 = vector.load %arg3[%c0_24, %c0_25, %c0_26] : memref<3x512x512xbf16, #tpu.memory_space<vmem>>, vector<1x512x512xbf16>
    %68 = vector.shape_cast %67 : vector<1x512x512xbf16> to vector<512x512xbf16>
    %cst_27 = arith.constant dense<0.000000e+00> : vector<8x512xf32>
    %69 = tpu.matmul %64, %68, %cst_27 {dimension_numbers = #tpu.dot_dimension_numbers<[1], [0], [0], [1], [0, 0, 1, 1], [], []>} : vector<8x512xbf16>, vector<512x512xbf16>, vector<8x512xf32> -> vector<8x512xf32>
    %c1_28 = arith.constant 1 : index
    %c0_29 = arith.constant 0 : index
    %c0_30 = arith.constant 0 : index
    %70 = vector.load %arg3[%c1_28, %c0_29, %c0_30] : memref<3x512x512xbf16, #tpu.memory_space<vmem>>, vector<1x512x512xbf16>
    %71 = vector.shape_cast %70 : vector<1x512x512xbf16> to vector<512x512xbf16>
    %cst_31 = arith.constant dense<0.000000e+00> : vector<8x512xf32>
    %72 = tpu.matmul %62, %71, %cst_31 {dimension_numbers = #tpu.dot_dimension_numbers<[1], [0], [0], [1], [0, 0, 1, 1], [], []>} : vector<8x512xbf16>, vector<512x512xbf16>, vector<8x512xf32> -> vector<8x512xf32>
    %73 = arith.addf %69, %72 : vector<8x512xf32>
    %c2_32 = arith.constant 2 : index
    %c0_33 = arith.constant 0 : index
    %c0_34 = arith.constant 0 : index
    %74 = vector.load %arg3[%c2_32, %c0_33, %c0_34] : memref<3x512x512xbf16, #tpu.memory_space<vmem>>, vector<1x512x512xbf16>
    %75 = vector.shape_cast %74 : vector<1x512x512xbf16> to vector<512x512xbf16>
    %cst_35 = arith.constant dense<0.000000e+00> : vector<8x512xf32>
    %76 = tpu.matmul %66, %75, %cst_35 {dimension_numbers = #tpu.dot_dimension_numbers<[1], [0], [0], [1], [0, 0, 1, 1], [], []>} : vector<8x512xbf16>, vector<512x512xbf16>, vector<8x512xf32> -> vector<8x512xf32>
    %77 = arith.addf %73, %76 : vector<8x512xf32>
    %cst_36 = arith.constant dense<0.000000e+00> : vector<512xf32>
    %78 = vector.multi_reduction <add>, %77, %cst_36 [0] : vector<8x512xf32> to vector<512xf32>
    %79 = vector.shape_cast %78 : vector<512xf32> to vector<1x512xf32>
    %c8_i32_37 = arith.constant 8 : i32
    %80 = tpu.dynamic_rotate %79 by %c8_i32_37 dim 1 : vector<1x512xf32>, i32 -> vector<1x512xf32>
    %81 = arith.addf %79, %80 : vector<1x512xf32>
    %c16_i32_38 = arith.constant 16 : i32
    %82 = tpu.dynamic_rotate %81 by %c16_i32_38 dim 1 : vector<1x512xf32>, i32 -> vector<1x512xf32>
    %83 = arith.addf %81, %82 : vector<1x512xf32>
    %c32_i32_39 = arith.constant 32 : i32
    %84 = tpu.dynamic_rotate %83 by %c32_i32_39 dim 1 : vector<1x512xf32>, i32 -> vector<1x512xf32>
    %85 = arith.addf %83, %84 : vector<1x512xf32>
    %c64_i32_40 = arith.constant 64 : i32
    %86 = tpu.dynamic_rotate %85 by %c64_i32_40 dim 1 : vector<1x512xf32>, i32 -> vector<1x512xf32>
    %87 = arith.addf %85, %86 : vector<1x512xf32>
    %c128_i32_41 = arith.constant 128 : i32
    %88 = tpu.dynamic_rotate %87 by %c128_i32_41 dim 1 : vector<1x512xf32>, i32 -> vector<1x512xf32>
    %89 = arith.addf %87, %88 : vector<1x512xf32>
    %c256_i32_42 = arith.constant 256 : i32
    %90 = tpu.dynamic_rotate %89 by %c256_i32_42 dim 1 : vector<1x512xf32>, i32 -> vector<1x512xf32>
    %91 = arith.addf %89, %90 : vector<1x512xf32>
    %92 = arith.mulf %77, %77 : vector<8x512xf32>
    %cst_43 = arith.constant dense<0.000000e+00> : vector<512xf32>
    %93 = vector.multi_reduction <add>, %92, %cst_43 [0] : vector<8x512xf32> to vector<512xf32>
    %94 = vector.shape_cast %93 : vector<512xf32> to vector<1x512xf32>
    %c8_i32_44 = arith.constant 8 : i32
    %95 = tpu.dynamic_rotate %94 by %c8_i32_44 dim 1 : vector<1x512xf32>, i32 -> vector<1x512xf32>
    %96 = arith.addf %94, %95 : vector<1x512xf32>
    %c16_i32_45 = arith.constant 16 : i32
    %97 = tpu.dynamic_rotate %96 by %c16_i32_45 dim 1 : vector<1x512xf32>, i32 -> vector<1x512xf32>
    %98 = arith.addf %96, %97 : vector<1x512xf32>
    %c32_i32_46 = arith.constant 32 : i32
    %99 = tpu.dynamic_rotate %98 by %c32_i32_46 dim 1 : vector<1x512xf32>, i32 -> vector<1x512xf32>
    %100 = arith.addf %98, %99 : vector<1x512xf32>
    %c64_i32_47 = arith.constant 64 : i32
    %101 = tpu.dynamic_rotate %100 by %c64_i32_47 dim 1 : vector<1x512xf32>, i32 -> vector<1x512xf32>
    %102 = arith.addf %100, %101 : vector<1x512xf32>
    %c128_i32_48 = arith.constant 128 : i32
    %103 = tpu.dynamic_rotate %102 by %c128_i32_48 dim 1 : vector<1x512xf32>, i32 -> vector<1x512xf32>
    %104 = arith.addf %102, %103 : vector<1x512xf32>
    %c256_i32_49 = arith.constant 256 : i32
    %105 = tpu.dynamic_rotate %104 by %c256_i32_49 dim 1 : vector<1x512xf32>, i32 -> vector<1x512xf32>
    %106 = arith.addf %104, %105 : vector<1x512xf32>
    %cst_50 = arith.constant 5.120000e+02 : f32
    %107 = vector.broadcast %cst_50 : f32 to vector<1x512xf32>
    %108 = arith.divf %91, %107 : vector<1x512xf32>
    %cst_51 = arith.constant 5.120000e+02 : f32
    %109 = vector.broadcast %cst_51 : f32 to vector<1x512xf32>
    %110 = arith.divf %106, %109 : vector<1x512xf32>
    %111 = arith.mulf %108, %108 : vector<1x512xf32>
    %112 = arith.subf %110, %111 : vector<1x512xf32>
    %cst_52 = arith.constant 9.99999974E-6 : f32
    %113 = vector.broadcast %cst_52 : f32 to vector<1x512xf32>
    %114 = arith.addf %112, %113 : vector<1x512xf32>
    %115 = math.rsqrt %114 : vector<1x512xf32>
    %116 = vector.broadcast %108 : vector<1x512xf32> to vector<8x512xf32>
    %117 = arith.subf %77, %116 : vector<8x512xf32>
    %118 = vector.broadcast %115 : vector<1x512xf32> to vector<8x512xf32>
    %119 = arith.mulf %117, %118 : vector<8x512xf32>
    %120 = arith.extf %1 : vector<8x512xbf16> to vector<8x512xf32>
    %121 = arith.addf %120, %119 : vector<8x512xf32>
    %c0_53 = arith.constant 0 : index
    %c0_54 = arith.constant 0 : index
    %c0_55 = arith.constant 0 : index
    %122 = vector.load %arg4[%c0_53, %c0_54, %c0_55] : memref<1x8x512xf32, #tpu.memory_space<vmem>>, vector<1x8x512xf32>
    %123 = vector.shape_cast %122 : vector<1x8x512xf32> to vector<8x512xf32>
    %124 = vector.shape_cast %121 : vector<8x512xf32> to vector<1x8x512xf32>
    tpu.vector_store %arg4[%c0_53, %c0_54, %c0_55], %124 {strides = array<i32>} : memref<1x8x512xf32, #tpu.memory_space<vmem>>, vector<1x8x512xf32>,
    return
  }
  func.func @transform_0(%arg0: i32) -> (i32, i32, i32) {
    %c0_i32 = arith.constant 0 : i32
    %c0_i32_0 = arith.constant 0 : i32
    %c0_i32_1 = arith.constant 0 : i32
    return %arg0, %c0_i32, %c0_i32_0 : i32, i32, i32
  }
  func.func @transform_1(%arg0: i32) -> (i32, i32, i32) {
    %c0_i32 = arith.constant 0 : i32
    %c0_i32_0 = arith.constant 0 : i32
    %c0_i32_1 = arith.constant 0 : i32
    %c0_i32_2 = arith.constant 0 : i32
    return %c0_i32, %c0_i32_0, %c0_i32_1 : i32, i32, i32
  }
  func.func @transform_2(%arg0: i32) -> (i32, i32, i32) {
    %c0_i32 = arith.constant 0 : i32
    %c0_i32_0 = arith.constant 0 : i32
    %c0_i32_1 = arith.constant 0 : i32
    %c0_i32_2 = arith.constant 0 : i32
    return %c0_i32, %c0_i32_0, %c0_i32_1 : i32, i32, i32
  }
  func.func @transform_3(%arg0: i32) -> (i32, i32, i32) {
    %c0_i32 = arith.constant 0 : i32
    %c0_i32_0 = arith.constant 0 : i32
    %c0_i32_1 = arith.constant 0 : i32
    return %arg0, %c0_i32, %c0_i32_0 : i32, i32, i32
  }
}

</mosaic_0001>

<bundles_post_ra>
// kernel: tpu_custom_call.1
= control target key start
LH: loop header
LB: loop body
LE: loop exit
PB: predicated region body
PF: predicated region fallthrough
CT: control target
= control target key end

     0   :  { %8 = vsyncpa [#allocation3], 0  ;;  %s9528_s0 = inlined_call_operand.hbm [shape: bf16[2,8,512], index: 0, kind: input, shape index: {}]   ;;  %s9529_s1 = inlined_call_operand.hbm [shape: bf16[3,512,512], index: 1, kind: input, shape index: {}]   ;;  %s9530_s2 = inlined_call_operand.hbm [shape: bf16[3,512,512], index: 2, kind: input, shape index: {}]   ;;  %s9531_s3 = inlined_call_operand.hbm [shape: f32[2,8,512], index: 3, kind: output, shape index: {}]  }
   0x1   :  { %10 = vsyncpa [#allocation3 + $0x1], 0 }
   0x2   :  { %11 = vsyncpa [#allocation6], 0 }
   0x3   :  { %12 = vsyncpa [#allocation4], 0 }
   0x4   :  { %14 = vsyncpa [#allocation4 + $0x1], 0  ;;  %s8745_s12 = smov 0   ;;  %s8747_s13 = smov 0  }
   0x5   :  { %s8749_s14 = smov 0   ;;  %s8751_s15 = smov 0  }
   0x6 LB: > { %s8766_s16 = sadd.s32 4294967295, %s8713_s15   ;;  %s6534_s17 = sadd.s32 4294967294, %s8713_s15   ;;  %s8713_s15 = sphi %s8751_s15, %s9557_s15   ;;  %s8709_s14 = sphi %s8749_s14, %s9556_s14   ;;  %s8705_s13 = sphi %s8747_s13, %s9555_s13   ;;  %s8701_s12 = sphi %s8745_s12, %s9554_s12  }
   0x7   : > { %p40_p0 = scmp.ne.s32.totalorder %s8705_s13, %s8701_s12  ;;  %p9532_p1 = scmp.eq.s32.totalorder %s8766_s16, 0 }
   0x8   : > { %p112_p3 = scmp.eq.s32.totalorder %s6534_s17, 1  ;;  %p6535_p5 = scmp.ge.s32.totalorder %s8713_s15, 1 }
   0x9   : > { %p8775_p4 = por %p9532_p1, %p40_p0  ;;  %p119_p7 = scmp.lt.s32.totalorder %s8713_s15, 3 }
   0xa   : > { %p8780_p6 = por %p112_p3, %p40_p0  ;;  %s8715_s21 = smov [#allocation5]  }
   0xb   : > { %s9536_s18 = scalar_select %p8775_p4, 1, 0 }
   0xc   : > { %s9537_s19 = scalar_select %p8780_p6, 1, 0 }
   0xd   : > { %p8785_p8 = pnand %p6535_p5, %p119_p7  ;;  %s131_s22 = sshll.u32 %s8715_s21, 4  ;;  %s132_s22 = int_to_ptr.vmem [resolvable:$true] %s131_s22 }
   0xe   : > { %s8716_s24 = smov [#allocation7]   ;;  %s8576_s26 = scalar_lea.vmem %s132_s22, 49152 }
   0xf   : > { %s9538_s20 = scalar_select %p8785_p8, 1, 0 }
  0x10   : > { %p7338_p9 = pneg %p8785_p8  ;;  %s144_s25 = sshll.u32 %s8716_s24, 4  ;;  %s145_s25 = int_to_ptr.vmem [resolvable:$true] %s144_s25 }
  0x11   : > { %p8577_p13 = scmp.ne.s32.totalorder %s132_s22, %s8576_s26  ;;  %p8584_p5 = scmp.lt.s32.totalorder %s132_s22, %s132_s22 }
  0x12   : > { %p8794_p11 = pnand %p7338_p9, %p9532_p1  ;;  %p8585_p7 = scmp.lt.s32.totalorder %s8576_s26, %s8576_s26 }
  0x14   : > { %p8567_p12 = pneg %p8794_p11  ;;  %p8586_p10 = por %p8585_p7, %p8584_p5 }
  0x16   : > { %p8579_p0 = pnand %p8577_p13, %p8567_p12 }
  0x18   : > { %p8580_p3 = pneg %p8579_p0 }
  0x1a   : > { %p8587_p9 = pnand %p8586_p10, %p8580_p3 }
  0x1c   : > { %8590 = shalt.err (!%p8587_p9)
}
  0x1d   : > { %s8717_s27 = smov 256   ;;  %s8718_s28 = smov 16  }
  0x1e   : > { %7341 = dma.hbm_to_vmem [thread:$0]  (!%p8794_p11), %s9529_s1, 49152, %s132_s22, [#allocation6], %s8717_s27, %s8717_s27, %s8718_s28  }
  0x1f   : > { %s8602_s4 = scalar_lea.vmem %s145_s25, 49152  ;;  %p8610_p2 = scmp.lt.s32.totalorder %s145_s25, %s145_s25 }
  0x20   : > { %p8603_p1 = scmp.ne.s32.totalorder %s145_s25, %s8602_s4  ;;  %p8611_p6 = scmp.lt.s32.totalorder %s8602_s4, %s8602_s4 }
  0x22   : > { %p8605_p13 = pnand %p8603_p1, %p8567_p12  ;;  %p8612_p5 = por %p8611_p6, %p8610_p2 }
  0x24   : > { %p8606_p0 = pneg %p8605_p13 }
  0x26   : > { %p8613_p10 = pnand %p8612_p5, %p8606_p0 }
  0x28   : > { %8616 = shalt.err (!%p8613_p10)
}
  0x29   : > { %7344 = dma.hbm_to_vmem [thread:$0]  (!%p8794_p11), %s9530_s2, 49152, %s145_s25, [#allocation6], %s8717_s27, %s8717_s27, %s8718_s28  }
  0x2a   : > { %s8817_s7 = sadd.s32 1, %s8713_s15   ;;  %s27_s8 = sadd.s32 1, %s8709_s14 }
  0x2b   : > { %s24_s9 = ssub.s32 %s8713_s15, %s8817_s7  ;;  %p34_p1 = scmp.ne.s32.totalorder %s8709_s14, %s8705_s13 }
  0x2c   : > { %p25_p2 = scmp.eq.s32.totalorder %s24_s9, 0  ;;  %p35_p6 = scmp.eq.s32.totalorder %s8713_s15, 0 }
  0x2d   : > { %p9540_p12 = scmp.eq.s32.totalorder %s8766_s16, 1  ;;  %p7355_p7 = scmp.lt.s32.totalorder %s8713_s15, 2 }
  0x2e   : > { %s8833_s11 = scalar_select %p25_p2, %s8709_s14, %s27_s8  }
  0x2f   : > { %p8827_p3 = por %p9540_p12, %p34_p1  ;;  %p36_p9 = por %p35_p6, %p34_p1 }
  0x30   : > { %s158_s17 = sand.u32 1, %s8709_s14   ;;  %s7324_s22 = sshll.u32 %s8713_s15, 8 }
  0x31   : > { %s9541_s10 = scalar_select %p8827_p3, 1, 0 }
  0x32   : > { %s6539_s21 = sshll.u32 %s158_s17, 4  ;;  %s8840_s25 = scalar_lea.hbm %s9528_s0, %s7324_s22 }
  0x33   : > { %s162_s26 = scalar_lea.vmem [#allocation2], %s6539_s21  ;;  %p8842_p11 = pnand %p7355_p7, %p36_p9 }
  0x34   : > { %s170_s27 = sshll.u32 %s162_s26, 4  ;;  %s159_s29 = scalar_lea.sflag [#allocation3], %s158_s17  ;;  %s171_s27 = int_to_ptr.vmem [resolvable:$true] %s170_s27 }
  0x35   : > { %s8617_s30 = scalar_lea.hbm %s8840_s25, 256  ;;  %p8619_p0 = pneg %p8842_p11 }
  0x36   : > { %p8618_p13 = scmp.ne.s32.totalorder %s8840_s25, %s8617_s30  ;;  %s8622_s6 = scalar_lea.hbm %s9528_s0, 512 }
  0x37   : > { %p8623_p1 = scmp.lt.s32.totalorder %s8840_s25, %s9528_s0  ;;  %p8624_p2 = scmp.lt.s32.totalorder %s8622_s6, %s8617_s30 }
  0x38   : > { %p8620_p5 = pnand %p8619_p0, %p8618_p13 }
  0x39   : > { %p8625_p6 = por %p8624_p2, %p8623_p1 }
  0x3a   : > { %p8621_p10 = pneg %p8620_p5 }
  0x3c   : > { %p8626_p12 = pnand %p8625_p6, %p8621_p10 }
  0x3e   : > { %8629 = shalt.err (!%p8626_p12)
}
  0x3f   : > { %s8630_s21 = scalar_lea.vmem %s171_s27, 256  ;;  %s8719_s17 = smov [#allocation2]  }
  0x40   : > { %p8631_p7 = scmp.ne.s32.totalorder %s171_s27, %s8630_s21  ;;  %s8635_s22 = sshll.u32 %s8719_s17, 4  ;;  %s8636_s22 = int_to_ptr.vmem [resolvable:$false] %s8635_s22 }
  0x41   : > { %s8637_s23 = scalar_lea.vmem %s8636_s22, 512  ;;  %p8638_p13 = scmp.lt.s32.totalorder %s171_s27, %s8636_s22 }
  0x42   : > { %p8633_p9 = pnand %p8631_p7, %p8619_p0  ;;  %p8639_p5 = scmp.lt.s32.totalorder %s8637_s23, %s8630_s21 }
  0x44   : > { %p8634_p3 = pneg %p8633_p9  ;;  %p8640_p4 = por %p8639_p5, %p8638_p13 }
  0x46   : > { %p8641_p8 = pnand %p8640_p4, %p8634_p3 }
  0x48   : > { %8644 = shalt.err (!%p8641_p8)
}
  0x49   : > { %7348 = dma.hbm_to_vmem [thread:$0]  (!%p8842_p11), %s8840_s25, 256, %s171_s27, %s159_s29  }
  0x4a   : > { %p9543_p10 = scmp.ne.s32.totalorder %s9538_s20, 0 }
  0x4b   : > { %s8863_s24 = sand.u32 (!%p9543_p10), 1, %s8705_s13   ;;  %p9544_p0 = scmp.ne.s32.totalorder (!%p9543_p10), %s9536_s18, 0 }
  0x4c   : > { %179 = sbr.rel (%p9543_p10) target bundleno = 2272 (0x8e0), region = 32  ;;  %s6543_s26 = sshll.u32 (!%p9543_p10), %s8863_s24, 4 }
  0x4d   : > { %s182_s30 = scalar_lea.sflag (!%p9543_p10), [#allocation3], %s8863_s24  ;;  %s8867_s4 = scalar_lea.vmem (!%p9543_p10), [#allocation2], %s6543_s26 }
  0x51   : > { %8688 = dma.done.wait (%p9544_p0), %s182_s30, 256  }
  0x52   : > { %8690 = vsyncadd (%p9544_p0), %s182_s30, 4294967040  ;;  %p9545_p4 = scmp.eq.s32.totalorder %s8766_s16, 0 }
  0x54   : > { %8692 = dma.done.wait (%p9545_p4), [#allocation6], 98304   ;;  %p9546_p8 = pmov %p9545_p4 }
  0x55   : > { %v7399_v0 = vld [vmem:[#allocation5 + $0x4e4] ss:$16 sps:$4 sm:$0xff]   ;;  %v7403_v2 = vld [vmem:[#allocation5 + $0x4e0] ss:$16 sps:$4 sm:$0xff]   ;;  %v218_v48 = vld [vmem:[%s8867_s4 + $0x8] sm:$0xff]  ;;  %vm261_vm1 = vcmask 1040384  }
  0x56   : > { %8694 = vsyncadd (%p9546_p8), [#allocation6], 4294868992  ;;  %v7401_v1 = vld [vmem:[#allocation5 + $0x6e4] ss:$16 sps:$4 sm:$0xff]   ;;  %1188 = vmatprep.subr.bf16.mxu0 %v7399_v0  ;;  %v7404_v3 = vld [vmem:[#allocation5 + $0x6e0] ss:$16 sps:$4 sm:$0xff]   ;;  %v8881_v51 = vcombine.high %v218_v48, %v218_v48 }
  0x57   : > { %1229 = vmatprep.subr.bf16.mxu1 %v7401_v1  ;;  %v7405_v4 = vld [vmem:[#allocation5 + $0x4c4] ss:$16 sps:$4 sm:$0xff]   ;;  %1189 = vmatpush1.bf16.msra.mxu0 %v7403_v2  ;;  %v7409_v6 = vld [vmem:[#allocation5 + $0x4c0] ss:$16 sps:$4 sm:$0xff]   ;;  %vm262_vm0 = vsmask.f32 256 }
  0x58   : > { %1230 = vmatpush1.bf16.msra.mxu1 %v7404_v3  ;;  %v7407_v5 = vld [vmem:[#allocation5 + $0x6c4] ss:$16 sps:$4 sm:$0xff]   ;;  %1190 = vmatprep.subr.bf16.mxu0 %v7405_v4  ;;  %v7410_v7 = vld [vmem:[#allocation5 + $0x6c0] ss:$16 sps:$4 sm:$0xff]   ;;  %v7501_v4 = vld [vmem:[#allocation5 + $0x4ec] ss:$16 sps:$4 sm:$0xff]  }
  0x59   : > { %1231 = vmatprep.subr.bf16.mxu1 %v7407_v5  ;;  %v7411_v8 = vld [vmem:[#allocation5 + $0x4a4] ss:$16 sps:$4 sm:$0xff]   ;;  %v7415_v10 = vld [vmem:[#allocation5 + $0x4a0] ss:$16 sps:$4 sm:$0xff]   ;;  %1261 = vmatprep.mubr.bf16.mxu1 %v8881_v51  ;;  %v7504_v5 = vld [vmem:[#allocation5 + $0x6ec] ss:$16 sps:$4 sm:$0xff]  }
  0x5a   : > { %v7413_v9 = vld [vmem:[#allocation5 + $0x6a4] ss:$16 sps:$4 sm:$0xff]   ;;  %v7416_v11 = vld [vmem:[#allocation5 + $0x6a0] ss:$16 sps:$4 sm:$0xff]   ;;  %vm8906_vm2 = vmand %vm261_vm1, %vm262_vm0  ;;  %vm280_vm3 = vcmask 1043456   ;;  %s8720_s18 = smov 8  }
  0x5b   : > { %1191 = vmatpush1.bf16.msra.mxu0 %v7409_v6  ;;  %v7417_v12 = vld [vmem:[#allocation5 + $0x484] ss:$16 sps:$4 sm:$0xff]   ;;  %v7421_v14 = vld [vmem:[#allocation5 + $0x480] ss:$16 sps:$4 sm:$0xff]   ;;  %vm281_vm4 = vsmask.f32 3328 }
  0x5c   : > { %1232 = vmatpush1.bf16.msra.mxu1 %v7410_v7  ;;  %1192 = vmatprep.subr.bf16.mxu0 %v7411_v8  ;;  %v7419_v13 = vld [vmem:[#allocation5 + $0x684] ss:$16 sps:$4 sm:$0xff]   ;;  %v7422_v15 = vld [vmem:[#allocation5 + $0x680] ss:$16 sps:$4 sm:$0xff]   ;;  %v8887_v7 = vcombine.low %v218_v48, %v218_v48  ;;  %v7499_v8 = vld [vmem:[#allocation5 + $0x4e8] ss:$16 sps:$4 sm:$0xff]  }
  0x5d   : > { %1233 = vmatprep.subr.bf16.mxu1 %v7413_v9  ;;  %v7423_v16 = vld [vmem:[#allocation5 + $0x464] ss:$16 sps:$4 sm:$0xff]   ;;  %v7427_v18 = vld [vmem:[#allocation5 + $0x460] ss:$16 sps:$4 sm:$0xff]   ;;  %v7502_v9 = vld [vmem:[#allocation5 + $0x6e8] ss:$16 sps:$4 sm:$0xff]  }
  0x5e   : > { %v7425_v17 = vld [vmem:[#allocation5 + $0x664] ss:$16 sps:$4 sm:$0xff]   ;;  %v7428_v19 = vld [vmem:[#allocation5 + $0x660] ss:$16 sps:$4 sm:$0xff]   ;;  %v7564_v48 = vld [vmem:[#allocation5 + $0x7ac] ss:$16 sps:$4 sm:$0xff]  }
  0x5f   : > { %1193 = vmatpush1.bf16.msra.mxu0 %v7415_v10  ;;  %v7429_v20 = vld [vmem:[#allocation5 + $0x444] ss:$16 sps:$4 sm:$0xff]   ;;  %v7433_v22 = vld [vmem:[#allocation5 + $0x440] ss:$16 sps:$4 sm:$0xff]   ;;  %v7507_v10 = vld [vmem:[#allocation5 + $0x4cc] ss:$16 sps:$4 sm:$0xff]  }
  0x60   : > { %1234 = vmatpush1.bf16.msra.mxu1 %v7416_v11  ;;  %1194 = vmatprep.subr.bf16.mxu0 %v7417_v12  ;;  %v7431_v21 = vld [vmem:[#allocation5 + $0x644] ss:$16 sps:$4 sm:$0xff]   ;;  %v7434_v23 = vld [vmem:[#allocation5 + $0x640] ss:$16 sps:$4 sm:$0xff]   ;;  %v7510_v11 = vld [vmem:[#allocation5 + $0x6cc] ss:$16 sps:$4 sm:$0xff]  }
  0x61   : > { %1235 = vmatprep.subr.bf16.mxu1 %v7419_v13  ;;  %v7435_v24 = vld [vmem:[#allocation5 + $0x424] ss:$16 sps:$4 sm:$0xff]   ;;  %v7439_v26 = vld [vmem:[#allocation5 + $0x420] ss:$16 sps:$4 sm:$0xff]   ;;  %v7505_v12 = vld [vmem:[#allocation5 + $0x4c8] ss:$16 sps:$4 sm:$0xff]  }
  0x62   : > { %v7437_v25 = vld [vmem:[#allocation5 + $0x624] ss:$16 sps:$4 sm:$0xff]   ;;  %v7440_v27 = vld [vmem:[#allocation5 + $0x620] ss:$16 sps:$4 sm:$0xff]   ;;  %v7508_v13 = vld [vmem:[#allocation5 + $0x6c8] ss:$16 sps:$4 sm:$0xff]  }
  0x63   : > { %1195 = vmatpush1.bf16.msra.mxu0 %v7421_v14  ;;  %v7441_v28 = vld [vmem:[#allocation5 + $0x404] ss:$16 sps:$4 sm:$0xff]   ;;  %v7445_v30 = vld [vmem:[#allocation5 + $0x400] ss:$16 sps:$4 sm:$0xff]   ;;  %v7513_v14 = vld [vmem:[#allocation5 + $0x4ac] ss:$16 sps:$4 sm:$0xff]  }
  0x64   : > { %1236 = vmatpush1.bf16.msra.mxu1 %v7422_v15  ;;  %1196 = vmatprep.subr.bf16.mxu0 %v7423_v16  ;;  %v7443_v29 = vld [vmem:[#allocation5 + $0x604] ss:$16 sps:$4 sm:$0xff]   ;;  %v7446_v31 = vld [vmem:[#allocation5 + $0x600] ss:$16 sps:$4 sm:$0xff]   ;;  %v7516_v15 = vld [vmem:[#allocation5 + $0x6ac] ss:$16 sps:$4 sm:$0xff]  }
  0x65   : > { %1237 = vmatprep.subr.bf16.mxu1 %v7425_v17  ;;  %v7447_v32 = vld [vmem:[#allocation5 + $0x5e4] ss:$16 sps:$4 sm:$0xff]   ;;  %v7451_v34 = vld [vmem:[#allocation5 + $0x5e0] ss:$16 sps:$4 sm:$0xff]   ;;  %v7511_v16 = vld [vmem:[#allocation5 + $0x4a8] ss:$16 sps:$4 sm:$0xff]  }
  0x66   : > { %v7449_v33 = vld [vmem:[#allocation5 + $0x7e4] ss:$16 sps:$4 sm:$0xff]   ;;  %v7452_v35 = vld [vmem:[#allocation5 + $0x7e0] ss:$16 sps:$4 sm:$0xff]   ;;  %v7514_v17 = vld [vmem:[#allocation5 + $0x6a8] ss:$16 sps:$4 sm:$0xff]  }
  0x67   : > { %1197 = vmatpush1.bf16.msra.mxu0 %v7427_v18  ;;  %v7453_v36 = vld [vmem:[#allocation5 + $0x5c4] ss:$16 sps:$4 sm:$0xff]   ;;  %v7457_v38 = vld [vmem:[#allocation5 + $0x5c0] ss:$16 sps:$4 sm:$0xff]   ;;  %v7519_v18 = vld [vmem:[#allocation5 + $0x48c] ss:$16 sps:$4 sm:$0xff]  }
  0x68   : > { %1238 = vmatpush1.bf16.msra.mxu1 %v7428_v19  ;;  %1198 = vmatprep.subr.bf16.mxu0 %v7429_v20  ;;  %v7455_v37 = vld [vmem:[#allocation5 + $0x7c4] ss:$16 sps:$4 sm:$0xff]   ;;  %v7458_v39 = vld [vmem:[#allocation5 + $0x7c0] ss:$16 sps:$4 sm:$0xff]   ;;  %v7522_v19 = vld [vmem:[#allocation5 + $0x68c] ss:$16 sps:$4 sm:$0xff]  }
  0x69   : > { %1239 = vmatprep.subr.bf16.mxu1 %v7431_v21  ;;  %v7459_v40 = vld [vmem:[#allocation5 + $0x5a4] ss:$16 sps:$4 sm:$0xff]   ;;  %v7463_v42 = vld [vmem:[#allocation5 + $0x5a0] ss:$16 sps:$4 sm:$0xff]   ;;  %v7517_v20 = vld [vmem:[#allocation5 + $0x488] ss:$16 sps:$4 sm:$0xff]  }
  0x6a   : > { %v7461_v41 = vld [vmem:[#allocation5 + $0x7a4] ss:$16 sps:$4 sm:$0xff]   ;;  %v7464_v43 = vld [vmem:[#allocation5 + $0x7a0] ss:$16 sps:$4 sm:$0xff]   ;;  %v7520_v21 = vld [vmem:[#allocation5 + $0x688] ss:$16 sps:$4 sm:$0xff]  }
  0x6b   : > { %1199 = vmatpush1.bf16.msra.mxu0 %v7433_v22  ;;  %v7465_v44 = vld [vmem:[#allocation5 + $0x584] ss:$16 sps:$4 sm:$0xff]   ;;  %v7469_v49 = vld [vmem:[#allocation5 + $0x580] ss:$16 sps:$4 sm:$0xff]   ;;  %v7525_v22 = vld [vmem:[#allocation5 + $0x46c] ss:$16 sps:$4 sm:$0xff]  }
  0x6c   : > { %1240 = vmatpush1.bf16.msra.mxu1 %v7434_v23  ;;  %1200 = vmatprep.subr.bf16.mxu0 %v7435_v24  ;;  %v7467_v45 = vld [vmem:[#allocation5 + $0x784] ss:$16 sps:$4 sm:$0xff]   ;;  %v7470_v50 = vld [vmem:[#allocation5 + $0x780] ss:$16 sps:$4 sm:$0xff]   ;;  %v7528_v23 = vld [vmem:[#allocation5 + $0x66c] ss:$16 sps:$4 sm:$0xff]  }
  0x6d   : > { %1241 = vmatprep.subr.bf16.mxu1 %v7437_v25  ;;  %v217_v46 = vld [vmem:[%s8867_s4] sm:$0xff]  ;;  %v7523_v24 = vld [vmem:[#allocation5 + $0x468] ss:$16 sps:$4 sm:$0xff]   ;;  %vm8954_vm5 = vmand %vm280_vm3, %vm281_vm4  ;;  %s8721_s20 = smov 16   ;;  %s8722_s25 = smov 32  }
  0x6e   : > { %v8878_v47 = vcombine.high %v217_v46, %v217_v46  ;;  %v7471_v52 = vld [vmem:[#allocation5 + $0x564] ss:$16 sps:$4 sm:$0xff]   ;;  %v7475_v54 = vld [vmem:[#allocation5 + $0x560] ss:$16 sps:$4 sm:$0xff]   ;;  %v8885_v6 = vcombine.low %v217_v46, %v217_v46  ;;  %v7526_v25 = vld [vmem:[#allocation5 + $0x668] ss:$16 sps:$4 sm:$0xff]  }
  0x6f   : > { %1201 = vmatpush1.bf16.msra.mxu0 %v7439_v26  ;;  %v7473_v53 = vld [vmem:[#allocation5 + $0x764] ss:$16 sps:$4 sm:$0xff]   ;;  %v7476_v55 = vld [vmem:[#allocation5 + $0x760] ss:$16 sps:$4 sm:$0xff]   ;;  %v7531_v26 = vld [vmem:[#allocation5 + $0x44c] ss:$16 sps:$4 sm:$0xff]  }
  0x70   : > { %1242 = vmatpush1.bf16.msra.mxu1 %v7440_v27  ;;  %1202 = vmatprep.subr.bf16.mxu0 %v7441_v28  ;;  %v7477_v56 = vld [vmem:[#allocation5 + $0x544] ss:$16 sps:$4 sm:$0xff]   ;;  %v7481_v58 = vld [vmem:[#allocation5 + $0x540] ss:$16 sps:$4 sm:$0xff]   ;;  %v7534_v27 = vld [vmem:[#allocation5 + $0x64c] ss:$16 sps:$4 sm:$0xff]  }
  0x71   : > { %1243 = vmatprep.subr.bf16.mxu1 %v7443_v29  ;;  %1220 = vmatprep.mubr.bf16.mxu0 %v8878_v47  ;;  %v7479_v57 = vld [vmem:[#allocation5 + $0x744] ss:$16 sps:$4 sm:$0xff]   ;;  %v7482_v59 = vld [vmem:[#allocation5 + $0x740] ss:$16 sps:$4 sm:$0xff]   ;;  %v7529_v28 = vld [vmem:[#allocation5 + $0x448] ss:$16 sps:$4 sm:$0xff]  }
  0x72   : > { %v7483_v60 = vld [vmem:[#allocation5 + $0x524] ss:$16 sps:$4 sm:$0xff]   ;;  %v7487_v62 = vld [vmem:[#allocation5 + $0x520] ss:$16 sps:$4 sm:$0xff]   ;;  %v7532_v29 = vld [vmem:[#allocation5 + $0x648] ss:$16 sps:$4 sm:$0xff]  }
  0x73   : > { %1203 = vmatpush1.bf16.msra.mxu0 %v7445_v30  ;;  %v7485_v61 = vld [vmem:[#allocation5 + $0x724] ss:$16 sps:$4 sm:$0xff]   ;;  %v7488_v63 = vld [vmem:[#allocation5 + $0x720] ss:$16 sps:$4 sm:$0xff]   ;;  %v7537_v30 = vld [vmem:[#allocation5 + $0x42c] ss:$16 sps:$4 sm:$0xff]  }
  0x74   : > { %1244 = vmatpush1.bf16.msra.mxu1 %v7446_v31  ;;  %1204 = vmatprep.subr.bf16.mxu0 %v7447_v32  ;;  %v7489_v0 = vld [vmem:[#allocation5 + $0x504] ss:$16 sps:$4 sm:$0xff]   ;;  %v7493_v2 = vld [vmem:[#allocation5 + $0x500] ss:$16 sps:$4 sm:$0xff]   ;;  %v7540_v31 = vld [vmem:[#allocation5 + $0x62c] ss:$16 sps:$4 sm:$0xff]  }
  0x75   : > { %1245 = vmatprep.subr.bf16.mxu1 %v7449_v33  ;;  %v7491_v1 = vld [vmem:[#allocation5 + $0x704] ss:$16 sps:$4 sm:$0xff]   ;;  %v7494_v3 = vld [vmem:[#allocation5 + $0x700] ss:$16 sps:$4 sm:$0xff]   ;;  %v7535_v32 = vld [vmem:[#allocation5 + $0x428] ss:$16 sps:$4 sm:$0xff]  }
  0x76   : > { %v7538_v33 = vld [vmem:[#allocation5 + $0x628] ss:$16 sps:$4 sm:$0xff]   ;;  %v7561_v46 = vld [vmem:[#allocation5 + $0x5ac] ss:$16 sps:$4 sm:$0xff]   ;;  %s8723_s27 = smov 64   ;;  %s6546_s28 = sshll.u32 %s8863_s24, 5 }
  0x77   : > { %1205 = vmatpush2.bf16.msra.mxu0 %v7451_v34  ;;  %v7543_v34 = vld [vmem:[#allocation5 + $0x40c] ss:$16 sps:$4 sm:$0xff]   ;;  %s7325_s29 = sshll.u32 %s8766_s16, 9  ;;  %s215_s5 = scalar_lea.vmem [#allocation8], %s6546_s28 }
  0x78   : > { %1246 = vmatpush2.bf16.msra.mxu1 %v7452_v35  ;;  %1206 = vmatprep.subr.bf16.mxu0 %v7453_v36  ;;  %v7546_v35 = vld [vmem:[#allocation5 + $0x60c] ss:$16 sps:$4 sm:$0xff]   ;;  %v7541_v36 = vld [vmem:[#allocation5 + $0x408] ss:$16 sps:$4 sm:$0xff]   ;;  %s6445_s6 = sshll.u32 %s215_s5, 4  ;;  %s9485_s21 = scalar_lea.hbm %s9531_s3, %s7325_s29  ;;  %s9487_s6 = int_to_ptr.vmem [resolvable:$true] %s6445_s6 }
  0x79   : > { %1247 = vmatprep.subr.bf16.mxu1 %v7455_v37  ;;  %v7544_v37 = vld [vmem:[#allocation5 + $0x608] ss:$16 sps:$4 sm:$0xff]   ;;  %s6431_s16 = scalar_lea.sflag [#allocation4], %s8863_s24  ;;  %s8645_s17 = scalar_lea.vmem %s9487_s6, 512 }
  0x7a   : > { %p8646_p3 = scmp.ne.s32.totalorder %s9487_s6, %s8645_s17  ;;  %p9551_p11 = scmp.ne.s32.totalorder %s9541_s10, 0 }
  0x7b   : > { %1207 = vmatpush2.bf16.msra.mxu0 %v7457_v38  ;;  %v7549_v38 = vld [vmem:[#allocation5 + $0x5ec] ss:$16 sps:$4 sm:$0xff]   ;;  %s8724_s22 = smov [#allocation8]  }
  0x7c   : > { %1248 = vmatpush2.bf16.msra.mxu1 %v7458_v39  ;;  %1208 = vmatprep.subr.bf16.mxu0 %v7459_v40  ;;  %v7552_v39 = vld [vmem:[#allocation5 + $0x7ec] ss:$16 sps:$4 sm:$0xff]   ;;  %v7547_v40 = vld [vmem:[#allocation5 + $0x5e8] ss:$16 sps:$4 sm:$0xff]   ;;  %p8647_p1 = pnand %p8646_p3, %p9551_p11  ;;  %s8649_s23 = sshll.u32 %s8724_s22, 4  ;;  %s8650_s23 = int_to_ptr.vmem [resolvable:$false] %s8649_s23 }
  0x7d   : > { %1249 = vmatprep.subr.bf16.mxu1 %v7461_v41  ;;  %v7550_v41 = vld [vmem:[#allocation5 + $0x7e8] ss:$16 sps:$4 sm:$0xff]   ;;  %s8651_s26 = scalar_lea.vmem %s8650_s23, 1024  ;;  %p8652_p6 = scmp.lt.s32.totalorder %s9487_s6, %s8650_s23 }
  0x7e   : > { %p8648_p2 = pneg %p8647_p1  ;;  %p8653_p12 = scmp.lt.s32.totalorder %s8651_s26, %s8645_s17 }
  0x7f   : > { %1209 = vmatpush2.bf16.msra.mxu0 %v7463_v42  ;;  %v7555_v42 = vld [vmem:[#allocation5 + $0x5cc] ss:$16 sps:$4 sm:$0xff]  }
  0x80   : > { %1250 = vmatpush2.bf16.msra.mxu1 %v7464_v43  ;;  %1210 = vmatprep.subr.bf16.mxu0 %v7465_v44  ;;  %v7558_v43 = vld [vmem:[#allocation5 + $0x7cc] ss:$16 sps:$4 sm:$0xff]   ;;  %v7553_v44 = vld [vmem:[#allocation5 + $0x5c8] ss:$16 sps:$4 sm:$0xff]   ;;  %p8654_p7 = por %p8653_p12, %p8652_p6 }
  0x81   : > { %1251 = vmatprep.subr.bf16.mxu1 %v7467_v45  ;;  %v7556_v45 = vld [vmem:[#allocation5 + $0x7c8] ss:$16 sps:$4 sm:$0xff]  }
  0x82   : > { %p8655_p9 = pnand %p8654_p7, %p8648_p2 }
  0x83   : > { %1211 = vmatpush2.bf16.msra.mxu0 %v7469_v49  ;;  %v7559_v49 = vld [vmem:[#allocation5 + $0x5a8] ss:$16 sps:$4 sm:$0xff]  }
  0x84   : > { %1252 = vmatpush2.bf16.msra.mxu1 %v7470_v50  ;;  %1212 = vmatprep.subr.bf16.mxu0 %v7471_v52  ;;  %v7562_v50 = vld [vmem:[#allocation5 + $0x7a8] ss:$16 sps:$4 sm:$0xff]   ;;  %v7567_v52 = vld [vmem:[#allocation5 + $0x58c] ss:$16 sps:$4 sm:$0xff]  }
  0x85   : > { %1253 = vmatprep.subr.bf16.mxu1 %v7473_v53  ;;  %v7570_v53 = vld [vmem:[#allocation5 + $0x78c] ss:$16 sps:$4 sm:$0xff]  }
  0x87   : > { %1213 = vmatpush2.bf16.msra.mxu0 %v7475_v54  ;;  %v7565_v54 = vld [vmem:[#allocation5 + $0x588] ss:$16 sps:$4 sm:$0xff]  }
  0x88   : > { %1254 = vmatpush2.bf16.msra.mxu1 %v7476_v55  ;;  %1214 = vmatprep.subr.bf16.mxu0 %v7477_v56  ;;  %v7568_v55 = vld [vmem:[#allocation5 + $0x788] ss:$16 sps:$4 sm:$0xff]   ;;  %v7573_v56 = vld [vmem:[#allocation5 + $0x56c] ss:$16 sps:$4 sm:$0xff]  }
  0x89   : > { %1255 = vmatprep.subr.bf16.mxu1 %v7479_v57  ;;  %v7576_v57 = vld [vmem:[#allocation5 + $0x76c] ss:$16 sps:$4 sm:$0xff]  }
  0x8b   : > { %1215 = vmatpush2.bf16.msra.mxu0 %v7481_v58  ;;  %v7571_v58 = vld [vmem:[#allocation5 + $0x568] ss:$16 sps:$4 sm:$0xff]  }
  0x8c   : > { %1256 = vmatpush2.bf16.msra.mxu1 %v7482_v59  ;;  %1216 = vmatprep.subr.bf16.mxu0 %v7483_v60  ;;  %v7574_v59 = vld [vmem:[#allocation5 + $0x768] ss:$16 sps:$4 sm:$0xff]   ;;  %v7579_v60 = vld [vmem:[#allocation5 + $0x54c] ss:$16 sps:$4 sm:$0xff]  }
  0x8d   : > { %1257 = vmatprep.subr.bf16.mxu1 %v7485_v61  ;;  %v7582_v61 = vld [vmem:[#allocation5 + $0x74c] ss:$16 sps:$4 sm:$0xff]  }
  0x8f   : > { %1217 = vmatpush2.bf16.msra.mxu0 %v7487_v62  ;;  %v7577_v62 = vld [vmem:[#allocation5 + $0x548] ss:$16 sps:$4 sm:$0xff]  }
  0x90   : > { %1258 = vmatpush2.bf16.msra.mxu1 %v7488_v63  ;;  %1218 = vmatprep.subr.bf16.mxu0 %v7489_v0  ;;  %v7580_v63 = vld [vmem:[#allocation5 + $0x748] ss:$16 sps:$4 sm:$0xff]   ;;  %v7585_v0 = vld [vmem:[#allocation5 + $0x52c] ss:$16 sps:$4 sm:$0xff]  }
  0x91   : > { %1259 = vmatprep.subr.bf16.mxu1 %v7491_v1  ;;  %v7588_v1 = vld [vmem:[#allocation5 + $0x72c] ss:$16 sps:$4 sm:$0xff]  }
  0x93   : > { %1219 = vmatpush2.bf16.msra.mxu0 %v7493_v2  ;;  %v237_v2 = vshrl.u32 %v8878_v47, 16 }
  0x94   : > { %1260 = vmatpush2.bf16.msra.mxu1 %v7494_v3  ;;  %1270 = vmatprep.subr.bf16.mxu0 %v7501_v4  ;;  %v251_v3 = vshrl.u32 %v8881_v51, 16  ;;  %v7583_v4 = vld [vmem:[#allocation5 + $0x528] ss:$16 sps:$4 sm:$0xff]  }
  0x95   : > { %1311 = vmatprep.subr.bf16.mxu1 %v7504_v5  ;;  %v7586_v5 = vld [vmem:[#allocation5 + $0x728] ss:$16 sps:$4 sm:$0xff]  }
  0x96   : > { %1221 = vmatmul.mubr.bf16.vlgmr.msra.gmra.mxu0 %v8885_v6 }
  0x97   : > { %1262 = vmatmul.mubr.bf16.vlgmr.msra.gmra.mxu1 %v8887_v7  ;;  %1271 = vmatpush1.bf16.msra.mxu0 %v7499_v8  ;;  %v7591_v8 = vld [vmem:[#allocation5 + $0x50c] ss:$16 sps:$4 sm:$0xff]  }
  0x98   : > { %1312 = vmatpush1.bf16.msra.mxu1 %v7502_v9  ;;  %1272 = vmatprep.subr.bf16.mxu0 %v7507_v10  ;;  %v7594_v9 = vld [vmem:[#allocation5 + $0x70c] ss:$16 sps:$4 sm:$0xff]   ;;  %v239_v10 = vrot.slane %v237_v2, 7 }
  0x99   : > { %1313 = vmatprep.subr.bf16.mxu1 %v7510_v11  ;;  %1302 = vmatprep.mubr.bf16.mxu0 %v8878_v47  ;;  %v240_v11 = vshll.u32 %v8878_v47, 16  ;;  %v7801_v47 = vld [vmem:[#allocation5 + $0x8a4] ss:$16 sps:$4 sm:$0xff]  }
  0x9a   : > { %1343 = vmatprep.mubr.bf16.mxu1 %v8881_v51 }
  0x9b   : > { %1273 = vmatpush1.bf16.msra.mxu0 %v7505_v12  ;;  %v253_v12 = vrot.slane %v251_v3, 7 }
  0x9c   : > { %1314 = vmatpush1.bf16.msra.mxu1 %v7508_v13  ;;  %1274 = vmatprep.subr.bf16.mxu0 %v7513_v14  ;;  %v254_v13 = vshll.u32 %v8881_v51, 16  ;;  %v7589_v14 = vld [vmem:[#allocation5 + $0x508] ss:$16 sps:$4 sm:$0xff]   ;;  %v7804_v51 = vld [vmem:[#allocation5 + $0xaa4] ss:$16 sps:$4 sm:$0xff]  }
  0x9d   : > { %1315 = vmatprep.subr.bf16.mxu1 %v7516_v15  ;;  %v7592_v15 = vld [vmem:[#allocation5 + $0x708] ss:$16 sps:$4 sm:$0xff]  }
  0x9f   : > { %1275 = vmatpush1.bf16.msra.mxu0 %v7511_v16  ;;  %v7597_v16 = vld [vmem:[#allocation5 + $0xe4] ss:$16 sps:$4 sm:$0xff]  }
  0xa0   : > { %1316 = vmatpush1.bf16.msra.mxu1 %v7514_v17  ;;  %1276 = vmatprep.subr.bf16.mxu0 %v7519_v18  ;;  %v7600_v17 = vld [vmem:[#allocation5 + $0x2e4] ss:$16 sps:$4 sm:$0xff]   ;;  %v7595_v18 = vld [vmem:[#allocation5 + $0xe0] ss:$16 sps:$4 sm:$0xff]  }
  0xa1   : > { %1317 = vmatprep.subr.bf16.mxu1 %v7522_v19  ;;  %v242_v19 = vor.u32 %v240_v11, %v239_v10  ;;  %v7664_v10 = vld [vmem:[#allocation5 + $0x380] ss:$16 sps:$4 sm:$0xff]  }
  0xa3   : > { %1277 = vmatpush1.bf16.msra.mxu0 %v7517_v20  ;;  %v256_v20 = vor.u32 %v254_v13, %v253_v12  ;;  %v7669_v12 = vld [vmem:[#allocation5 + $0x164] ss:$16 sps:$4 sm:$0xff]  }
  0xa4   : > { %1318 = vmatpush1.bf16.msra.mxu1 %v7520_v21  ;;  %1278 = vmatprep.subr.bf16.mxu0 %v7525_v22  ;;  %v7598_v21 = vld [vmem:[#allocation5 + $0x2e0] ss:$16 sps:$4 sm:$0xff]   ;;  %v7603_v22 = vld [vmem:[#allocation5 + $0xc4] ss:$16 sps:$4 sm:$0xff]  }
  0xa5   : > { %1319 = vmatprep.subr.bf16.mxu1 %v7528_v23  ;;  %v8282_v23 = vld [vmem:[#allocation7 + $0x2a8] ss:$16 sps:$4 sm:$0xff]  }
  0xa7   : > { %1279 = vmatpush1.bf16.msra.mxu0 %v7523_v24  ;;  %v7606_v24 = vld [vmem:[#allocation5 + $0x2c4] ss:$16 sps:$4 sm:$0xff]  }
  0xa8   : > { %1320 = vmatpush1.bf16.msra.mxu1 %v7526_v25  ;;  %1280 = vmatprep.subr.bf16.mxu0 %v7531_v26  ;;  %v7601_v25 = vld [vmem:[#allocation5 + $0xc0] ss:$16 sps:$4 sm:$0xff]  }
  0xa9   : > { %1321 = vmatprep.subr.bf16.mxu1 %v7534_v27  ;;  %v7604_v26 = vld [vmem:[#allocation5 + $0x2c0] ss:$16 sps:$4 sm:$0xff]   ;;  %v8914_v27 = vsel %vm8906_vm2, 0, %v242_v19  ;;  %v230_v19 = vshrl.u32 %v8885_v6, 16 }
  0xab   : > { %1281 = vmatpush1.bf16.msra.mxu0 %v7529_v28  ;;  %v8918_v28 = vsel %vm8906_vm2, 0, %v256_v20  ;;  %v7673_v20 = vld [vmem:[#allocation5 + $0x140] ss:$16 sps:$4 sm:$0xff]  }
  0xac   : > { %1322 = vmatpush1.bf16.msra.mxu1 %v7532_v29  ;;  %1282 = vmatprep.subr.bf16.mxu0 %v7537_v30  ;;  %v7609_v29 = vld [vmem:[#allocation5 + $0xa4] ss:$16 sps:$4 sm:$0xff]  }
  0xad   : > { %1323 = vmatprep.subr.bf16.mxu1 %v7540_v31  ;;  %v7612_v30 = vld [vmem:[#allocation5 + $0x2a4] ss:$16 sps:$4 sm:$0xff]   ;;  %v7607_v31 = vld [vmem:[#allocation5 + $0xa0] ss:$16 sps:$4 sm:$0xff]  }
  0xaf   : > { %1283 = vmatpush1.bf16.msra.mxu0 %v7535_v32  ;;  %v7610_v32 = vld [vmem:[#allocation5 + $0x2a0] ss:$16 sps:$4 sm:$0xff]  }
  0xb0   : > { %1324 = vmatpush1.bf16.msra.mxu1 %v7538_v33  ;;  %1284 = vmatprep.subr.bf16.mxu0 %v7543_v34  ;;  %v7615_v33 = vld [vmem:[#allocation5 + $0x84] ss:$16 sps:$4 sm:$0xff]  }
  0xb1   : > { %1325 = vmatprep.subr.bf16.mxu1 %v7546_v35  ;;  %v7618_v34 = vld [vmem:[#allocation5 + $0x284] ss:$16 sps:$4 sm:$0xff]   ;;  %v7613_v35 = vld [vmem:[#allocation5 + $0x80] ss:$16 sps:$4 sm:$0xff]  }
  0xb3   : > { %1285 = vmatpush1.bf16.msra.mxu0 %v7541_v36  ;;  %v7616_v36 = vld [vmem:[#allocation5 + $0x280] ss:$16 sps:$4 sm:$0xff]  }
  0xb4   : > { %1326 = vmatpush1.bf16.msra.mxu1 %v7544_v37  ;;  %1286 = vmatprep.subr.bf16.mxu0 %v7549_v38  ;;  %v7621_v37 = vld [vmem:[#allocation5 + $0x64] ss:$16 sps:$4 sm:$0xff]  }
  0xb5   : > { %1327 = vmatprep.subr.bf16.mxu1 %v7552_v39  ;;  %v7624_v38 = vld [vmem:[#allocation5 + $0x264] ss:$16 sps:$4 sm:$0xff]   ;;  %v7619_v39 = vld [vmem:[#allocation5 + $0x60] ss:$16 sps:$4 sm:$0xff]  }
  0xb7   : > { %1287 = vmatpush2.bf16.msra.mxu0 %v7547_v40  ;;  %v7622_v40 = vld [vmem:[#allocation5 + $0x260] ss:$16 sps:$4 sm:$0xff]  }
  0xb8   : > { %1328 = vmatpush2.bf16.msra.mxu1 %v7550_v41  ;;  %1288 = vmatprep.subr.bf16.mxu0 %v7555_v42  ;;  %v7627_v41 = vld [vmem:[#allocation5 + $0x44] ss:$16 sps:$4 sm:$0xff]  }
  0xb9   : > { %1329 = vmatprep.subr.bf16.mxu1 %v7558_v43  ;;  %v7630_v42 = vld [vmem:[#allocation5 + $0x244] ss:$16 sps:$4 sm:$0xff]   ;;  %v7625_v43 = vld [vmem:[#allocation5 + $0x40] ss:$16 sps:$4 sm:$0xff]  }
  0xbb   : > { %1289 = vmatpush2.bf16.msra.mxu0 %v7553_v44  ;;  %v7628_v44 = vld [vmem:[#allocation5 + $0x240] ss:$16 sps:$4 sm:$0xff]  }
  0xbc   : > { %1330 = vmatpush2.bf16.msra.mxu1 %v7556_v45  ;;  %1290 = vmatprep.subr.bf16.mxu0 %v7561_v46  ;;  %v7633_v45 = vld [vmem:[#allocation5 + $0x24] ss:$16 sps:$4 sm:$0xff]  }
  0xbd   : > { %1331 = vmatprep.subr.bf16.mxu1 %v7564_v48  ;;  %v7636_v46 = vld [vmem:[#allocation5 + $0x224] ss:$16 sps:$4 sm:$0xff]   ;;  %v7631_v48 = vld [vmem:[#allocation5 + $0x20] ss:$16 sps:$4 sm:$0xff]  }
  0xbf   : > { %1291 = vmatpush2.bf16.msra.mxu0 %v7559_v49  ;;  %v7634_v49 = vld [vmem:[#allocation5 + $0x220] ss:$16 sps:$4 sm:$0xff]  }
  0xc0   : > { %1332 = vmatpush2.bf16.msra.mxu1 %v7562_v50  ;;  %1292 = vmatprep.subr.bf16.mxu0 %v7567_v52  ;;  %v7639_v50 = vld [vmem:[#allocation5 + $0x4] ss:$16 sps:$4 sm:$0xff]  }
  0xc1   : > { %1333 = vmatprep.subr.bf16.mxu1 %v7570_v53  ;;  %v7642_v52 = vld [vmem:[#allocation5 + $0x204] ss:$16 sps:$4 sm:$0xff]   ;;  %v7637_v53 = vld [vmem:[#allocation5] ss:$16 sps:$4 sm:$0xff]  }
  0xc3   : > { %1293 = vmatpush2.bf16.msra.mxu0 %v7565_v54  ;;  %v7640_v54 = vld [vmem:[#allocation5 + $0x200] ss:$16 sps:$4 sm:$0xff]  }
  0xc4   : > { %1334 = vmatpush2.bf16.msra.mxu1 %v7568_v55  ;;  %1294 = vmatprep.subr.bf16.mxu0 %v7573_v56  ;;  %v7645_v55 = vld [vmem:[#allocation5 + $0x1e4] ss:$16 sps:$4 sm:$0xff]  }
  0xc5   : > { %1335 = vmatprep.subr.bf16.mxu1 %v7576_v57  ;;  %v7648_v56 = vld [vmem:[#allocation5 + $0x3e4] ss:$16 sps:$4 sm:$0xff]   ;;  %v7643_v57 = vld [vmem:[#allocation5 + $0x1e0] ss:$16 sps:$4 sm:$0xff]  }
  0xc7   : > { %1295 = vmatpush2.bf16.msra.mxu0 %v7571_v58  ;;  %v7646_v58 = vld [vmem:[#allocation5 + $0x3e0] ss:$16 sps:$4 sm:$0xff]  }
  0xc8   : > { %1336 = vmatpush2.bf16.msra.mxu1 %v7574_v59  ;;  %1296 = vmatprep.subr.bf16.mxu0 %v7579_v60  ;;  %v7651_v59 = vld [vmem:[#allocation5 + $0x1c4] ss:$16 sps:$4 sm:$0xff]  }
  0xc9   : > { %1337 = vmatprep.subr.bf16.mxu1 %v7582_v61  ;;  %v7654_v60 = vld [vmem:[#allocation5 + $0x3c4] ss:$16 sps:$4 sm:$0xff]   ;;  %v7649_v61 = vld [vmem:[#allocation5 + $0x1c0] ss:$16 sps:$4 sm:$0xff]  }
  0xcb   : > { %1297 = vmatpush2.bf16.msra.mxu0 %v7577_v62  ;;  %v7652_v62 = vld [vmem:[#allocation5 + $0x3c0] ss:$16 sps:$4 sm:$0xff]  }
  0xcc   : > { %1338 = vmatpush2.bf16.msra.mxu1 %v7580_v63  ;;  %1298 = vmatprep.subr.bf16.mxu0 %v7585_v0  ;;  %v7657_v63 = vld [vmem:[#allocation5 + $0x1a4] ss:$16 sps:$4 sm:$0xff]  }
  0xcd   : > { %1339 = vmatprep.subr.bf16.mxu1 %v7588_v1  ;;  %v7660_v0 = vld [vmem:[#allocation5 + $0x3a4] ss:$16 sps:$4 sm:$0xff]   ;;  %v7655_v1 = vld [vmem:[#allocation5 + $0x1a0] ss:$16 sps:$4 sm:$0xff]  }
  0xcf   : > { %1299 = vmatpush2.bf16.msra.mxu0 %v7583_v4  ;;  %v7658_v4 = vld [vmem:[#allocation5 + $0x3a0] ss:$16 sps:$4 sm:$0xff]  }
  0xd0   : > { %1340 = vmatpush2.bf16.msra.mxu1 %v7586_v5  ;;  %1300 = vmatprep.subr.bf16.mxu0 %v7591_v8  ;;  %v7663_v5 = vld [vmem:[#allocation5 + $0x184] ss:$16 sps:$4 sm:$0xff]  }
  0xd1   : > { %1341 = vmatprep.subr.bf16.mxu1 %v7594_v9  ;;  %v7666_v8 = vld [vmem:[#allocation5 + $0x384] ss:$16 sps:$4 sm:$0xff]   ;;  %v7661_v9 = vld [vmem:[#allocation5 + $0x180] ss:$16 sps:$4 sm:$0xff]  }
  0xd3   : > { %1301 = vmatpush2.bf16.msra.mxu0 %v7589_v14  ;;  %v7672_v14 = vld [vmem:[#allocation5 + $0x364] ss:$16 sps:$4 sm:$0xff]  }
  0xd4   : > { %1342 = vmatpush2.bf16.msra.mxu1 %v7592_v15  ;;  %1992 = vmatprep.subr.bf16.mxu0 %v7597_v16  ;;  %v7667_v15 = vld [vmem:[#allocation5 + $0x160] ss:$16 sps:$4 sm:$0xff]  }
  0xd5   : > { %2033 = vmatprep.subr.bf16.mxu1 %v7600_v17  ;;  %v7670_v16 = vld [vmem:[#allocation5 + $0x360] ss:$16 sps:$4 sm:$0xff]   ;;  %v7675_v17 = vld [vmem:[#allocation5 + $0x144] ss:$16 sps:$4 sm:$0xff]  }
  0xd6   : > { %1303 = vmatmul.mubr.bf16.vlgmr.msra.gmra.mxu0 %v8885_v6 }
  0xd7   : > { %1344 = vmatmul.mubr.bf16.vlgmr.msra.gmra.mxu1 %v8887_v7  ;;  %1993 = vmatpush1.bf16.msra.mxu0 %v7595_v18  ;;  %v7678_v18 = vld [vmem:[#allocation5 + $0x344] ss:$16 sps:$4 sm:$0xff]  }
  0xd8   : > { %2034 = vmatpush1.bf16.msra.mxu1 %v7598_v21  ;;  %1994 = vmatprep.subr.bf16.mxu0 %v7603_v22  ;;  %v7676_v21 = vld [vmem:[#allocation5 + $0x340] ss:$16 sps:$4 sm:$0xff]   ;;  %v7681_v22 = vld [vmem:[#allocation5 + $0x124] ss:$16 sps:$4 sm:$0xff]  }
  0xd9   : > { %2035 = vmatprep.subr.bf16.mxu1 %v7606_v24  ;;  %2024 = vmatprep.mubr.bf16.mxu0 %v8914_v27  ;;  %v244_v24 = vshrl.u32 %v8887_v7, 16 }
  0xda   : > { %2065 = vmatprep.mubr.bf16.mxu1 %v8918_v28 }
  0xdb   : > { %1995 = vmatpush1.bf16.msra.mxu0 %v7601_v25  ;;  %v7684_v25 = vld [vmem:[#allocation5 + $0x324] ss:$16 sps:$4 sm:$0xff]  }
  0xdc   : > { %2036 = vmatpush1.bf16.msra.mxu1 %v7604_v26  ;;  %1996 = vmatprep.subr.bf16.mxu0 %v7609_v29  ;;  %v232_v26 = vrot.slane %v230_v19, 7  ;;  %v7679_v29 = vld [vmem:[#allocation5 + $0x120] ss:$16 sps:$4 sm:$0xff]  }
  0xdd   : > { %2037 = vmatprep.subr.bf16.mxu1 %v7612_v30  ;;  %v7682_v30 = vld [vmem:[#allocation5 + $0x320] ss:$16 sps:$4 sm:$0xff]  }
  0xdf   : > { %1997 = vmatpush1.bf16.msra.mxu0 %v7607_v31  ;;  %v233_v31 = vshll.u32 %v8885_v6, 16  ;;  %v7889_v6 = vld [vmem:[#allocation5 + $0x8c8] ss:$16 sps:$4 sm:$0xff]  }
  0xe0   : > { %2038 = vmatpush1.bf16.msra.mxu1 %v7610_v32  ;;  %1998 = vmatprep.subr.bf16.mxu0 %v7615_v33  ;;  %v7687_v32 = vld [vmem:[#allocation5 + $0x104] ss:$16 sps:$4 sm:$0xff]   ;;  %v246_v33 = vrot.slane %v244_v24, 7 }
  0xe1   : > { %2039 = vmatprep.subr.bf16.mxu1 %v7618_v34  ;;  %v247_v34 = vshll.u32 %v8887_v7, 16  ;;  %v7892_v7 = vld [vmem:[#allocation5 + $0xac8] ss:$16 sps:$4 sm:$0xff]  }
  0xe3   : > { %1999 = vmatpush1.bf16.msra.mxu0 %v7613_v35  ;;  %v7690_v35 = vld [vmem:[#allocation5 + $0x304] ss:$16 sps:$4 sm:$0xff]  }
  0xe4   : > { %2040 = vmatpush1.bf16.msra.mxu1 %v7616_v36  ;;  %2000 = vmatprep.subr.bf16.mxu0 %v7621_v37  ;;  %v7685_v36 = vld [vmem:[#allocation5 + $0x100] ss:$16 sps:$4 sm:$0xff]  }
  0xe5   : > { %2041 = vmatprep.subr.bf16.mxu1 %v7624_v38  ;;  %v7688_v37 = vld [vmem:[#allocation5 + $0x300] ss:$16 sps:$4 sm:$0xff]   ;;  %v235_v38 = vor.u32 %v233_v31, %v232_v26  ;;  %v7748_v26 = vld [vmem:[#allocation5 + $0x3c8] ss:$16 sps:$4 sm:$0xff]  }
  0xe7   : > { %2001 = vmatpush1.bf16.msra.mxu0 %v7619_v39  ;;  %v249_v39 = vor.u32 %v247_v34, %v246_v33  ;;  %v7754_v33 = vld [vmem:[#allocation5 + $0x3a8] ss:$16 sps:$4 sm:$0xff]  }
  0xe8   : > { %2042 = vmatpush1.bf16.msra.mxu1 %v7622_v40  ;;  %2002 = vmatprep.subr.bf16.mxu0 %v7627_v41  ;;  %v7693_v40 = vld [vmem:[#allocation5 + $0xec] ss:$16 sps:$4 sm:$0xff]  }
  0xe9   : > { %2043 = vmatprep.subr.bf16.mxu1 %v7630_v42  ;;  %v7696_v41 = vld [vmem:[#allocation5 + $0x2ec] ss:$16 sps:$4 sm:$0xff]   ;;  %v7691_v42 = vld [vmem:[#allocation5 + $0xe8] ss:$16 sps:$4 sm:$0xff]  }
  0xeb   : > { %2003 = vmatpush1.bf16.msra.mxu0 %v7625_v43  ;;  %v7694_v43 = vld [vmem:[#allocation5 + $0x2e8] ss:$16 sps:$4 sm:$0xff]  }
  0xec   : > { %2044 = vmatpush1.bf16.msra.mxu1 %v7628_v44  ;;  %2004 = vmatprep.subr.bf16.mxu0 %v7633_v45  ;;  %v8936_v44 = vsel %vm8906_vm2, 0, %v235_v38  ;;  %v8940_v45 = vsel %vm8906_vm2, 0, %v249_v39  ;;  %v7760_v38 = vld [vmem:[#allocation5 + $0x388] ss:$16 sps:$4 sm:$0xff]   ;;  %v7765_v39 = vld [vmem:[#allocation5 + $0x16c] ss:$16 sps:$4 sm:$0xff]  }
  0xed   : > { %2045 = vmatprep.subr.bf16.mxu1 %v7636_v46  ;;  %v7699_v46 = vld [vmem:[#allocation5 + $0xcc] ss:$16 sps:$4 sm:$0xff]  }
  0xef   : > { %2005 = vmatpush1.bf16.msra.mxu0 %v7631_v48  ;;  %v7702_v48 = vld [vmem:[#allocation5 + $0x2cc] ss:$16 sps:$4 sm:$0xff]  }
  0xf0   : > { %2046 = vmatpush1.bf16.msra.mxu1 %v7634_v49  ;;  %2006 = vmatprep.subr.bf16.mxu0 %v7639_v50  ;;  %v7697_v49 = vld [vmem:[#allocation5 + $0xc8] ss:$16 sps:$4 sm:$0xff]  }
  0xf1   : > { %2047 = vmatprep.subr.bf16.mxu1 %v7642_v52  ;;  %v7700_v50 = vld [vmem:[#allocation5 + $0x2c8] ss:$16 sps:$4 sm:$0xff]   ;;  %v7705_v52 = vld [vmem:[#allocation5 + $0xac] ss:$16 sps:$4 sm:$0xff]  }
  0xf3   : > { %2007 = vmatpush1.bf16.msra.mxu0 %v7637_v53  ;;  %v7708_v53 = vld [vmem:[#allocation5 + $0x2ac] ss:$16 sps:$4 sm:$0xff]  }
  0xf4   : > { %2048 = vmatpush1.bf16.msra.mxu1 %v7640_v54  ;;  %2008 = vmatprep.subr.bf16.mxu0 %v7645_v55  ;;  %v7703_v54 = vld [vmem:[#allocation5 + $0xa8] ss:$16 sps:$4 sm:$0xff]  }
  0xf5   : > { %2049 = vmatprep.subr.bf16.mxu1 %v7648_v56  ;;  %v7706_v55 = vld [vmem:[#allocation5 + $0x2a8] ss:$16 sps:$4 sm:$0xff]   ;;  %v7711_v56 = vld [vmem:[#allocation5 + $0x8c] ss:$16 sps:$4 sm:$0xff]  }
  0xf7   : > { %2009 = vmatpush2.bf16.msra.mxu0 %v7643_v57  ;;  %v7714_v57 = vld [vmem:[#allocation5 + $0x28c] ss:$16 sps:$4 sm:$0xff]  }
  0xf8   : > { %2050 = vmatpush2.bf16.msra.mxu1 %v7646_v58  ;;  %2010 = vmatprep.subr.bf16.mxu0 %v7651_v59  ;;  %v7709_v58 = vld [vmem:[#allocation5 + $0x88] ss:$16 sps:$4 sm:$0xff]  }
  0xf9   : > { %2051 = vmatprep.subr.bf16.mxu1 %v7654_v60  ;;  %v7712_v59 = vld [vmem:[#allocation5 + $0x288] ss:$16 sps:$4 sm:$0xff]   ;;  %v7717_v60 = vld [vmem:[#allocation5 + $0x6c] ss:$16 sps:$4 sm:$0xff]  }
  0xfb   : > { %2011 = vmatpush2.bf16.msra.mxu0 %v7649_v61  ;;  %v7720_v61 = vld [vmem:[#allocation5 + $0x26c] ss:$16 sps:$4 sm:$0xff]  }
  0xfc   : > { %2052 = vmatpush2.bf16.msra.mxu1 %v7652_v62  ;;  %2012 = vmatprep.subr.bf16.mxu0 %v7657_v63  ;;  %v7715_v62 = vld [vmem:[#allocation5 + $0x68] ss:$16 sps:$4 sm:$0xff]   ;;  %v7726_v63 = vld [vmem:[#allocation5 + $0x24c] ss:$16 sps:$4 sm:$0xff]  }
  0xfd   : > { %2053 = vmatprep.subr.bf16.mxu1 %v7660_v0  ;;  %v7721_v0 = vld [vmem:[#allocation5 + $0x48] ss:$16 sps:$4 sm:$0xff]  }
  0xff   : > { %2013 = vmatpush2.bf16.msra.mxu0 %v7655_v1  ;;  %v7724_v1 = vld [vmem:[#allocation5 + $0x248] ss:$16 sps:$4 sm:$0xff]  }
 0x100   : > { %2054 = vmatpush2.bf16.msra.mxu1 %v7658_v4  ;;  %2014 = vmatprep.subr.bf16.mxu0 %v7663_v5  ;;  %v7729_v4 = vld [vmem:[#allocation5 + $0x2c] ss:$16 sps:$4 sm:$0xff]  }
 0x101   : > { %2055 = vmatprep.subr.bf16.mxu1 %v7666_v8  ;;  %v7732_v5 = vld [vmem:[#allocation5 + $0x22c] ss:$16 sps:$4 sm:$0xff]   ;;  %v7727_v8 = vld [vmem:[#allocation5 + $0x28] ss:$16 sps:$4 sm:$0xff]  }
 0x103   : > { %2015 = vmatpush2.bf16.msra.mxu0 %v7661_v9  ;;  %v7730_v9 = vld [vmem:[#allocation5 + $0x228] ss:$16 sps:$4 sm:$0xff]  }
 0x104   : > { %2056 = vmatpush2.bf16.msra.mxu1 %v7664_v10  ;;  %2016 = vmatprep.subr.bf16.mxu0 %v7669_v12  ;;  %v7735_v10 = vld [vmem:[#allocation5 + $0xc] ss:$16 sps:$4 sm:$0xff]  }
 0x105   : > { %2057 = vmatprep.subr.bf16.mxu1 %v7672_v14  ;;  %v7738_v12 = vld [vmem:[#allocation5 + $0x20c] ss:$16 sps:$4 sm:$0xff]   ;;  %v7733_v14 = vld [vmem:[#allocation5 + $0x8] ss:$16 sps:$4 sm:$0xff]  }
 0x107   : > { %2017 = vmatpush2.bf16.msra.mxu0 %v7667_v15  ;;  %v7736_v15 = vld [vmem:[#allocation5 + $0x208] ss:$16 sps:$4 sm:$0xff]  }
 0x108   : > { %2058 = vmatpush2.bf16.msra.mxu1 %v7670_v16  ;;  %2018 = vmatprep.subr.bf16.mxu0 %v7675_v17  ;;  %v7741_v16 = vld [vmem:[#allocation5 + $0x1ec] ss:$16 sps:$4 sm:$0xff]  }
 0x109   : > { %2059 = vmatprep.subr.bf16.mxu1 %v7678_v18  ;;  %v7744_v17 = vld [vmem:[#allocation5 + $0x3ec] ss:$16 sps:$4 sm:$0xff]   ;;  %v7739_v18 = vld [vmem:[#allocation5 + $0x1e8] ss:$16 sps:$4 sm:$0xff]  }
 0x10b   : > { %2019 = vmatpush2.bf16.msra.mxu0 %v7673_v20  ;;  %v7742_v20 = vld [vmem:[#allocation5 + $0x3e8] ss:$16 sps:$4 sm:$0xff]  }
 0x10c   : > { %2060 = vmatpush2.bf16.msra.mxu1 %v7676_v21  ;;  %2020 = vmatprep.subr.bf16.mxu0 %v7681_v22  ;;  %v7747_v21 = vld [vmem:[#allocation5 + $0x1cc] ss:$16 sps:$4 sm:$0xff]  }
 0x10d   : > { %2061 = vmatprep.subr.bf16.mxu1 %v7684_v25  ;;  %v7750_v22 = vld [vmem:[#allocation5 + $0x3cc] ss:$16 sps:$4 sm:$0xff]   ;;  %v7745_v25 = vld [vmem:[#allocation5 + $0x1c8] ss:$16 sps:$4 sm:$0xff]  }
 0x10f   : > { %2021 = vmatpush2.bf16.msra.mxu0 %v7679_v29  ;;  %v7753_v29 = vld [vmem:[#allocation5 + $0x1ac] ss:$16 sps:$4 sm:$0xff]  }
 0x110   : > { %2062 = vmatpush2.bf16.msra.mxu1 %v7682_v30  ;;  %2022 = vmatprep.subr.bf16.mxu0 %v7687_v32  ;;  %v7756_v30 = vld [vmem:[#allocation5 + $0x3ac] ss:$16 sps:$4 sm:$0xff]   ;;  %v7751_v32 = vld [vmem:[#allocation5 + $0x1a8] ss:$16 sps:$4 sm:$0xff]  }
 0x111   : > { %2063 = vmatprep.subr.bf16.mxu1 %v7690_v35  ;;  %v7759_v35 = vld [vmem:[#allocation5 + $0x18c] ss:$16 sps:$4 sm:$0xff]  }
 0x113   : > { %2023 = vmatpush2.bf16.msra.mxu0 %v7685_v36  ;;  %v7762_v36 = vld [vmem:[#allocation5 + $0x38c] ss:$16 sps:$4 sm:$0xff]  }
 0x114   : > { %2064 = vmatpush2.bf16.msra.mxu1 %v7688_v37  ;;  %2074 = vmatprep.subr.bf16.mxu0 %v7693_v40  ;;  %v7757_v37 = vld [vmem:[#allocation5 + $0x188] ss:$16 sps:$4 sm:$0xff]   ;;  %v7768_v40 = vld [vmem:[#allocation5 + $0x36c] ss:$16 sps:$4 sm:$0xff]  }
 0x115   : > { %2115 = vmatprep.subr.bf16.mxu1 %v7696_v41  ;;  %v7763_v41 = vld [vmem:[#allocation5 + $0x168] ss:$16 sps:$4 sm:$0xff]  }
 0x116   : > { %2025 = vmatmul.mubr.bf16.vlgmr.msra.gmra.mxu0 %v8936_v44 }
 0x117   : > { %2066 = vmatmul.mubr.bf16.vlgmr.msra.gmra.mxu1 %v8940_v45  ;;  %2075 = vmatpush1.bf16.msra.mxu0 %v7691_v42  ;;  %v7766_v42 = vld [vmem:[#allocation5 + $0x368] ss:$16 sps:$4 sm:$0xff]  }
 0x118   : > { %2116 = vmatpush1.bf16.msra.mxu1 %v7694_v43  ;;  %2076 = vmatprep.subr.bf16.mxu0 %v7699_v46  ;;  %v7771_v43 = vld [vmem:[#allocation5 + $0x14c] ss:$16 sps:$4 sm:$0xff]  }
 0x119   : > { %2117 = vmatprep.subr.bf16.mxu1 %v7702_v48  ;;  %2106 = vmatprep.mubr.bf16.mxu0 %v8914_v27  ;;  %v7718_v27 = vld [vmem:[#allocation5 + $0x268] ss:$16 sps:$4 sm:$0xff]   ;;  %v7774_v46 = vld [vmem:[#allocation5 + $0x34c] ss:$16 sps:$4 sm:$0xff]  }
 0x11a   : > { %2147 = vmatprep.mubr.bf16.mxu1 %v8918_v28  ;;  %v7723_v28 = vld [vmem:[#allocation5 + $0x4c] ss:$16 sps:$4 sm:$0xff]   ;;  %v7769_v48 = vld [vmem:[#allocation5 + $0x148] ss:$16 sps:$4 sm:$0xff]  }
 0x11b   : > { %2077 = vmatpush1.bf16.msra.mxu0 %v7697_v49  ;;  %v7772_v49 = vld [vmem:[#allocation5 + $0x348] ss:$16 sps:$4 sm:$0xff]  }
 0x11c   : > { %2118 = vmatpush1.bf16.msra.mxu1 %v7700_v50  ;;  %2078 = vmatprep.subr.bf16.mxu0 %v7705_v52  ;;  %v7777_v50 = vld [vmem:[#allocation5 + $0x12c] ss:$16 sps:$4 sm:$0xff]  }
 0x11d   : > { %2119 = vmatprep.subr.bf16.mxu1 %v7708_v53  ;;  %v7780_v52 = vld [vmem:[#allocation5 + $0x32c] ss:$16 sps:$4 sm:$0xff]   ;;  %v7775_v53 = vld [vmem:[#allocation5 + $0x128] ss:$16 sps:$4 sm:$0xff]  }
 0x11f   : > { %2079 = vmatpush1.bf16.msra.mxu0 %v7703_v54  ;;  %v7778_v54 = vld [vmem:[#allocation5 + $0x328] ss:$16 sps:$4 sm:$0xff]  }
 0x120   : > { %2120 = vmatpush1.bf16.msra.mxu1 %v7706_v55  ;;  %2080 = vmatprep.subr.bf16.mxu0 %v7711_v56  ;;  %v7783_v55 = vld [vmem:[#allocation5 + $0x10c] ss:$16 sps:$4 sm:$0xff]  }
 0x121   : > { %2121 = vmatprep.subr.bf16.mxu1 %v7714_v57  ;;  %v7786_v56 = vld [vmem:[#allocation5 + $0x30c] ss:$16 sps:$4 sm:$0xff]   ;;  %v7781_v57 = vld [vmem:[#allocation5 + $0x108] ss:$16 sps:$4 sm:$0xff]  }
 0x123   : > { %2081 = vmatpush1.bf16.msra.mxu0 %v7709_v58  ;;  %v270_v58 = vrot.slane %v240_v11, 1  ;;  %v7790_v11 = vld [vmem:[#allocation5 + $0xae0] ss:$16 sps:$4 sm:$0xff]  }
 0x124   : > { %2122 = vmatpush1.bf16.msra.mxu1 %v7712_v59  ;;  %2082 = vmatprep.subr.bf16.mxu0 %v7717_v60  ;;  %v274_v59 = vrot.slane %v254_v13, 1  ;;  %v7784_v60 = vld [vmem:[#allocation5 + $0x308] ss:$16 sps:$4 sm:$0xff]   ;;  %v8476_v13 = vld [vmem:[#allocation7 + $0xaac] ss:$16 sps:$4 sm:$0xff]  }
 0x125   : > { %2123 = vmatprep.subr.bf16.mxu1 %v7720_v61  ;;  %v7789_v61 = vld [vmem:[#allocation5 + $0x8e4] ss:$16 sps:$4 sm:$0xff]  }
 0x127   : > { %2083 = vmatpush1.bf16.msra.mxu0 %v7715_v62  ;;  %v7792_v62 = vld [vmem:[#allocation5 + $0xae4] ss:$16 sps:$4 sm:$0xff]  }
 0x128   : > { %2124 = vmatpush1.bf16.msra.mxu1 %v7718_v27  ;;  %2084 = vmatprep.subr.bf16.mxu0 %v7723_v28  ;;  %v7787_v27 = vld [vmem:[#allocation5 + $0x8e0] ss:$16 sps:$4 sm:$0xff]   ;;  %v271_v28 = vor.u32 %v270_v58, %v237_v2 }
 0x129   : > { %2125 = vmatprep.subr.bf16.mxu1 %v7726_v63  ;;  %v275_v63 = vor.u32 %v274_v59, %v251_v3  ;;  %v7844_v58 = vld [vmem:[#allocation5 + $0xbc0] ss:$16 sps:$4 sm:$0xff]   ;;  %v7849_v59 = vld [vmem:[#allocation5 + $0x9a4] ss:$16 sps:$4 sm:$0xff]  }
 0x12a   : > { %v8962_v2 = vsel %vm8954_vm5, %v271_v28, 0  ;;  %v7858_v28 = vld [vmem:[#allocation5 + $0xb84] ss:$16 sps:$4 sm:$0xff]  }
 0x12b   : > { %2085 = vmatpush1.bf16.msra.mxu0 %v7721_v0  ;;  %v7795_v0 = vld [vmem:[#allocation5 + $0x8c4] ss:$16 sps:$4 sm:$0xff]   ;;  %v8966_v3 = vsel %vm8954_vm5, %v275_v63, 0  ;;  %v7853_v63 = vld [vmem:[#allocation5 + $0x980] ss:$16 sps:$4 sm:$0xff]  }
 0x12c   : > { %2126 = vmatpush1.bf16.msra.mxu1 %v7724_v1  ;;  %2086 = vmatprep.subr.bf16.mxu0 %v7729_v4  ;;  %v7798_v1 = vld [vmem:[#allocation5 + $0xac4] ss:$16 sps:$4 sm:$0xff]   ;;  %v7793_v4 = vld [vmem:[#allocation5 + $0x8c0] ss:$16 sps:$4 sm:$0xff]  }
 0x12d   : > { %2127 = vmatprep.subr.bf16.mxu1 %v7732_v5  ;;  %v7796_v5 = vld [vmem:[#allocation5 + $0xac0] ss:$16 sps:$4 sm:$0xff]  }
 0x12f   : > { %2087 = vmatpush1.bf16.msra.mxu0 %v7727_v8 }
 0x130   : > { %2128 = vmatpush1.bf16.msra.mxu1 %v7730_v9  ;;  %2088 = vmatprep.subr.bf16.mxu0 %v7735_v10 }
 0x131   : > { %2129 = vmatprep.subr.bf16.mxu1 %v7738_v12 }
 0x133   : > { %2089 = vmatpush1.bf16.msra.mxu0 %v7733_v14 }
 0x134   : > { %2130 = vmatpush1.bf16.msra.mxu1 %v7736_v15  ;;  %2090 = vmatprep.subr.bf16.mxu0 %v7741_v16  ;;  %v7802_v15 = vld [vmem:[#allocation5 + $0xaa0] ss:$16 sps:$4 sm:$0xff]  }
 0x135   : > { %2131 = vmatprep.subr.bf16.mxu1 %v7744_v17 }
 0x137   : > { %2091 = vmatpush2.bf16.msra.mxu0 %v7739_v18  ;;  %v7807_v18 = vld [vmem:[#allocation5 + $0x884] ss:$16 sps:$4 sm:$0xff]  }
 0x138   : > { %2132 = vmatpush2.bf16.msra.mxu1 %v7742_v20  ;;  %2092 = vmatprep.subr.bf16.mxu0 %v7747_v21  ;;  %v7810_v20 = vld [vmem:[#allocation5 + $0xa84] ss:$16 sps:$4 sm:$0xff]  }
 0x139   : > { %2133 = vmatprep.subr.bf16.mxu1 %v7750_v22 }
 0x13b   : > { %2093 = vmatpush2.bf16.msra.mxu0 %v7745_v25  ;;  %v7805_v25 = vld [vmem:[#allocation5 + $0x880] ss:$16 sps:$4 sm:$0xff]  }
 0x13c   : > { %2134 = vmatpush2.bf16.msra.mxu1 %v7748_v26  ;;  %2094 = vmatprep.subr.bf16.mxu0 %v7753_v29  ;;  %v7808_v26 = vld [vmem:[#allocation5 + $0xa80] ss:$16 sps:$4 sm:$0xff]   ;;  %v7813_v29 = vld [vmem:[#allocation5 + $0x864] ss:$16 sps:$4 sm:$0xff]  }
 0x13d   : > { %2135 = vmatprep.subr.bf16.mxu1 %v7756_v30  ;;  %v7816_v30 = vld [vmem:[#allocation5 + $0xa64] ss:$16 sps:$4 sm:$0xff]  }
 0x13f   : > { %2095 = vmatpush2.bf16.msra.mxu0 %v7751_v32  ;;  %v7811_v32 = vld [vmem:[#allocation5 + $0x860] ss:$16 sps:$4 sm:$0xff]  }
 0x140   : > { %2136 = vmatpush2.bf16.msra.mxu1 %v7754_v33  ;;  %2096 = vmatprep.subr.bf16.mxu0 %v7759_v35  ;;  %v7814_v33 = vld [vmem:[#allocation5 + $0xa60] ss:$16 sps:$4 sm:$0xff]   ;;  %v7819_v35 = vld [vmem:[#allocation5 + $0x844] ss:$16 sps:$4 sm:$0xff]  }
 0x141   : > { %2137 = vmatprep.subr.bf16.mxu1 %v7762_v36  ;;  %v7822_v36 = vld [vmem:[#allocation5 + $0xa44] ss:$16 sps:$4 sm:$0xff]  }
 0x143   : > { %2097 = vmatpush2.bf16.msra.mxu0 %v7757_v37  ;;  %v7817_v37 = vld [vmem:[#allocation5 + $0x840] ss:$16 sps:$4 sm:$0xff]  }
 0x144   : > { %2138 = vmatpush2.bf16.msra.mxu1 %v7760_v38  ;;  %2098 = vmatprep.subr.bf16.mxu0 %v7765_v39  ;;  %v7820_v38 = vld [vmem:[#allocation5 + $0xa40] ss:$16 sps:$4 sm:$0xff]   ;;  %v7825_v39 = vld [vmem:[#allocation5 + $0x824] ss:$16 sps:$4 sm:$0xff]  }
 0x145   : > { %2139 = vmatprep.subr.bf16.mxu1 %v7768_v40  ;;  %v7828_v40 = vld [vmem:[#allocation5 + $0xa24] ss:$16 sps:$4 sm:$0xff]  }
 0x147   : > { %2099 = vmatpush2.bf16.msra.mxu0 %v7763_v41  ;;  %v7823_v41 = vld [vmem:[#allocation5 + $0x820] ss:$16 sps:$4 sm:$0xff]  }
 0x148   : > { %2140 = vmatpush2.bf16.msra.mxu1 %v7766_v42  ;;  %2100 = vmatprep.subr.bf16.mxu0 %v7771_v43  ;;  %v7826_v42 = vld [vmem:[#allocation5 + $0xa20] ss:$16 sps:$4 sm:$0xff]   ;;  %v7831_v43 = vld [vmem:[#allocation5 + $0x804] ss:$16 sps:$4 sm:$0xff]  }
 0x149   : > { %2141 = vmatprep.subr.bf16.mxu1 %v7774_v46  ;;  %v7834_v46 = vld [vmem:[#allocation5 + $0xa04] ss:$16 sps:$4 sm:$0xff]  }
 0x14b   : > { %2101 = vmatpush2.bf16.msra.mxu0 %v7769_v48  ;;  %v7829_v48 = vld [vmem:[#allocation5 + $0x800] ss:$16 sps:$4 sm:$0xff]  }
 0x14c   : > { %2142 = vmatpush2.bf16.msra.mxu1 %v7772_v49  ;;  %2102 = vmatprep.subr.bf16.mxu0 %v7777_v50  ;;  %v7832_v49 = vld [vmem:[#allocation5 + $0xa00] ss:$16 sps:$4 sm:$0xff]   ;;  %v7837_v50 = vld [vmem:[#allocation5 + $0x9e4] ss:$16 sps:$4 sm:$0xff]  }
 0x14d   : > { %2143 = vmatprep.subr.bf16.mxu1 %v7780_v52  ;;  %v7840_v52 = vld [vmem:[#allocation5 + $0xbe4] ss:$16 sps:$4 sm:$0xff]  }
 0x14f   : > { %2103 = vmatpush2.bf16.msra.mxu0 %v7775_v53  ;;  %v7835_v53 = vld [vmem:[#allocation5 + $0x9e0] ss:$16 sps:$4 sm:$0xff]  }
 0x150   : > { %2144 = vmatpush2.bf16.msra.mxu1 %v7778_v54  ;;  %2104 = vmatprep.subr.bf16.mxu0 %v7783_v55  ;;  %v7838_v54 = vld [vmem:[#allocation5 + $0xbe0] ss:$16 sps:$4 sm:$0xff]   ;;  %v7843_v55 = vld [vmem:[#allocation5 + $0x9c4] ss:$16 sps:$4 sm:$0xff]  }
 0x151   : > { %2145 = vmatprep.subr.bf16.mxu1 %v7786_v56  ;;  %v7846_v56 = vld [vmem:[#allocation5 + $0xbc4] ss:$16 sps:$4 sm:$0xff]  }
 0x153   : > { %2105 = vmatpush2.bf16.msra.mxu0 %v7781_v57  ;;  %v7841_v57 = vld [vmem:[#allocation5 + $0x9c0] ss:$16 sps:$4 sm:$0xff]  }
 0x154   : > { %2146 = vmatpush2.bf16.msra.mxu1 %v7784_v60  ;;  %2925 = vmatprep.subr.bf16.mxu0 %v7789_v61  ;;  %v7852_v60 = vld [vmem:[#allocation5 + $0xba4] ss:$16 sps:$4 sm:$0xff]   ;;  %v7847_v61 = vld [vmem:[#allocation5 + $0x9a0] ss:$16 sps:$4 sm:$0xff]  }
 0x155   : > { %2966 = vmatprep.subr.bf16.mxu1 %v7792_v62  ;;  %v7850_v62 = vld [vmem:[#allocation5 + $0xba0] ss:$16 sps:$4 sm:$0xff]  }
 0x156   : > { %v1222_v8 = vpop.f32.mrf.mxu0  ;;  %2107 = vmatmul.mubr.bf16.vlgmr.msra.gmra.mxu0 %v8936_v44 }
 0x157   : > { %v1263_v9 = vpop.f32.mrf.mxu1  ;;  %2148 = vmatmul.mubr.bf16.vlgmr.msra.gmra.mxu1 %v8940_v45  ;;  %2926 = vmatpush1.bf16.msra.mxu0 %v7787_v27  ;;  %v7799_v45 = vld [vmem:[#allocation5 + $0x8a0] ss:$16 sps:$4 sm:$0xff]   ;;  %v7855_v27 = vld [vmem:[#allocation5 + $0x984] ss:$16 sps:$4 sm:$0xff]  }
 0x158   : > { %v8968_v10 = vadd.f32 %v1263_v9, %v1222_v8  ;;  %2967 = vmatpush1.bf16.msra.mxu1 %v7790_v11  ;;  %v1224_v12 = vpop.f32.mrf.mxu0  ;;  %2927 = vmatprep.subr.bf16.mxu0 %v7795_v0  ;;  %v7856_v11 = vld [vmem:[#allocation5 + $0xb80] ss:$16 sps:$4 sm:$0xff]   ;;  %v7861_v0 = vld [vmem:[#allocation5 + $0x964] ss:$16 sps:$4 sm:$0xff]  }
 0x159   : > { %v1265_v14 = vpop.f32.mrf.mxu1  ;;  %2968 = vmatprep.subr.bf16.mxu1 %v7798_v1  ;;  %2957 = vmatprep.mubr.bf16.mxu0 %v8962_v2  ;;  %v7864_v1 = vld [vmem:[#allocation5 + $0xb64] ss:$16 sps:$4 sm:$0xff]  }
 0x15a   : > { %v8970_v44 = vadd.f32 %v1265_v14, %v1224_v12  ;;  %2998 = vmatprep.mubr.bf16.mxu1 %v8966_v3  ;;  %v1226_v16 = vpop.f32.mrf.mxu0  ;;  %v7867_v8 = vld [vmem:[#allocation5 + $0x944] ss:$16 sps:$4 sm:$0xff]  }
 0x15b   : > { %v1267_v17 = vpop.f32.mrf.mxu1  ;;  %2928 = vmatpush1.bf16.msra.mxu0 %v7793_v4  ;;  %v7859_v4 = vld [vmem:[#allocation5 + $0x960] ss:$16 sps:$4 sm:$0xff]   ;;  %v7870_v9 = vld [vmem:[#allocation5 + $0xb44] ss:$16 sps:$4 sm:$0xff]  }
 0x15c   : > { %2969 = vmatpush1.bf16.msra.mxu1 %v7796_v5  ;;  %v1227_v21 = vpop.f32.mrf.mxu0  ;;  %2929 = vmatprep.subr.bf16.mxu0 %v7801_v47  ;;  %v7862_v5 = vld [vmem:[#allocation5 + $0xb60] ss:$16 sps:$4 sm:$0xff]   ;;  %v7873_v12 = vld [vmem:[#allocation5 + $0x924] ss:$16 sps:$4 sm:$0xff]  }
 0x15d   : > { %v1268_v22 = vpop.f32.mrf.mxu1  ;;  %2970 = vmatprep.subr.bf16.mxu1 %v7804_v51  ;;  %v7865_v47 = vld [vmem:[#allocation5 + $0x940] ss:$16 sps:$4 sm:$0xff]   ;;  %v7876_v14 = vld [vmem:[#allocation5 + $0xb24] ss:$16 sps:$4 sm:$0xff]  }
 0x15e   : > { %v7868_v51 = vld [vmem:[#allocation5 + $0xb40] ss:$16 sps:$4 sm:$0xff]   ;;  %v7879_v16 = vld [vmem:[#allocation5 + $0x904] ss:$16 sps:$4 sm:$0xff]  }
 0x15f   : > { %2930 = vmatpush1.bf16.msra.mxu0 %v7799_v45  ;;  %v7871_v45 = vld [vmem:[#allocation5 + $0x920] ss:$16 sps:$4 sm:$0xff]   ;;  %v7882_v17 = vld [vmem:[#allocation5 + $0xb04] ss:$16 sps:$4 sm:$0xff]  }
 0x160   : > { %2971 = vmatpush1.bf16.msra.mxu1 %v7802_v15  ;;  %2931 = vmatprep.subr.bf16.mxu0 %v7807_v18  ;;  %v7874_v15 = vld [vmem:[#allocation5 + $0xb20] ss:$16 sps:$4 sm:$0xff]   ;;  %v268_v18 = vrot.slane %v233_v31, 1  ;;  %v7883_v31 = vld [vmem:[#allocation5 + $0x8e8] ss:$16 sps:$4 sm:$0xff]  }
 0x161   : > { %2972 = vmatprep.subr.bf16.mxu1 %v7810_v20  ;;  %v272_v20 = vrot.slane %v247_v34, 1  ;;  %v7877_v21 = vld [vmem:[#allocation5 + $0x900] ss:$16 sps:$4 sm:$0xff]   ;;  %v7894_v34 = vld [vmem:[#allocation5 + $0xacc] ss:$16 sps:$4 sm:$0xff]  }
 0x162   : > { %v7880_v22 = vld [vmem:[#allocation5 + $0xb00] ss:$16 sps:$4 sm:$0xff]  }
 0x163   : > { %2932 = vmatpush1.bf16.msra.mxu0 %v7805_v25  ;;  %v7885_v25 = vld [vmem:[#allocation5 + $0x8ec] ss:$16 sps:$4 sm:$0xff]  }
 0x164   : > { %2973 = vmatpush1.bf16.msra.mxu1 %v7808_v26  ;;  %2933 = vmatprep.subr.bf16.mxu0 %v7813_v29  ;;  %v7888_v26 = vld [vmem:[#allocation5 + $0xaec] ss:$16 sps:$4 sm:$0xff]   ;;  %v269_v29 = vor.u32 %v268_v18, %v230_v19  ;;  %v7943_v18 = vld [vmem:[#allocation5 + $0x9a8] ss:$16 sps:$4 sm:$0xff]  }
 0x165   : > { %2974 = vmatprep.subr.bf16.mxu1 %v7816_v30  ;;  %v273_v30 = vor.u32 %v272_v20, %v244_v24  ;;  %v7946_v20 = vld [vmem:[#allocation5 + $0xba8] ss:$16 sps:$4 sm:$0xff]  }
 0x167   : > { %2934 = vmatpush1.bf16.msra.mxu0 %v7811_v32  ;;  %v7886_v32 = vld [vmem:[#allocation5 + $0xae8] ss:$16 sps:$4 sm:$0xff]  }
 0x168   : > { %2975 = vmatpush1.bf16.msra.mxu1 %v7814_v33  ;;  %2935 = vmatprep.subr.bf16.mxu0 %v7819_v35  ;;  %v7891_v33 = vld [vmem:[#allocation5 + $0x8cc] ss:$16 sps:$4 sm:$0xff]   ;;  %v8984_v35 = vsel %vm8954_vm5, %v269_v29, 0 }
 0x169   : > { %2976 = vmatprep.subr.bf16.mxu1 %v7822_v36  ;;  %v8988_v36 = vsel %vm8954_vm5, %v273_v30, 0  ;;  %v7957_v29 = vld [vmem:[#allocation5 + $0x96c] ss:$16 sps:$4 sm:$0xff]  }
 0x16a   : > { %v7960_v30 = vld [vmem:[#allocation5 + $0xb6c] ss:$16 sps:$4 sm:$0xff]  }
 0x16b   : > { %2936 = vmatpush1.bf16.msra.mxu0 %v7817_v37  ;;  %v7897_v37 = vld [vmem:[#allocation5 + $0x8ac] ss:$16 sps:$4 sm:$0xff]  }
 0x16c   : > { %2977 = vmatpush1.bf16.msra.mxu1 %v7820_v38  ;;  %2937 = vmatprep.subr.bf16.mxu0 %v7825_v39  ;;  %v7900_v38 = vld [vmem:[#allocation5 + $0xaac] ss:$16 sps:$4 sm:$0xff]  }
 0x16d   : > { %2978 = vmatprep.subr.bf16.mxu1 %v7828_v40 }
 0x16f   : > { %2938 = vmatpush1.bf16.msra.mxu0 %v7823_v41 }
 0x170   : > { %2979 = vmatpush1.bf16.msra.mxu1 %v7826_v42  ;;  %2939 = vmatprep.subr.bf16.mxu0 %v7831_v43  ;;  %v7895_v43 = vld [vmem:[#allocation5 + $0x8a8] ss:$16 sps:$4 sm:$0xff]  }
 0x171   : > { %2980 = vmatprep.subr.bf16.mxu1 %v7834_v46  ;;  %v7898_v46 = vld [vmem:[#allocation5 + $0xaa8] ss:$16 sps:$4 sm:$0xff]  }
 0x173   : > { %2940 = vmatpush1.bf16.msra.mxu0 %v7829_v48 }
 0x174   : > { %2981 = vmatpush1.bf16.msra.mxu1 %v7832_v49  ;;  %2941 = vmatprep.subr.bf16.mxu0 %v7837_v50  ;;  %v7903_v50 = vld [vmem:[#allocation5 + $0x88c] ss:$16 sps:$4 sm:$0xff]  }
 0x175   : > { %2982 = vmatprep.subr.bf16.mxu1 %v7840_v52  ;;  %v7906_v52 = vld [vmem:[#allocation5 + $0xa8c] ss:$16 sps:$4 sm:$0xff]  }
 0x177   : > { %2942 = vmatpush2.bf16.msra.mxu0 %v7835_v53 }
 0x178   : > { %2983 = vmatpush2.bf16.msra.mxu1 %v7838_v54  ;;  %2943 = vmatprep.subr.bf16.mxu0 %v7843_v55  ;;  %v7901_v55 = vld [vmem:[#allocation5 + $0x888] ss:$16 sps:$4 sm:$0xff]  }
 0x179   : > { %2984 = vmatprep.subr.bf16.mxu1 %v7846_v56  ;;  %v7904_v56 = vld [vmem:[#allocation5 + $0xa88] ss:$16 sps:$4 sm:$0xff]  }
 0x17b   : > { %2944 = vmatpush2.bf16.msra.mxu0 %v7841_v57  ;;  %v7909_v57 = vld [vmem:[#allocation5 + $0x86c] ss:$16 sps:$4 sm:$0xff]  }
 0x17c   : > { %2985 = vmatpush2.bf16.msra.mxu1 %v7844_v58  ;;  %2945 = vmatprep.subr.bf16.mxu0 %v7849_v59  ;;  %v7912_v58 = vld [vmem:[#allocation5 + $0xa6c] ss:$16 sps:$4 sm:$0xff]  }
 0x17d   : > { %2986 = vmatprep.subr.bf16.mxu1 %v7852_v60  ;;  %v7915_v59 = vld [vmem:[#allocation5 + $0x84c] ss:$16 sps:$4 sm:$0xff]  }
 0x17e   : > { %v7918_v60 = vld [vmem:[#allocation5 + $0xa4c] ss:$16 sps:$4 sm:$0xff]  }
 0x17f   : > { %2946 = vmatpush2.bf16.msra.mxu0 %v7847_v61  ;;  %v7913_v61 = vld [vmem:[#allocation5 + $0x848] ss:$16 sps:$4 sm:$0xff]  }
 0x180   : > { %2987 = vmatpush2.bf16.msra.mxu1 %v7850_v62  ;;  %2947 = vmatprep.subr.bf16.mxu0 %v7855_v27  ;;  %v7916_v62 = vld [vmem:[#allocation5 + $0xa48] ss:$16 sps:$4 sm:$0xff]   ;;  %v7921_v27 = vld [vmem:[#allocation5 + $0x82c] ss:$16 sps:$4 sm:$0xff]  }
 0x181   : > { %2988 = vmatprep.subr.bf16.mxu1 %v7858_v28  ;;  %v7924_v28 = vld [vmem:[#allocation5 + $0xa2c] ss:$16 sps:$4 sm:$0xff]  }
 0x183   : > { %2948 = vmatpush2.bf16.msra.mxu0 %v7853_v63  ;;  %v7919_v63 = vld [vmem:[#allocation5 + $0x828] ss:$16 sps:$4 sm:$0xff]  }
 0x184   : > { %2989 = vmatpush2.bf16.msra.mxu1 %v7856_v11  ;;  %2949 = vmatprep.subr.bf16.mxu0 %v7861_v0  ;;  %v7922_v11 = vld [vmem:[#allocation5 + $0xa28] ss:$16 sps:$4 sm:$0xff]   ;;  %v7927_v0 = vld [vmem:[#allocation5 + $0x80c] ss:$16 sps:$4 sm:$0xff]  }
 0x185   : > { %2990 = vmatprep.subr.bf16.mxu1 %v7864_v1  ;;  %v7930_v1 = vld [vmem:[#allocation5 + $0xa0c] ss:$16 sps:$4 sm:$0xff]  }
 0x187   : > { %2950 = vmatpush2.bf16.msra.mxu0 %v7859_v4  ;;  %v7925_v4 = vld [vmem:[#allocation5 + $0x808] ss:$16 sps:$4 sm:$0xff]  }
 0x188   : > { %2991 = vmatpush2.bf16.msra.mxu1 %v7862_v5  ;;  %2951 = vmatprep.subr.bf16.mxu0 %v7867_v8  ;;  %v7928_v5 = vld [vmem:[#allocation5 + $0xa08] ss:$16 sps:$4 sm:$0xff]   ;;  %v7933_v8 = vld [vmem:[#allocation5 + $0x9ec] ss:$16 sps:$4 sm:$0xff]  }
 0x189   : > { %2992 = vmatprep.subr.bf16.mxu1 %v7870_v9  ;;  %v7936_v9 = vld [vmem:[#allocation5 + $0xbec] ss:$16 sps:$4 sm:$0xff]  }
 0x18b   : > { %2952 = vmatpush2.bf16.msra.mxu0 %v7865_v47  ;;  %v7931_v47 = vld [vmem:[#allocation5 + $0x9e8] ss:$16 sps:$4 sm:$0xff]  }
 0x18c   : > { %2993 = vmatpush2.bf16.msra.mxu1 %v7868_v51  ;;  %2953 = vmatprep.subr.bf16.mxu0 %v7873_v12  ;;  %v7934_v51 = vld [vmem:[#allocation5 + $0xbe8] ss:$16 sps:$4 sm:$0xff]   ;;  %v7939_v12 = vld [vmem:[#allocation5 + $0x9cc] ss:$16 sps:$4 sm:$0xff]  }
 0x18d   : > { %2994 = vmatprep.subr.bf16.mxu1 %v7876_v14  ;;  %v7942_v14 = vld [vmem:[#allocation5 + $0xbcc] ss:$16 sps:$4 sm:$0xff]  }
 0x18f   : > { %2954 = vmatpush2.bf16.msra.mxu0 %v7871_v45  ;;  %v7937_v45 = vld [vmem:[#allocation5 + $0x9c8] ss:$16 sps:$4 sm:$0xff]  }
 0x190   : > { %2995 = vmatpush2.bf16.msra.mxu1 %v7874_v15  ;;  %2955 = vmatprep.subr.bf16.mxu0 %v7879_v16  ;;  %v7940_v15 = vld [vmem:[#allocation5 + $0xbc8] ss:$16 sps:$4 sm:$0xff]   ;;  %v7945_v16 = vld [vmem:[#allocation5 + $0x9ac] ss:$16 sps:$4 sm:$0xff]  }
 0x191   : > { %2996 = vmatprep.subr.bf16.mxu1 %v7882_v17  ;;  %v7948_v17 = vld [vmem:[#allocation5 + $0xbac] ss:$16 sps:$4 sm:$0xff]  }
 0x193   : > { %2956 = vmatpush2.bf16.msra.mxu0 %v7877_v21  ;;  %v7951_v21 = vld [vmem:[#allocation5 + $0x98c] ss:$16 sps:$4 sm:$0xff]  }
 0x194   : > { %2997 = vmatpush2.bf16.msra.mxu1 %v7880_v22  ;;  %3007 = vmatprep.subr.bf16.mxu0 %v7885_v25  ;;  %v7954_v22 = vld [vmem:[#allocation5 + $0xb8c] ss:$16 sps:$4 sm:$0xff]   ;;  %v7949_v25 = vld [vmem:[#allocation5 + $0x988] ss:$16 sps:$4 sm:$0xff]  }
 0x195   : > { %3048 = vmatprep.subr.bf16.mxu1 %v7888_v26  ;;  %v7952_v26 = vld [vmem:[#allocation5 + $0xb88] ss:$16 sps:$4 sm:$0xff]  }
 0x196   : > { %v1304_v19 = vpop.f32.mrf.mxu0  ;;  %2958 = vmatmul.mubr.bf16.vlgmr.msra.gmra.mxu0 %v8984_v35 }
 0x197   : > { %v1345_v24 = vpop.f32.mrf.mxu1  ;;  %2999 = vmatmul.mubr.bf16.vlgmr.msra.gmra.mxu1 %v8988_v36  ;;  %3008 = vmatpush1.bf16.msra.mxu0 %v7883_v31  ;;  %v7955_v31 = vld [vmem:[#allocation5 + $0x968] ss:$16 sps:$4 sm:$0xff]  }
 0x198   : > { %v8992_v39 = vadd.f32 %v1345_v24, %v1304_v19  ;;  %3049 = vmatpush1.bf16.msra.mxu1 %v7886_v32  ;;  %v1306_v40 = vpop.f32.mrf.mxu0  ;;  %3009 = vmatprep.subr.bf16.mxu0 %v7891_v33  ;;  %v7958_v32 = vld [vmem:[#allocation5 + $0xb68] ss:$16 sps:$4 sm:$0xff]   ;;  %v7963_v33 = vld [vmem:[#allocation5 + $0x94c] ss:$16 sps:$4 sm:$0xff]  }
 0x199   : > { %v1347_v41 = vpop.f32.mrf.mxu1  ;;  %3050 = vmatprep.subr.bf16.mxu1 %v7894_v34  ;;  %3039 = vmatprep.mubr.bf16.mxu0 %v8962_v2  ;;  %v7907_v2 = vld [vmem:[#allocation5 + $0x868] ss:$16 sps:$4 sm:$0xff]   ;;  %v7966_v34 = vld [vmem:[#allocation5 + $0xb4c] ss:$16 sps:$4 sm:$0xff]  }
 0x19a   : > { %v8994_v42 = vadd.f32 %v1347_v41, %v1306_v40  ;;  %3080 = vmatprep.mubr.bf16.mxu1 %v8966_v3  ;;  %v1308_v48 = vpop.f32.mrf.mxu0  ;;  %v7910_v3 = vld [vmem:[#allocation5 + $0xa68] ss:$16 sps:$4 sm:$0xff]   ;;  %v7969_v19 = vld [vmem:[#allocation5 + $0x92c] ss:$16 sps:$4 sm:$0xff]  }
 0x19b   : > { %v1349_v49 = vpop.f32.mrf.mxu1  ;;  %3010 = vmatpush1.bf16.msra.mxu0 %v7889_v6  ;;  %v7961_v6 = vld [vmem:[#allocation5 + $0x948] ss:$16 sps:$4 sm:$0xff]   ;;  %v7972_v24 = vld [vmem:[#allocation5 + $0xb2c] ss:$16 sps:$4 sm:$0xff]  }
 0x19c   : > { %3051 = vmatpush1.bf16.msra.mxu1 %v7892_v7  ;;  %v1309_v53 = vpop.f32.mrf.mxu0  ;;  %3011 = vmatprep.subr.bf16.mxu0 %v7897_v37  ;;  %v7964_v7 = vld [vmem:[#allocation5 + $0xb48] ss:$16 sps:$4 sm:$0xff]   ;;  %v7975_v40 = vld [vmem:[#allocation5 + $0x90c] ss:$16 sps:$4 sm:$0xff]  }
 0x19d   : > { %v1350_v54 = vpop.f32.mrf.mxu1  ;;  %3052 = vmatprep.subr.bf16.mxu1 %v7900_v38  ;;  %v7967_v37 = vld [vmem:[#allocation5 + $0x928] ss:$16 sps:$4 sm:$0xff]   ;;  %v7978_v41 = vld [vmem:[#allocation5 + $0xb0c] ss:$16 sps:$4 sm:$0xff]  }
 0x19e   : > { %v7970_v38 = vld [vmem:[#allocation5 + $0xb28] ss:$16 sps:$4 sm:$0xff]  }
 0x19f   : > { %3012 = vmatpush1.bf16.msra.mxu0 %v7895_v43  ;;  %v7973_v43 = vld [vmem:[#allocation5 + $0x908] ss:$16 sps:$4 sm:$0xff]  }
 0x1a0   : > { %3053 = vmatpush1.bf16.msra.mxu1 %v7898_v46  ;;  %3013 = vmatprep.subr.bf16.mxu0 %v7903_v50  ;;  %v7976_v46 = vld [vmem:[#allocation5 + $0xb08] ss:$16 sps:$4 sm:$0xff]  }
 0x1a1   : > { %3054 = vmatprep.subr.bf16.mxu1 %v7906_v52 }
 0x1a3   : > { %3014 = vmatpush1.bf16.msra.mxu0 %v7901_v55 }
 0x1a4   : > { %3055 = vmatpush1.bf16.msra.mxu1 %v7904_v56  ;;  %3015 = vmatprep.subr.bf16.mxu0 %v7909_v57 }
 0x1a5   : > { %3056 = vmatprep.subr.bf16.mxu1 %v7912_v58 }
 0x1a7   : > { %3016 = vmatpush1.bf16.msra.mxu0 %v7907_v2 }
 0x1a8   : > { %3057 = vmatpush1.bf16.msra.mxu1 %v7910_v3  ;;  %3017 = vmatprep.subr.bf16.mxu0 %v7915_v59 }
 0x1a9   : > { %3058 = vmatprep.subr.bf16.mxu1 %v7918_v60 }
 0x1ab   : > { %3018 = vmatpush1.bf16.msra.mxu0 %v7913_v61 }
 0x1ac   : > { %3059 = vmatpush1.bf16.msra.mxu1 %v7916_v62  ;;  %3019 = vmatprep.subr.bf16.mxu0 %v7921_v27 }
 0x1ad   : > { %3060 = vmatprep.subr.bf16.mxu1 %v7924_v28 }
 0x1af   : > { %3020 = vmatpush1.bf16.msra.mxu0 %v7919_v63 }
 0x1b0   : > { %3061 = vmatpush1.bf16.msra.mxu1 %v7922_v11  ;;  %3021 = vmatprep.subr.bf16.mxu0 %v7927_v0 }
 0x1b1   : > { %3062 = vmatprep.subr.bf16.mxu1 %v7930_v1 }
 0x1b3   : > { %3022 = vmatpush1.bf16.msra.mxu0 %v7925_v4 }
 0x1b4   : > { %3063 = vmatpush1.bf16.msra.mxu1 %v7928_v5  ;;  %3023 = vmatprep.subr.bf16.mxu0 %v7933_v8 }
 0x1b5   : > { %3064 = vmatprep.subr.bf16.mxu1 %v7936_v9 }
 0x1b7   : > { %3024 = vmatpush2.bf16.msra.mxu0 %v7931_v47 }
 0x1b8   : > { %3065 = vmatpush2.bf16.msra.mxu1 %v7934_v51  ;;  %3025 = vmatprep.subr.bf16.mxu0 %v7939_v12 }
 0x1b9   : > { %3066 = vmatprep.subr.bf16.mxu1 %v7942_v14 }
 0x1bb   : > { %3026 = vmatpush2.bf16.msra.mxu0 %v7937_v45 }
 0x1bc   : > { %3067 = vmatpush2.bf16.msra.mxu1 %v7940_v15  ;;  %3027 = vmatprep.subr.bf16.mxu0 %v7945_v16 }
 0x1bd   : > { %3068 = vmatprep.subr.bf16.mxu1 %v7948_v17 }
 0x1bf   : > { %3028 = vmatpush2.bf16.msra.mxu0 %v7943_v18 }
 0x1c0   : > { %3069 = vmatpush2.bf16.msra.mxu1 %v7946_v20  ;;  %3029 = vmatprep.subr.bf16.mxu0 %v7951_v21 }
 0x1c1   : > { %3070 = vmatprep.subr.bf16.mxu1 %v7954_v22 }
 0x1c3   : > { %3030 = vmatpush2.bf16.msra.mxu0 %v7949_v25 }
 0x1c4   : > { %3071 = vmatpush2.bf16.msra.mxu1 %v7952_v26  ;;  %3031 = vmatprep.subr.bf16.mxu0 %v7957_v29 }
 0x1c5   : > { %3072 = vmatprep.subr.bf16.mxu1 %v7960_v30 }
 0x1c7   : > { %3032 = vmatpush2.bf16.msra.mxu0 %v7955_v31 }
 0x1c8   : > { %3073 = vmatpush2.bf16.msra.mxu1 %v7958_v32  ;;  %3033 = vmatprep.subr.bf16.mxu0 %v7963_v33 }
 0x1c9   : > { %3074 = vmatprep.subr.bf16.mxu1 %v7966_v34 }
 0x1cb   : > { %3034 = vmatpush2.bf16.msra.mxu0 %v7961_v6 }
 0x1cc   : > { %3075 = vmatpush2.bf16.msra.mxu1 %v7964_v7  ;;  %3035 = vmatprep.subr.bf16.mxu0 %v7969_v19 }
 0x1cd   : > { %3076 = vmatprep.subr.bf16.mxu1 %v7972_v24 }
 0x1cf   : > { %3036 = vmatpush2.bf16.msra.mxu0 %v7967_v37 }
 0x1d0   : > { %3077 = vmatpush2.bf16.msra.mxu1 %v7970_v38  ;;  %3037 = vmatprep.subr.bf16.mxu0 %v7975_v40 }
 0x1d1   : > { %3078 = vmatprep.subr.bf16.mxu1 %v7978_v41 }
 0x1d3   : > { %3038 = vmatpush2.bf16.msra.mxu0 %v7973_v43 }
 0x1d4   : > { %3079 = vmatpush2.bf16.msra.mxu1 %v7976_v46 }
 0x1d6   : > { %v2026_v48 = vpop.f32.mrf.mxu0  ;;  %3040 = vmatmul.mubr.bf16.vlgmr.msra.gmra.mxu0 %v8984_v35 }
 0x1d7   : > { %v2067_v49 = vpop.f32.mrf.mxu1  ;;  %3081 = vmatmul.mubr.bf16.vlgmr.msra.gmra.mxu1 %v8988_v36  ;;  %v2027_v50 = vadd.f32 %v2026_v48, %v8968_v10 }
 0x1d8   : > { %v2028_v52 = vpop.f32.mrf.mxu0 }
 0x1d9   : > { %v2069_v53 = vpop.f32.mrf.mxu1  ;;  %v2068_v54 = vadd.f32 %v2067_v49, %v2027_v50  ;;  %v2029_v55 = vadd.f32 %v2028_v52, %v8970_v44 }
 0x1da   : > { %v2030_v56 = vpop.f32.mrf.mxu0 }
 0x1db   : > { %v2071_v57 = vpop.f32.mrf.mxu1  ;;  %v2070_v58 = vadd.f32 %v2069_v53, %v2029_v55 }
 0x1dc   : > { %v2031_v2 = vpop.f32.mrf.mxu0 }
 0x1dd   : > { %v2072_v3 = vpop.f32.mrf.mxu1 }
 0x216   : > { %v2108_v59 = vpop.f32.mrf.mxu0 }
 0x217   : > { %v2149_v60 = vpop.f32.mrf.mxu1  ;;  %v2109_v61 = vadd.f32 %v2108_v59, %v8992_v39 }
 0x218   : > { %v2110_v62 = vpop.f32.mrf.mxu0 }
 0x219   : > { %v2151_v35 = vpop.f32.mrf.mxu1  ;;  %v2150_v27 = vadd.f32 %v2149_v60, %v2109_v61  ;;  %v2111_v36 = vadd.f32 %v2110_v62, %v8994_v42 }
 0x21a   : > { %v2112_v10 = vpop.f32.mrf.mxu0 }
 0x21b   : > { %v2153_v28 = vpop.f32.mrf.mxu1  ;;  %v2152_v63 = vadd.f32 %v2151_v35, %v2111_v36 }
 0x21c   : > { %v2113_v11 = vpop.f32.mrf.mxu0 }
 0x21d   : > { %v2154_v0 = vpop.f32.mrf.mxu1 }
 0x256   : > { %v2959_v44 = vpop.f32.mrf.mxu0 }
 0x257   : > { %v3000_v1 = vpop.f32.mrf.mxu1 }
 0x258   : > { %v3001_v4 = vadd.f32 %v3000_v1, %v2959_v44  ;;  %v2961_v5 = vpop.f32.mrf.mxu0 }
 0x259   : > { %v3002_v8 = vpop.f32.mrf.mxu1 }
 0x25a   : > { %v9004_v9 = vadd.f32 %v3001_v4, %v2068_v54  ;;  %v3003_v47 = vadd.f32 %v3002_v8, %v2961_v5  ;;  %v2963_v51 = vpop.f32.mrf.mxu0 }
 0x25b   : > { %v3004_v39 = vpop.f32.mrf.mxu1 }
 0x25c   : > { %v9006_v12 = vadd.f32 %v3003_v47, %v2070_v58  ;;  %v3093_v14 = vrot.slane %v9004_v9, 4  ;;  %v3193_v42 = vmul.f32 %v9004_v9, %v9004_v9  ;;  %v2964_v45 = vpop.f32.mrf.mxu0 }
 0x25d   : > { %v3005_v15 = vpop.f32.mrf.mxu1 }
 0x25e   : > { %v3094_v16 = vadd.f32 %v3093_v14, %v9004_v9  ;;  %v3194_v17 = vmul.f32 %v9006_v12, %v9006_v12  ;;  %v3099_v18 = vrot.slane %v9006_v12, 4  ;;  %v3197_v20 = vrot.slane %v3193_v42, 4 }
 0x260   : > { %v3095_v21 = vrot.slane %v3094_v16, 2  ;;  %v3203_v22 = vrot.slane %v3194_v17, 4  ;;  %v3100_v25 = vadd.f32 %v3099_v18, %v9006_v12  ;;  %v3198_v26 = vadd.f32 %v3197_v20, %v3193_v42 }
 0x261   : > { %v3125_v18 = vlaneseq }
 0x262   : > { %v3096_v29 = vadd.f32 %v3095_v21, %v3094_v16  ;;  %v3204_v30 = vadd.f32 %v3203_v22, %v3194_v17  ;;  %v3101_v31 = vrot.slane %v3100_v25, 2  ;;  %v3199_v32 = vrot.slane %v3198_v26, 2 }
 0x263   : > { %v9043_v20 = vand.u32 127, %v3125_v18 }
 0x264   : > { %v3097_v33 = vrot.slane %v3096_v29, 1  ;;  %v3205_v34 = vrot.slane %v3204_v30, 2  ;;  %v3102_v6 = vadd.f32 %v3101_v31, %v3100_v25  ;;  %v3200_v37 = vadd.f32 %v3199_v32, %v3198_v26 }
 0x265   : > { %vm3127_vm6 = vcmp.lt.s32.totalorder %v9043_v20, 8  ;;  %vm3144_vm7 = vcmp.lt.s32.totalorder %v9043_v20, 16  ;;  %vm3161_vm8 = vcmp.lt.s32.totalorder %v9043_v20, 32  ;;  %vm3178_vm9 = vcmp.lt.s32.totalorder %v9043_v20, 64 }
 0x266   : > { %v9016_v7 = vadd.f32 %v3097_v33, %v3096_v29  ;;  %v3206_v19 = vadd.f32 %v3205_v34, %v3204_v30  ;;  %v3103_v24 = vrot.slane %v3102_v6, 1  ;;  %v3201_v43 = vrot.slane %v3200_v37, 1 }
 0x268   : > { %3117 = vrot.lane.b32.xlu0 %v9016_v7, %s8720_s18  ;;  %v3207_v38 = vrot.slane %v3206_v19, 1  ;;  %v3104_v41 = vadd.f32 %v3103_v24, %v3102_v6  ;;  %v9022_v46 = vadd.f32 %v3201_v43, %v3200_v37 }
 0x26a   : > { %v3208_v40 = vadd.f32 %v3207_v38, %v3206_v19 }
 0x26c   : > { %3223 = vrot.lane.b32.xlu1 %v3208_v40, %s8720_s18  ;;  %3119 = vrot.lane.b32.xlu0 %v3104_v41, %s8720_s18 }
 0x270   : > { %3221 = vrot.lane.b32.xlu0 %v9022_v46, %s8720_s18 }
 0x296   : > { %v3041_v48 = vpop.f32.mrf.mxu0 }
 0x297   : > { %v3082_v49 = vpop.f32.mrf.mxu1 }
 0x298   : > { %v3083_v50 = vadd.f32 %v3082_v49, %v3041_v48  ;;  %v3043_v52 = vpop.f32.mrf.mxu0 }
 0x299   : > { %v3084_v53 = vpop.f32.mrf.mxu1 }
 0x29a   : > { %v9026_v54 = vadd.f32 %v3083_v50, %v2150_v27  ;;  %v3085_v55 = vadd.f32 %v3084_v53, %v3043_v52  ;;  %v3045_v56 = vpop.f32.mrf.mxu0 }
 0x29b   : > { %v3086_v57 = vpop.f32.mrf.mxu1 }
 0x29c   : > { %v9028_v58 = vadd.f32 %v3085_v55, %v2152_v63  ;;  %v3105_v2 = vrot.slane %v9026_v54, 4  ;;  %v3195_v3 = vmul.f32 %v9026_v54, %v9026_v54  ;;  %v3046_v59 = vpop.f32.mrf.mxu0 }
 0x29d   : > { %v3087_v60 = vpop.f32.mrf.mxu1 }
 0x29e   : > { %v3106_v61 = vadd.f32 %v3105_v2, %v9026_v54  ;;  %v3209_v62 = vrot.slane %v3195_v3, 4  ;;  %v3111_v35 = vrot.slane %v9028_v58, 4  ;;  %v3196_v27 = vmul.f32 %v9028_v58, %v9028_v58 }
 0x2a0   : > { %v3107_v36 = vrot.slane %v3106_v61, 2  ;;  %v3210_v10 = vadd.f32 %v3209_v62, %v3195_v3  ;;  %v3112_v28 = vadd.f32 %v3111_v35, %v9028_v58  ;;  %v3215_v63 = vrot.slane %v3196_v27, 4 }
 0x2a2   : > { %v3108_v11 = vadd.f32 %v3107_v36, %v3106_v61  ;;  %v3211_v0 = vrot.slane %v3210_v10, 2  ;;  %v3113_v44 = vrot.slane %v3112_v28, 2  ;;  %v3216_v1 = vadd.f32 %v3215_v63, %v3196_v27 }
 0x2a4   : > { %v3109_v4 = vrot.slane %v3108_v11, 1  ;;  %v3212_v5 = vadd.f32 %v3211_v0, %v3210_v10  ;;  %v3114_v8 = vadd.f32 %v3113_v44, %v3112_v28  ;;  %v3217_v47 = vrot.slane %v3216_v1, 2 }
 0x2a6   : > { %v3110_v51 = vadd.f32 %v3109_v4, %v3108_v11  ;;  %v3213_v39 = vrot.slane %v3212_v5, 1  ;;  %v3115_v14 = vrot.slane %v3114_v8, 1  ;;  %v3218_v42 = vadd.f32 %v3217_v47, %v3216_v1  ;;  %v7981_v47 = vld [vmem:[#allocation7 + $0x4e4] ss:$16 sps:$4 sm:$0xff]  }
 0x2a7   : > { %4285 = vmatprep.subr.bf16.mxu0 %v7981_v47  ;;  %v8030_v47 = vld [vmem:[#allocation7 + $0x7e0] ss:$16 sps:$4 sm:$0xff]  }
 0x2a8   : > { %3121 = vrot.lane.b32.xlu1 %v3110_v51, %s8720_s18  ;;  %v3214_v45 = vadd.f32 %v3213_v39, %v3212_v5  ;;  %v3116_v15 = vadd.f32 %v3115_v14, %v3114_v8  ;;  %v3219_v16 = vrot.slane %v3218_v42, 1  ;;  %v7979_v8 = vld [vmem:[#allocation7 + $0x4e0] ss:$16 sps:$4 sm:$0xff]   ;;  %v7984_v14 = vld [vmem:[#allocation7 + $0x6e4] ss:$16 sps:$4 sm:$0xff]  }
 0x2a9   : > { %4326 = vmatprep.subr.bf16.mxu1 %v7984_v14  ;;  %4286 = vmatpush1.bf16.msra.mxu0 %v7979_v8  ;;  %v8027_v8 = vld [vmem:[#allocation7 + $0x5e0] ss:$16 sps:$4 sm:$0xff]  }
 0x2aa   : > { %3225 = vrot.lane.b32.xlu0 %v3214_v45, %s8720_s18  ;;  %v3220_v17 = vadd.f32 %v3219_v16, %v3218_v42  ;;  %v7987_v42 = vld [vmem:[#allocation7 + $0x4c4] ss:$16 sps:$4 sm:$0xff]   ;;  %v7985_v16 = vld [vmem:[#allocation7 + $0x4c0] ss:$16 sps:$4 sm:$0xff]  }
 0x2ab   : > { %4287 = vmatprep.subr.bf16.mxu0 %v7987_v42 }
 0x2ac   : > { %3123 = vrot.lane.b32.xlu1 %v3116_v15, %s8720_s18 }
 0x2ad   : > { %4288 = vmatpush1.bf16.msra.mxu0 %v7985_v16  ;;  %v8038_v16 = vld [vmem:[#allocation7 + $0x7c4] ss:$16 sps:$4 sm:$0xff]  }
 0x2b0   : > { %3227 = vrot.lane.b32.xlu1 %v3220_v17, %s8720_s18 }
 0x2da   : > { %v3118_v21 = vpop.permute.xlu0 %3117 }
 0x2de   : > { %v3120_v22 = vpop.permute.xlu0 %3119  ;;  %v3224_v29 = vpop.permute.xlu1 %3223 }
 0x2df   : > { %v3130_v25 = vsel %vm3127_vm6, %v3118_v21, %v3120_v22 }
 0x2e0   : > { %v3133_v26 = vadd.f32 %v3130_v25, %v3104_v41  ;;  %v7991_v25 = vld [vmem:[#allocation7 + $0x4a0] ss:$16 sps:$4 sm:$0xff]  }
 0x2e2   : > { %3138 = vrot.lane.b32.xlu1 %v3133_v26, %s8721_s20  ;;  %v3222_v30 = vpop.permute.xlu0 %3221 }
 0x2e3   : > { %v3231_v31 = vsel %vm3127_vm6, %v3222_v30, %v3224_v29 }
 0x2e4   : > { %v3234_v32 = vadd.f32 %v3231_v31, %v3208_v40  ;;  %v7997_v31 = vld [vmem:[#allocation7 + $0x480] ss:$16 sps:$4 sm:$0xff]  }
 0x2e6   : > { %3239 = vrot.lane.b32.xlu1 %v3234_v32, %s8721_s20 }
 0x31a   : > { %v3122_v33 = vpop.permute.xlu1 %3121 }
 0x31b   : > { %v3129_v34 = vsel %vm3127_vm6, %v3120_v22, %v3122_v33  ;;  %v7996_v22 = vld [vmem:[#allocation7 + $0x6a4] ss:$16 sps:$4 sm:$0xff]  }
 0x31c   : > { %v3134_v6 = vadd.f32 %v3129_v34, %v3110_v51  ;;  %v3226_v40 = vpop.permute.xlu0 %3225  ;;  %v7982_v51 = vld [vmem:[#allocation7 + $0x6e0] ss:$16 sps:$4 sm:$0xff]   ;;  %v8005_v34 = vld [vmem:[#allocation7 + $0x464] ss:$16 sps:$4 sm:$0xff]  }
 0x31d   : > { %v3230_v53 = vsel %vm3127_vm6, %v3224_v29, %v3226_v40  ;;  %4327 = vmatpush1.bf16.msra.mxu1 %v7982_v51  ;;  %v7999_v29 = vld [vmem:[#allocation7 + $0x484] ss:$16 sps:$4 sm:$0xff]  }
 0x31e   : > { %v3124_v19 = vpop.permute.xlu1 %3123  ;;  %3140 = vrot.lane.b32.xlu0 %v3134_v6, %s8721_s20 }
 0x31f   : > { %v3128_v24 = vsel %vm3127_vm6, %v3122_v33, %v3124_v19  ;;  %v3131_v37 = vsel %vm3127_vm6, %v3124_v19, %v3118_v21  ;;  %v7993_v21 = vld [vmem:[#allocation7 + $0x4a4] ss:$16 sps:$4 sm:$0xff]   ;;  %v8003_v33 = vld [vmem:[#allocation7 + $0x460] ss:$16 sps:$4 sm:$0xff]  }
 0x320   : > { %v3132_v38 = vadd.f32 %v3131_v37, %v9016_v7  ;;  %v3135_v41 = vadd.f32 %v3128_v24, %v3116_v15  ;;  %v3235_v7 = vadd.f32 %v3230_v53, %v3214_v45  ;;  %v7990_v45 = vld [vmem:[#allocation7 + $0x6c4] ss:$16 sps:$4 sm:$0xff]   ;;  %4289 = vmatprep.subr.bf16.mxu0 %v7993_v21  ;;  %v8015_v53 = vld [vmem:[#allocation7 + $0x420] ss:$16 sps:$4 sm:$0xff]  }
 0x321   : > { %4328 = vmatprep.subr.bf16.mxu1 %v7990_v45  ;;  %4290 = vmatpush1.bf16.msra.mxu0 %v7991_v25  ;;  %v8008_v19 = vld [vmem:[#allocation7 + $0x664] ss:$16 sps:$4 sm:$0xff]   ;;  %v8033_v21 = vld [vmem:[#allocation7 + $0x5c0] ss:$16 sps:$4 sm:$0xff]  }
 0x322   : > { %v3228_v43 = vpop.permute.xlu1 %3227  ;;  %3136 = vrot.lane.b32.xlu0 %v3132_v38, %s8721_s20  ;;  %3142 = vrot.lane.b32.xlu1 %v3135_v41, %s8721_s20  ;;  %v8011_v37 = vld [vmem:[#allocation7 + $0x444] ss:$16 sps:$4 sm:$0xff]  }
 0x323   : > { %v3229_v48 = vsel %vm3127_vm6, %v3226_v40, %v3228_v43  ;;  %v3232_v49 = vsel %vm3127_vm6, %v3228_v43, %v3222_v30  ;;  %v8002_v30 = vld [vmem:[#allocation7 + $0x684] ss:$16 sps:$4 sm:$0xff]   ;;  %4291 = vmatprep.subr.bf16.mxu0 %v7999_v29  ;;  %v8012_v40 = vld [vmem:[#allocation7 + $0x640] ss:$16 sps:$4 sm:$0xff]  }
 0x324   : > { %v3233_v50 = vadd.f32 %v3232_v49, %v9022_v46  ;;  %v3236_v52 = vadd.f32 %v3229_v48, %v3220_v17  ;;  %v7988_v17 = vld [vmem:[#allocation7 + $0x6c0] ss:$16 sps:$4 sm:$0xff]   ;;  %v8017_v49 = vld [vmem:[#allocation7 + $0x424] ss:$16 sps:$4 sm:$0xff]  }
 0x325   : > { %4329 = vmatpush1.bf16.msra.mxu1 %v7988_v17  ;;  %4292 = vmatpush1.bf16.msra.mxu0 %v7997_v31  ;;  %v8035_v45 = vld [vmem:[#allocation7 + $0x5c4] ss:$16 sps:$4 sm:$0xff]   ;;  %v8042_v29 = vld [vmem:[#allocation7 + $0x7a0] ss:$16 sps:$4 sm:$0xff]  }
 0x326   : > { %3237 = vrot.lane.b32.xlu0 %v3233_v50, %s8721_s20  ;;  %3243 = vrot.lane.b32.xlu1 %v3236_v52, %s8721_s20  ;;  %v8044_v25 = vld [vmem:[#allocation7 + $0x7a4] ss:$16 sps:$4 sm:$0xff]  }
 0x327   : > { %4330 = vmatprep.subr.bf16.mxu1 %v7996_v22  ;;  %4293 = vmatprep.subr.bf16.mxu0 %v8005_v34  ;;  %v8036_v22 = vld [vmem:[#allocation7 + $0x7c0] ss:$16 sps:$4 sm:$0xff]   ;;  %v8047_v31 = vld [vmem:[#allocation7 + $0x584] ss:$16 sps:$4 sm:$0xff]  }
 0x328   : > { %v8053_v34 = vld [vmem:[#allocation7 + $0x564] ss:$16 sps:$4 sm:$0xff]  }
 0x329   : > { %4294 = vmatpush1.bf16.msra.mxu0 %v8003_v33  ;;  %v8050_v33 = vld [vmem:[#allocation7 + $0x784] ss:$16 sps:$4 sm:$0xff]  }
 0x32a   : > { %3241 = vrot.lane.b32.xlu0 %v3235_v7, %s8721_s20  ;;  %4295 = vmatprep.subr.bf16.mxu0 %v8011_v37  ;;  %v8062_v37 = vld [vmem:[#allocation7 + $0x744] ss:$16 sps:$4 sm:$0xff]  }
 0x354   : > { %v3139_v55 = vpop.permute.xlu1 %3138 }
 0x358   : > { %v3240_v56 = vpop.permute.xlu1 %3239 }
 0x390   : > { %v3141_v57 = vpop.permute.xlu0 %3140 }
 0x391   : > { %v3146_v2 = vsel %vm3144_vm7, %v3139_v55, %v3141_v57 }
 0x392   : > { %v9075_v46 = vadd.f32 %v3146_v2, %v3134_v6  ;;  %v8006_v6 = vld [vmem:[#allocation7 + $0x660] ss:$16 sps:$4 sm:$0xff]   ;;  %v8026_v2 = vld [vmem:[#allocation7 + $0x604] ss:$16 sps:$4 sm:$0xff]  }
 0x394   : > { %v3143_v3 = vpop.permute.xlu1 %3142  ;;  %3157 = vrot.lane.b32.xlu0 %v9075_v46, %s8722_s25  ;;  %v3137_v59 = vpop.permute.xlu0 %3136 }
 0x395   : > { %v3147_v60 = vsel %vm3144_vm7, %v3137_v59, %v3139_v55  ;;  %v3148_v61 = vsel %vm3144_vm7, %v3143_v3, %v3137_v59  ;;  %v3145_v27 = vsel %vm3144_vm7, %v3141_v57, %v3143_v3  ;;  %v8023_v57 = vld [vmem:[#allocation7 + $0x404] ss:$16 sps:$4 sm:$0xff]  }
 0x396   : > { %v9083_v62 = vadd.f32 %v3148_v61, %v3132_v38  ;;  %v9085_v35 = vadd.f32 %v3147_v60, %v3133_v26  ;;  %v9095_v63 = vadd.f32 %v3145_v27, %v3135_v41  ;;  %v7994_v26 = vld [vmem:[#allocation7 + $0x6a0] ss:$16 sps:$4 sm:$0xff]   ;;  %v8014_v38 = vld [vmem:[#allocation7 + $0x644] ss:$16 sps:$4 sm:$0xff]  }
 0x397   : > { %4331 = vmatpush1.bf16.msra.mxu1 %v7994_v26  ;;  %v8009_v41 = vld [vmem:[#allocation7 + $0x440] ss:$16 sps:$4 sm:$0xff]  }
 0x398   : > { %v3244_v36 = vpop.permute.xlu1 %3243  ;;  %3153 = vrot.lane.b32.xlu0 %v9083_v62, %s8722_s25  ;;  %3155 = vrot.lane.b32.xlu1 %v9085_v35, %s8722_s25  ;;  %v3238_v10 = vpop.permute.xlu0 %3237  ;;  %v8021_v60 = vld [vmem:[#allocation7 + $0x400] ss:$16 sps:$4 sm:$0xff]  }
 0x399   : > { %v3248_v28 = vsel %vm3144_vm7, %v3244_v36, %v3238_v10  ;;  %v3247_v0 = vsel %vm3144_vm7, %v3238_v10, %v3240_v56  ;;  %4332 = vmatprep.subr.bf16.mxu1 %v8002_v30  ;;  %4296 = vmatpush1.bf16.msra.mxu0 %v8009_v41  ;;  %v8024_v61 = vld [vmem:[#allocation7 + $0x600] ss:$16 sps:$4 sm:$0xff]  }
 0x39a   : > { %v9097_v11 = vadd.f32 %v3248_v28, %v3233_v50  ;;  %v9107_v4 = vadd.f32 %v3247_v0, %v3234_v32  ;;  %v8000_v32 = vld [vmem:[#allocation7 + $0x680] ss:$16 sps:$4 sm:$0xff]   ;;  %v8020_v50 = vld [vmem:[#allocation7 + $0x624] ss:$16 sps:$4 sm:$0xff]   ;;  %4297 = vmatprep.subr.bf16.mxu0 %v8017_v49 }
 0x39b   : > { %4333 = vmatpush1.bf16.msra.mxu1 %v8000_v32  ;;  %v8039_v26 = vld [vmem:[#allocation7 + $0x5a0] ss:$16 sps:$4 sm:$0xff]  }
 0x39c   : > { %3159 = vrot.lane.b32.xlu1 %v9095_v63, %s8722_s25  ;;  %3253 = vrot.lane.b32.xlu0 %v9097_v11, %s8722_s25  ;;  %v3242_v44 = vpop.permute.xlu0 %3241  ;;  %v8045_v30 = vld [vmem:[#allocation7 + $0x580] ss:$16 sps:$4 sm:$0xff]  }
 0x39d   : > { %v3246_v1 = vsel %vm3144_vm7, %v3240_v56, %v3242_v44  ;;  %v3245_v39 = vsel %vm3144_vm7, %v3242_v44, %v3244_v36  ;;  %4334 = vmatprep.subr.bf16.mxu1 %v8008_v19  ;;  %4298 = vmatpush1.bf16.msra.mxu0 %v8015_v53  ;;  %v8029_v44 = vld [vmem:[#allocation7 + $0x5e4] ss:$16 sps:$4 sm:$0xff]   ;;  %v8048_v32 = vld [vmem:[#allocation7 + $0x780] ss:$16 sps:$4 sm:$0xff]  }
 0x39e   : > { %v9109_v5 = vadd.f32 %v3246_v1, %v3235_v7  ;;  %v9117_v15 = vadd.f32 %v3245_v39, %v3236_v52  ;;  %v8018_v7 = vld [vmem:[#allocation7 + $0x620] ss:$16 sps:$4 sm:$0xff]   ;;  %4299 = vmatprep.subr.bf16.mxu0 %v8023_v57  ;;  %v8032_v1 = vld [vmem:[#allocation7 + $0x7e4] ss:$16 sps:$4 sm:$0xff]   ;;  %v8080_v57 = vld [vmem:[#allocation7 + $0x6ec] ss:$16 sps:$4 sm:$0xff]  }
 0x39f   : > { %4335 = vmatpush1.bf16.msra.mxu1 %v8006_v6  ;;  %v8051_v6 = vld [vmem:[#allocation7 + $0x560] ss:$16 sps:$4 sm:$0xff]  }
 0x3a0   : > { %3255 = vrot.lane.b32.xlu1 %v9107_v4, %s8722_s25  ;;  %3257 = vrot.lane.b32.xlu0 %v9109_v5, %s8722_s25  ;;  %v8054_v19 = vld [vmem:[#allocation7 + $0x760] ss:$16 sps:$4 sm:$0xff]  }
 0x3a1   : > { %4336 = vmatprep.subr.bf16.mxu1 %v8014_v38  ;;  %4300 = vmatpush1.bf16.msra.mxu0 %v8021_v60  ;;  %v8057_v38 = vld [vmem:[#allocation7 + $0x540] ss:$16 sps:$4 sm:$0xff]  }
 0x3a2   : > { %4301 = vmatprep.subr.bf16.mxu0 %v8029_v44  ;;  %v8060_v41 = vld [vmem:[#allocation7 + $0x740] ss:$16 sps:$4 sm:$0xff]  }
 0x3a3   : > { %4337 = vmatpush1.bf16.msra.mxu1 %v8012_v40  ;;  %v8065_v40 = vld [vmem:[#allocation7 + $0x524] ss:$16 sps:$4 sm:$0xff]   ;;  %v8066_v49 = vld [vmem:[#allocation7 + $0x720] ss:$16 sps:$4 sm:$0xff]  }
 0x3a4   : > { %3259 = vrot.lane.b32.xlu1 %v9117_v15, %s8722_s25  ;;  %4338 = vmatprep.subr.bf16.mxu1 %v8020_v50  ;;  %v8071_v50 = vld [vmem:[#allocation7 + $0x504] ss:$16 sps:$4 sm:$0xff]   ;;  %v8069_v53 = vld [vmem:[#allocation7 + $0x500] ss:$16 sps:$4 sm:$0xff]  }
 0x3a5   : > { %4302 = vmatpush2.bf16.msra.mxu0 %v8027_v8 }
 0x3a6   : > { %4303 = vmatprep.subr.bf16.mxu0 %v8035_v45 }
 0x3a7   : > { %4339 = vmatpush1.bf16.msra.mxu1 %v8018_v7  ;;  %v8072_v7 = vld [vmem:[#allocation7 + $0x700] ss:$16 sps:$4 sm:$0xff]  }
 0x3a8   : > { %4340 = vmatprep.subr.bf16.mxu1 %v8026_v2 }
 0x3a9   : > { %4304 = vmatpush2.bf16.msra.mxu0 %v8033_v21 }
 0x3ab   : > { %4341 = vmatpush1.bf16.msra.mxu1 %v8024_v61 }
 0x3ac   : > { %4342 = vmatprep.subr.bf16.mxu1 %v8032_v1 }
 0x3af   : > { %4343 = vmatpush2.bf16.msra.mxu1 %v8030_v47 }
 0x3b0   : > { %4344 = vmatprep.subr.bf16.mxu1 %v8038_v16 }
 0x3b3   : > { %4345 = vmatpush2.bf16.msra.mxu1 %v8036_v22 }
 0x3b4   : > { %4346 = vmatprep.subr.bf16.mxu1 %v8044_v25 }
 0x3b7   : > { %4347 = vmatpush2.bf16.msra.mxu1 %v8042_v29 }
 0x3b8   : > { %4348 = vmatprep.subr.bf16.mxu1 %v8050_v33 }
 0x3bb   : > { %4349 = vmatpush2.bf16.msra.mxu1 %v8048_v32 }
 0x406   : > { %v3158_v24 = vpop.permute.xlu0 %3157 }
 0x40a   : > { %v3156_v43 = vpop.permute.xlu1 %3155  ;;  %v3154_v48 = vpop.permute.xlu0 %3153 }
 0x40b   : > { %v3164_v52 = vsel %vm3161_vm8, %v3154_v48, %v3156_v43  ;;  %v3163_v10 = vsel %vm3161_vm8, %v3156_v43, %v3158_v24  ;;  %v8068_v43 = vld [vmem:[#allocation7 + $0x724] ss:$16 sps:$4 sm:$0xff]  }
 0x40c   : > { %v9125_v55 = vadd.f32 %v3164_v52, %v9085_v35  ;;  %v8074_v52 = vld [vmem:[#allocation7 + $0x704] ss:$16 sps:$4 sm:$0xff]  }
 0x40e   : > { %v3160_v56 = vpop.permute.xlu1 %3159  ;;  %3172 = vrot.lane.b32.xlu1 %v9125_v55, %s8723_s27  ;;  %v3254_v36 = vpop.permute.xlu0 %3253 }
 0x40f   : > { %v3162_v3 = vsel %vm3161_vm8, %v3158_v24, %v3160_v56  ;;  %v3165_v59 = vsel %vm3161_vm8, %v3160_v56, %v3154_v48  ;;  %v8059_v24 = vld [vmem:[#allocation7 + $0x544] ss:$16 sps:$4 sm:$0xff]   ;;  %v8063_v48 = vld [vmem:[#allocation7 + $0x520] ss:$16 sps:$4 sm:$0xff]   ;;  %v8077_v56 = vld [vmem:[#allocation7 + $0x4ec] ss:$16 sps:$4 sm:$0xff]  }
 0x410   : > { %v9134_v35 = vadd.f32 %v3165_v59, %v9083_v62  ;;  %v9137_v27 = vadd.f32 %v3162_v3, %v9095_v63  ;;  %v9148_v63 = vadd.f32 %v3163_v10, %v9075_v46 }
 0x412   : > { %v3256_v28 = vpop.permute.xlu1 %3255  ;;  %3170 = vrot.lane.b32.xlu0 %v9134_v35, %s8723_s27  ;;  %3176 = vrot.lane.b32.xlu1 %v9137_v27, %s8723_s27  ;;  %v3258_v51 = vpop.permute.xlu0 %3257 }
 0x413   : > { %v3263_v62 = vsel %vm3161_vm8, %v3254_v36, %v3256_v28  ;;  %v3262_v17 = vsel %vm3161_vm8, %v3256_v28, %v3258_v51 }
 0x414   : > { %v9151_v0 = vadd.f32 %v3263_v62, %v9107_v4 }
 0x416   : > { %v3260_v39 = vpop.permute.xlu1 %3259  ;;  %3174 = vrot.lane.b32.xlu0 %v9148_v63, %s8723_s27  ;;  %3271 = vrot.lane.b32.xlu1 %v9151_v0, %s8723_s27 }
 0x417   : > { %v3261_v14 = vsel %vm3161_vm8, %v3258_v51, %v3260_v39  ;;  %v3264_v46 = vsel %vm3161_vm8, %v3260_v39, %v3254_v36 }
 0x418   : > { %v9162_v4 = vadd.f32 %v3264_v46, %v9097_v11  ;;  %v9165_v42 = vadd.f32 %v3261_v14, %v9117_v15  ;;  %v9174_v11 = vadd.f32 %v3262_v17, %v9109_v5  ;;  %v8041_v15 = vld [vmem:[#allocation7 + $0x5a4] ss:$16 sps:$4 sm:$0xff]  }
 0x419   : > { %4305 = vmatprep.subr.bf16.mxu0 %v8041_v15  ;;  %v8056_v5 = vld [vmem:[#allocation7 + $0x764] ss:$16 sps:$4 sm:$0xff]  }
 0x41a   : > { %3269 = vrot.lane.b32.xlu0 %v9162_v4, %s8723_s27  ;;  %3275 = vrot.lane.b32.xlu1 %v9165_v42, %s8723_s27 }
 0x41b   : > { %4306 = vmatpush2.bf16.msra.mxu0 %v8039_v26  ;;  %4350 = vmatprep.subr.bf16.mxu1 %v8056_v5 }
 0x41c   : > { %4307 = vmatprep.subr.bf16.mxu0 %v8047_v31  ;;  %4351 = vmatpush2.bf16.msra.mxu1 %v8054_v19 }
 0x41d   : > { %4352 = vmatprep.subr.bf16.mxu1 %v8062_v37 }
 0x41e   : > { %3273 = vrot.lane.b32.xlu0 %v9174_v11, %s8723_s27 }
 0x41f   : > { %4308 = vmatpush2.bf16.msra.mxu0 %v8045_v30 }
 0x420   : > { %4309 = vmatprep.subr.bf16.mxu0 %v8053_v34  ;;  %4353 = vmatpush2.bf16.msra.mxu1 %v8060_v41 }
 0x421   : > { %4354 = vmatprep.subr.bf16.mxu1 %v8068_v43 }
 0x423   : > { %4310 = vmatpush2.bf16.msra.mxu0 %v8051_v6 }
 0x424   : > { %4311 = vmatprep.subr.bf16.mxu0 %v8059_v24  ;;  %4355 = vmatpush2.bf16.msra.mxu1 %v8066_v49 }
 0x425   : > { %4356 = vmatprep.subr.bf16.mxu1 %v8074_v52 }
 0x427   : > { %4312 = vmatpush2.bf16.msra.mxu0 %v8057_v38 }
 0x428   : > { %4313 = vmatprep.subr.bf16.mxu0 %v8065_v40  ;;  %4357 = vmatpush2.bf16.msra.mxu1 %v8072_v7 }
 0x429   : > { %4408 = vmatprep.subr.bf16.mxu1 %v8080_v57 }
 0x42b   : > { %4314 = vmatpush2.bf16.msra.mxu0 %v8063_v48 }
 0x42c   : > { %4315 = vmatprep.subr.bf16.mxu0 %v8071_v50 }
 0x42f   : > { %4316 = vmatpush2.bf16.msra.mxu0 %v8069_v53 }
 0x430   : > { %4367 = vmatprep.subr.bf16.mxu0 %v8077_v56 }
 0x480   : > { %v3173_v2 = vpop.permute.xlu1 %3172 }
 0x484   : > { %v3177_v3 = vpop.permute.xlu1 %3176  ;;  %v3171_v59 = vpop.permute.xlu0 %3170 }
 0x485   : > { %v3181_v60 = vsel %vm3178_vm9, %v3171_v59, %v3173_v2  ;;  %v3182_v61 = vsel %vm3178_vm9, %v3177_v3, %v3171_v59 }
 0x486   : > { %v3183_v44 = vadd.f32 %v3182_v61, %v9134_v35  ;;  %v3184_v1 = vadd.f32 %v3181_v60, %v9125_v55 }
 0x488   : > { %v3272_v36 = vpop.permute.xlu1 %3271  ;;  %v3175_v10 = vpop.permute.xlu0 %3174  ;;  %v3188_v16 = vadd.f32 %v3184_v1, %v3183_v44 }
 0x489   : > { %v3179_v28 = vsel %vm3178_vm9, %v3175_v10, %v3177_v3  ;;  %v3180_v62 = vsel %vm3178_vm9, %v3173_v2, %v3175_v10 }
 0x48a   : > { %v3185_v8 = vadd.f32 %v3180_v62, %v9148_v63  ;;  %v3186_v47 = vadd.f32 %v3179_v28, %v9137_v27 }
 0x48c   : > { %v3187_v51 = vadd.f32 %v3186_v47, %v3183_v44  ;;  %v3189_v39 = vadd.f32 %v3185_v8, %v3184_v1  ;;  %v3190_v14 = vadd.f32 %v3186_v47, %v3185_v8  ;;  %v3276_v46 = vpop.permute.xlu1 %3275  ;;  %v3270_v45 = vpop.permute.xlu0 %3269  ;;  %v8078_v8 = vld [vmem:[#allocation7 + $0x6e8] ss:$16 sps:$4 sm:$0xff]  }
 0x48d   : > { %v3279_v17 = vsel %vm3178_vm9, %v3270_v45, %v3272_v36  ;;  %v3280_v21 = vsel %vm3178_vm9, %v3276_v46, %v3270_v45  ;;  %v8081_v45 = vld [vmem:[#allocation7 + $0x4c8] ss:$16 sps:$4 sm:$0xff]  }
 0x48e   : > { %v3191_v22 = vadd.f32 %v3189_v39, %v3187_v51  ;;  %v3192_v35 = vadd.f32 %v3190_v14, %v3188_v16  ;;  %v3281_v55 = vadd.f32 %v3280_v21, %v9162_v4  ;;  %v3282_v63 = vadd.f32 %v3279_v17, %v9151_v0  ;;  %v8083_v51 = vld [vmem:[#allocation7 + $0x4cc] ss:$16 sps:$4 sm:$0xff]   ;;  %v8084_v16 = vld [vmem:[#allocation7 + $0x6c8] ss:$16 sps:$4 sm:$0xff]  }
 0x48f   : > { %v8086_v39 = vld [vmem:[#allocation7 + $0x6cc] ss:$16 sps:$4 sm:$0xff]  }
 0x490   : > { %v3274_v15 = vpop.permute.xlu0 %3273  ;;  %v3292_v30 = vmul.f32 0.001953125, %v3191_v22  ;;  %v3293_v31 = vmul.f32 0.001953125, %v3192_v35  ;;  %v3286_v32 = vadd.f32 %v3282_v63, %v3281_v55  ;;  %v8089_v17 = vld [vmem:[#allocation7 + $0x4ac] ss:$16 sps:$4 sm:$0xff]  }
 0x491   : > { %v3277_v27 = vsel %vm3178_vm9, %v3274_v15, %v3276_v46  ;;  %v3278_v25 = vsel %vm3178_vm9, %v3272_v36, %v3274_v15  ;;  %v8092_v15 = vld [vmem:[#allocation7 + $0x6ac] ss:$16 sps:$4 sm:$0xff]  }
 0x492   : > { %v3283_v26 = vadd.f32 %v3278_v25, %v9174_v11  ;;  %v3284_v29 = vadd.f32 %v3277_v27, %v9165_v42  ;;  %v3296_v19 = vmul.f32 %v3292_v30, %v3292_v30  ;;  %v3297_v0 = vmul.f32 %v3293_v31, %v3293_v31 }
 0x493   : > { %v3305_v42 = vshrl.u32 %v3125_v18, 7 }
 0x494   : > { %v3285_v33 = vadd.f32 %v3284_v29, %v3281_v55  ;;  %v3287_v34 = vadd.f32 %v3283_v26, %v3282_v63  ;;  %v3288_v5 = vadd.f32 %v3284_v29, %v3283_v26 }
 0x495   : > { %v9204_v11 = vsub.s32 0, %v3305_v42  ;;  %v8108_v42 = vld [vmem:[#allocation7 + $0x648] ss:$16 sps:$4 sm:$0xff]  }
 0x496   : > { %v3289_v6 = vadd.f32 %v3287_v34, %v3285_v33  ;;  %v3290_v4 = vadd.f32 %v3288_v5, %v3286_v32  ;;  %v8087_v32 = vld [vmem:[#allocation7 + $0x4a8] ss:$16 sps:$4 sm:$0xff]   ;;  %v8095_v5 = vld [vmem:[#allocation7 + $0x48c] ss:$16 sps:$4 sm:$0xff]  }
 0x497   : > { %v3307_v48 = vrot.slane %v3292_v30, %v9204_v11  ;;  %v3311_v49 = vrot.slane %v3293_v31, %v9204_v11  ;;  %v8090_v33 = vld [vmem:[#allocation7 + $0x6a8] ss:$16 sps:$4 sm:$0xff]  }
 0x498   : > { %v3294_v24 = vmul.f32 0.001953125, %v3289_v6  ;;  %v3295_v37 = vmul.f32 0.001953125, %v3290_v4  ;;  %v8098_v6 = vld [vmem:[#allocation7 + $0x68c] ss:$16 sps:$4 sm:$0xff]   ;;  %v8093_v4 = vld [vmem:[#allocation7 + $0x488] ss:$16 sps:$4 sm:$0xff]  }
 0x499   : > { %v3312_v53 = vsub.f32 %v9004_v9, %v3307_v48  ;;  %v3314_v56 = vsub.f32 %v9026_v54, %v3307_v48  ;;  %v3313_v57 = vsub.f32 %v9006_v12, %v3311_v49  ;;  %v3315_v18 = vsub.f32 %v9028_v58, %v3311_v49  ;;  %v8075_v12 = vld [vmem:[#allocation7 + $0x4e8] ss:$16 sps:$4 sm:$0xff]   ;;  %v8113_v48 = vld [vmem:[#allocation7 + $0x42c] ss:$16 sps:$4 sm:$0xff]  }
 0x49a   : > { %v3298_v38 = vsub.f32 %v3294_v24, %v3296_v19  ;;  %v3299_v41 = vsub.f32 %v3295_v37, %v3297_v0  ;;  %v8096_v19 = vld [vmem:[#allocation7 + $0x688] ss:$16 sps:$4 sm:$0xff]   ;;  %v8101_v0 = vld [vmem:[#allocation7 + $0x46c] ss:$16 sps:$4 sm:$0xff]  }
 0x49b   : > { %v8104_v24 = vld [vmem:[#allocation7 + $0x66c] ss:$16 sps:$4 sm:$0xff]   ;;  %v8099_v37 = vld [vmem:[#allocation7 + $0x468] ss:$16 sps:$4 sm:$0xff]  }
 0x49c   : > { %v3300_v40 = vadd.f32 1e-05, %v3298_v38  ;;  %v3301_v43 = vadd.f32 1e-05, %v3299_v41  ;;  %v8102_v38 = vld [vmem:[#allocation7 + $0x668] ss:$16 sps:$4 sm:$0xff]  }
 0x49d   : > { %v8107_v41 = vld [vmem:[#allocation7 + $0x44c] ss:$16 sps:$4 sm:$0xff]  }
 0x49e   : > { %8555 = vrsqrt.f32 %v3300_v40  ;;  %v8110_v40 = vld [vmem:[#allocation7 + $0x64c] ss:$16 sps:$4 sm:$0xff]  }
 0x49f   : > { %8557 = vrsqrt.f32 %v3301_v43  ;;  %v8105_v43 = vld [vmem:[#allocation7 + $0x448] ss:$16 sps:$4 sm:$0xff]   ;;  %v8116_v49 = vld [vmem:[#allocation7 + $0x62c] ss:$16 sps:$4 sm:$0xff]  }
 0x4ab   : > { %v8556_v50 = vpop.eup %8555 }
 0x4ac   : > { %v8558_v52 = vpop.eup %8557  ;;  %v3319_v7 = vrot.slane %v8556_v50, %v9204_v11  ;;  %v8111_v50 = vld [vmem:[#allocation7 + $0x428] ss:$16 sps:$4 sm:$0xff]  }
 0x4ad   : > { %v3323_v2 = vrot.slane %v8558_v52, %v9204_v11  ;;  %v8114_v52 = vld [vmem:[#allocation7 + $0x628] ss:$16 sps:$4 sm:$0xff]  }
 0x4ae   : > { %v3324_v3 = vmul.f32 %v3319_v7, %v3312_v53  ;;  %v3326_v59 = vmul.f32 %v3319_v7, %v3314_v56  ;;  %v8119_v53 = vld [vmem:[#allocation7 + $0x40c] ss:$16 sps:$4 sm:$0xff]   ;;  %v8117_v56 = vld [vmem:[#allocation7 + $0x408] ss:$16 sps:$4 sm:$0xff]  }
 0x4af   : > { %v3325_v60 = vmul.f32 %v3323_v2, %v3313_v57  ;;  %v3327_v61 = vmul.f32 %v3323_v2, %v3315_v18  ;;  %v8122_v7 = vld [vmem:[#allocation7 + $0x60c] ss:$16 sps:$4 sm:$0xff]   ;;  %v8120_v57 = vld [vmem:[#allocation7 + $0x608] ss:$16 sps:$4 sm:$0xff]  }
 0x4b0   : > { %v3328_v36 = vmax.f32 %v3324_v3, 0.0  ;;  %v3330_v10 = vmax.f32 %v3326_v59, 0.0  ;;  %v8125_v2 = vld [vmem:[#allocation7 + $0x5ec] ss:$16 sps:$4 sm:$0xff]   ;;  %v8123_v3 = vld [vmem:[#allocation7 + $0x5e8] ss:$16 sps:$4 sm:$0xff]  }
 0x4b1   : > { %v3329_v28 = vmax.f32 %v3325_v60, 0.0  ;;  %v3331_v62 = vmax.f32 %v3327_v61, 0.0  ;;  %v8128_v18 = vld [vmem:[#allocation7 + $0x7ec] ss:$16 sps:$4 sm:$0xff]   ;;  %v8126_v59 = vld [vmem:[#allocation7 + $0x7e8] ss:$16 sps:$4 sm:$0xff]  }
 0x4b2   : > { %v9214_v44 = vpack.c.bf16 %v3328_v36, %v3328_v36  ;;  %v9216_v9 = vpack.c.bf16 %v3330_v10, %v3330_v10  ;;  %v8131_v60 = vld [vmem:[#allocation7 + $0x5cc] ss:$16 sps:$4 sm:$0xff]   ;;  %v8129_v36 = vld [vmem:[#allocation7 + $0x5c8] ss:$16 sps:$4 sm:$0xff]  }
 0x4b3   : > { %v9218_v1 = vpack.c.bf16 %v3329_v28, %v3329_v28  ;;  %v9220_v54 = vpack.c.bf16 %v3331_v62, %v3331_v62  ;;  %v8134_v61 = vld [vmem:[#allocation7 + $0x7cc] ss:$16 sps:$4 sm:$0xff]   ;;  %v8132_v10 = vld [vmem:[#allocation7 + $0x7c8] ss:$16 sps:$4 sm:$0xff]  }
 0x4b4   : > { %v3340_v58 = vshll.u32 %v9214_v44, 16  ;;  %v3354_v47 = vshll.u32 %v9216_v9, 16  ;;  %v3337_v63 = vshrl.u32 %v9214_v44, 16  ;;  %v3351_v26 = vshrl.u32 %v9216_v9, 16  ;;  %v8137_v28 = vld [vmem:[#allocation7 + $0x5ac] ss:$16 sps:$4 sm:$0xff]  }
 0x4b5   : > { %4317 = vmatprep.mubr.bf16.mxu0 %v9218_v1  ;;  %4358 = vmatprep.mubr.bf16.mxu1 %v9220_v54  ;;  %v3347_v14 = vshll.u32 %v9218_v1, 16  ;;  %v3361_v46 = vshll.u32 %v9220_v54, 16  ;;  %v3344_v21 = vshrl.u32 %v9218_v1, 16  ;;  %v3358_v55 = vshrl.u32 %v9220_v54, 16  ;;  %v8140_v62 = vld [vmem:[#allocation7 + $0x7ac] ss:$16 sps:$4 sm:$0xff]  }
 0x4b6   : > { %4318 = vmatmul.mubr.bf16.vlgmr.msra.gmra.mxu0 %v9214_v44  ;;  %4359 = vmatmul.mubr.bf16.vlgmr.msra.gmra.mxu1 %v9216_v9  ;;  %v3372_v27 = vrot.slane %v3340_v58, 1  ;;  %v3376_v25 = vrot.slane %v3354_v47, 1 }
 0x4b7   : > { %4368 = vmatpush1.bf16.msra.mxu0 %v8075_v12  ;;  %4409 = vmatpush1.bf16.msra.mxu1 %v8078_v8  ;;  %v3374_v22 = vrot.slane %v3347_v14, 1  ;;  %v3378_v35 = vrot.slane %v3361_v46, 1  ;;  %v8135_v12 = vld [vmem:[#allocation7 + $0x5a8] ss:$16 sps:$4 sm:$0xff]  }
 0x4b8   : > { %4399 = vmatprep.mubr.bf16.mxu0 %v9218_v1  ;;  %4440 = vmatprep.mubr.bf16.mxu1 %v9220_v54  ;;  %v9254_v31 = vor.u32 %v3372_v27, %v3337_v63  ;;  %v9258_v34 = vor.u32 %v3376_v25, %v3351_v26  ;;  %v8138_v8 = vld [vmem:[#allocation7 + $0x7a8] ss:$16 sps:$4 sm:$0xff]   ;;  %v8155_v27 = vld [vmem:[#allocation7 + $0x54c] ss:$16 sps:$4 sm:$0xff]   ;;  %v8177_v54 = vld [vmem:[#allocation7 + $0xc0] ss:$16 sps:$4 sm:$0xff]  }
 0x4b9   : > { %4369 = vmatprep.subr.bf16.mxu0 %v8083_v51  ;;  %4410 = vmatprep.subr.bf16.mxu1 %v8086_v39  ;;  %v9246_v29 = vor.u32 %v3374_v22, %v3344_v21  ;;  %v9250_v30 = vor.u32 %v3378_v35, %v3358_v55  ;;  %v8143_v51 = vld [vmem:[#allocation7 + $0x58c] ss:$16 sps:$4 sm:$0xff]   ;;  %v8147_v35 = vld [vmem:[#allocation7 + $0x568] ss:$16 sps:$4 sm:$0xff]  }
 0x4ba   : > { %v8146_v39 = vld [vmem:[#allocation7 + $0x78c] ss:$16 sps:$4 sm:$0xff]  }
 0x4bb   : > { %4370 = vmatpush1.bf16.msra.mxu0 %v8081_v45  ;;  %4411 = vmatpush1.bf16.msra.mxu1 %v8084_v16  ;;  %v8141_v45 = vld [vmem:[#allocation7 + $0x588] ss:$16 sps:$4 sm:$0xff]   ;;  %v8152_v22 = vld [vmem:[#allocation7 + $0x76c] ss:$16 sps:$4 sm:$0xff]  }
 0x4bc   : > { %4371 = vmatprep.subr.bf16.mxu0 %v8089_v17  ;;  %4412 = vmatprep.subr.bf16.mxu1 %v8092_v15  ;;  %v8144_v16 = vld [vmem:[#allocation7 + $0x788] ss:$16 sps:$4 sm:$0xff]   ;;  %v8149_v17 = vld [vmem:[#allocation7 + $0x56c] ss:$16 sps:$4 sm:$0xff]  }
 0x4bd   : > { %v8150_v15 = vld [vmem:[#allocation7 + $0x768] ss:$16 sps:$4 sm:$0xff]   ;;  %v8158_v25 = vld [vmem:[#allocation7 + $0x74c] ss:$16 sps:$4 sm:$0xff]  }
 0x4bf   : > { %4372 = vmatpush1.bf16.msra.mxu0 %v8087_v32  ;;  %4413 = vmatpush1.bf16.msra.mxu1 %v8090_v33  ;;  %v8153_v32 = vld [vmem:[#allocation7 + $0x548] ss:$16 sps:$4 sm:$0xff]  }
 0x4c0   : > { %4373 = vmatprep.subr.bf16.mxu0 %v8095_v5  ;;  %4414 = vmatprep.subr.bf16.mxu1 %v8098_v6  ;;  %v8156_v33 = vld [vmem:[#allocation7 + $0x748] ss:$16 sps:$4 sm:$0xff]   ;;  %v8161_v5 = vld [vmem:[#allocation7 + $0x52c] ss:$16 sps:$4 sm:$0xff]  }
 0x4c1   : > { %v8164_v6 = vld [vmem:[#allocation7 + $0x72c] ss:$16 sps:$4 sm:$0xff]  }
 0x4c3   : > { %4374 = vmatpush1.bf16.msra.mxu0 %v8093_v4  ;;  %4415 = vmatpush1.bf16.msra.mxu1 %v8096_v19  ;;  %v8159_v4 = vld [vmem:[#allocation7 + $0x528] ss:$16 sps:$4 sm:$0xff]  }
 0x4c4   : > { %4375 = vmatprep.subr.bf16.mxu0 %v8101_v0  ;;  %4416 = vmatprep.subr.bf16.mxu1 %v8104_v24  ;;  %v8162_v19 = vld [vmem:[#allocation7 + $0x728] ss:$16 sps:$4 sm:$0xff]   ;;  %v8167_v0 = vld [vmem:[#allocation7 + $0x50c] ss:$16 sps:$4 sm:$0xff]  }
 0x4c5   : > { %v8170_v24 = vld [vmem:[#allocation7 + $0x70c] ss:$16 sps:$4 sm:$0xff]  }
 0x4c7   : > { %4376 = vmatpush1.bf16.msra.mxu0 %v8099_v37  ;;  %4417 = vmatpush1.bf16.msra.mxu1 %v8102_v38  ;;  %v3346_v37 = vrot.slane %v3344_v21, 7  ;;  %v8165_v38 = vld [vmem:[#allocation7 + $0x508] ss:$16 sps:$4 sm:$0xff]  }
 0x4c8   : > { %4377 = vmatprep.subr.bf16.mxu0 %v8107_v41  ;;  %4418 = vmatprep.subr.bf16.mxu1 %v8110_v40  ;;  %v8168_v41 = vld [vmem:[#allocation7 + $0x708] ss:$16 sps:$4 sm:$0xff]   ;;  %v3360_v40 = vrot.slane %v3358_v55, 7 }
 0x4ca   : > { %v3363_v21 = vor.u32 %v3361_v46, %v3360_v40  ;;  %v8185_v46 = vld [vmem:[#allocation7 + $0xa4] ss:$16 sps:$4 sm:$0xff]  }
 0x4cb   : > { %4378 = vmatpush1.bf16.msra.mxu0 %v8105_v43  ;;  %4419 = vmatpush1.bf16.msra.mxu1 %v8108_v42  ;;  %v8173_v43 = vld [vmem:[#allocation7 + $0xe4] ss:$16 sps:$4 sm:$0xff]  }
 0x4cc   : > { %4379 = vmatprep.subr.bf16.mxu0 %v8113_v48  ;;  %4420 = vmatprep.subr.bf16.mxu1 %v8116_v49  ;;  %v8176_v42 = vld [vmem:[#allocation7 + $0x2e4] ss:$16 sps:$4 sm:$0xff]   ;;  %v3349_v48 = vor.u32 %v3347_v14, %v3346_v37  ;;  %v8171_v49 = vld [vmem:[#allocation7 + $0xe0] ss:$16 sps:$4 sm:$0xff]   ;;  %v9277_v1 = vsel %vm8906_vm2, 0, %v3363_v21 }
 0x4cd   : > { %v8180_v14 = vld [vmem:[#allocation7 + $0x2c0] ss:$16 sps:$4 sm:$0xff]   ;;  %v8242_v40 = vld [vmem:[#allocation7 + $0x384] ss:$16 sps:$4 sm:$0xff]  }
 0x4ce   : > { %v9272_v55 = vsel %vm8906_vm2, 0, %v3349_v48  ;;  %v8231_v37 = vld [vmem:[#allocation7 + $0x1a0] ss:$16 sps:$4 sm:$0xff]   ;;  %v8245_v48 = vld [vmem:[#allocation7 + $0x164] ss:$16 sps:$4 sm:$0xff]  }
 0x4cf   : > { %4380 = vmatpush1.bf16.msra.mxu0 %v8111_v50  ;;  %4421 = vmatpush1.bf16.msra.mxu1 %v8114_v52  ;;  %v8174_v50 = vld [vmem:[#allocation7 + $0x2e0] ss:$16 sps:$4 sm:$0xff]   ;;  %v8179_v52 = vld [vmem:[#allocation7 + $0xc4] ss:$16 sps:$4 sm:$0xff]  }
 0x4d0   : > { %4381 = vmatprep.subr.bf16.mxu0 %v8119_v53  ;;  %4422 = vmatprep.subr.bf16.mxu1 %v8122_v7  ;;  %v8182_v53 = vld [vmem:[#allocation7 + $0x2c4] ss:$16 sps:$4 sm:$0xff]   ;;  %v8243_v21 = vld [vmem:[#allocation7 + $0x160] ss:$16 sps:$4 sm:$0xff]  }
 0x4d1   : > { %v8188_v7 = vld [vmem:[#allocation7 + $0x2a4] ss:$16 sps:$4 sm:$0xff]  }
 0x4d3   : > { %4382 = vmatpush1.bf16.msra.mxu0 %v8117_v56  ;;  %4423 = vmatpush1.bf16.msra.mxu1 %v8120_v57  ;;  %v8183_v56 = vld [vmem:[#allocation7 + $0xa0] ss:$16 sps:$4 sm:$0xff]  }
 0x4d4   : > { %4383 = vmatprep.subr.bf16.mxu0 %v8125_v2  ;;  %4424 = vmatprep.subr.bf16.mxu1 %v8128_v18  ;;  %v8186_v57 = vld [vmem:[#allocation7 + $0x2a0] ss:$16 sps:$4 sm:$0xff]   ;;  %v8191_v2 = vld [vmem:[#allocation7 + $0x84] ss:$16 sps:$4 sm:$0xff]  }
 0x4d5   : > { %v8194_v18 = vld [vmem:[#allocation7 + $0x284] ss:$16 sps:$4 sm:$0xff]  }
 0x4d7   : > { %4384 = vmatpush2.bf16.msra.mxu0 %v8123_v3  ;;  %4425 = vmatpush2.bf16.msra.mxu1 %v8126_v59  ;;  %v8189_v3 = vld [vmem:[#allocation7 + $0x80] ss:$16 sps:$4 sm:$0xff]  }
 0x4d8   : > { %4385 = vmatprep.subr.bf16.mxu0 %v8131_v60  ;;  %4426 = vmatprep.subr.bf16.mxu1 %v8134_v61  ;;  %v8192_v59 = vld [vmem:[#allocation7 + $0x280] ss:$16 sps:$4 sm:$0xff]   ;;  %v8197_v60 = vld [vmem:[#allocation7 + $0x64] ss:$16 sps:$4 sm:$0xff]  }
 0x4d9   : > { %v8200_v61 = vld [vmem:[#allocation7 + $0x264] ss:$16 sps:$4 sm:$0xff]  }
 0x4db   : > { %4386 = vmatpush2.bf16.msra.mxu0 %v8129_v36  ;;  %4427 = vmatpush2.bf16.msra.mxu1 %v8132_v10  ;;  %v8195_v36 = vld [vmem:[#allocation7 + $0x60] ss:$16 sps:$4 sm:$0xff]  }
 0x4dc   : > { %4387 = vmatprep.subr.bf16.mxu0 %v8137_v28  ;;  %4428 = vmatprep.subr.bf16.mxu1 %v8140_v62  ;;  %v8198_v10 = vld [vmem:[#allocation7 + $0x260] ss:$16 sps:$4 sm:$0xff]   ;;  %v8203_v28 = vld [vmem:[#allocation7 + $0x44] ss:$16 sps:$4 sm:$0xff]  }
 0x4dd   : > { %v8206_v62 = vld [vmem:[#allocation7 + $0x244] ss:$16 sps:$4 sm:$0xff]  }
 0x4df   : > { %4388 = vmatpush2.bf16.msra.mxu0 %v8135_v12  ;;  %4429 = vmatpush2.bf16.msra.mxu1 %v8138_v8  ;;  %v8201_v12 = vld [vmem:[#allocation7 + $0x40] ss:$16 sps:$4 sm:$0xff]  }
 0x4e0   : > { %4389 = vmatprep.subr.bf16.mxu0 %v8143_v51  ;;  %4430 = vmatprep.subr.bf16.mxu1 %v8146_v39  ;;  %v8204_v8 = vld [vmem:[#allocation7 + $0x240] ss:$16 sps:$4 sm:$0xff]   ;;  %v8209_v51 = vld [vmem:[#allocation7 + $0x24] ss:$16 sps:$4 sm:$0xff]  }
 0x4e1   : > { %v8212_v39 = vld [vmem:[#allocation7 + $0x224] ss:$16 sps:$4 sm:$0xff]  }
 0x4e3   : > { %4390 = vmatpush2.bf16.msra.mxu0 %v8141_v45  ;;  %4431 = vmatpush2.bf16.msra.mxu1 %v8144_v16  ;;  %v8207_v45 = vld [vmem:[#allocation7 + $0x20] ss:$16 sps:$4 sm:$0xff]  }
 0x4e4   : > { %4391 = vmatprep.subr.bf16.mxu0 %v8149_v17  ;;  %4432 = vmatprep.subr.bf16.mxu1 %v8152_v22  ;;  %v8210_v16 = vld [vmem:[#allocation7 + $0x220] ss:$16 sps:$4 sm:$0xff]   ;;  %v8215_v17 = vld [vmem:[#allocation7 + $0x4] ss:$16 sps:$4 sm:$0xff]  }
 0x4e5   : > { %v8218_v22 = vld [vmem:[#allocation7 + $0x204] ss:$16 sps:$4 sm:$0xff]  }
 0x4e7   : > { %4392 = vmatpush2.bf16.msra.mxu0 %v8147_v35  ;;  %4433 = vmatpush2.bf16.msra.mxu1 %v8150_v15  ;;  %v8213_v35 = vld [vmem:[#allocation7] ss:$16 sps:$4 sm:$0xff]  }
 0x4e8   : > { %4393 = vmatprep.subr.bf16.mxu0 %v8155_v27  ;;  %4434 = vmatprep.subr.bf16.mxu1 %v8158_v25  ;;  %v8216_v15 = vld [vmem:[#allocation7 + $0x200] ss:$16 sps:$4 sm:$0xff]   ;;  %v8221_v27 = vld [vmem:[#allocation7 + $0x1e4] ss:$16 sps:$4 sm:$0xff]  }
 0x4e9   : > { %v8224_v25 = vld [vmem:[#allocation7 + $0x3e4] ss:$16 sps:$4 sm:$0xff]  }
 0x4eb   : > { %4394 = vmatpush2.bf16.msra.mxu0 %v8153_v32  ;;  %4435 = vmatpush2.bf16.msra.mxu1 %v8156_v33  ;;  %v8219_v32 = vld [vmem:[#allocation7 + $0x1e0] ss:$16 sps:$4 sm:$0xff]  }
 0x4ec   : > { %4395 = vmatprep.subr.bf16.mxu0 %v8161_v5  ;;  %4436 = vmatprep.subr.bf16.mxu1 %v8164_v6  ;;  %v8222_v33 = vld [vmem:[#allocation7 + $0x3e0] ss:$16 sps:$4 sm:$0xff]   ;;  %v8227_v5 = vld [vmem:[#allocation7 + $0x1c4] ss:$16 sps:$4 sm:$0xff]  }
 0x4ed   : > { %v8230_v6 = vld [vmem:[#allocation7 + $0x3c4] ss:$16 sps:$4 sm:$0xff]  }
 0x4ef   : > { %4396 = vmatpush2.bf16.msra.mxu0 %v8159_v4  ;;  %4437 = vmatpush2.bf16.msra.mxu1 %v8162_v19  ;;  %v8225_v4 = vld [vmem:[#allocation7 + $0x1c0] ss:$16 sps:$4 sm:$0xff]  }
 0x4f0   : > { %4397 = vmatprep.subr.bf16.mxu0 %v8167_v0  ;;  %4438 = vmatprep.subr.bf16.mxu1 %v8170_v24  ;;  %v8228_v19 = vld [vmem:[#allocation7 + $0x3c0] ss:$16 sps:$4 sm:$0xff]   ;;  %v8233_v0 = vld [vmem:[#allocation7 + $0x1a4] ss:$16 sps:$4 sm:$0xff]  }
 0x4f1   : > { %v8236_v24 = vld [vmem:[#allocation7 + $0x3a4] ss:$16 sps:$4 sm:$0xff]  }
 0x4f3   : > { %4398 = vmatpush2.bf16.msra.mxu0 %v8165_v38  ;;  %4439 = vmatpush2.bf16.msra.mxu1 %v8168_v41  ;;  %v8234_v38 = vld [vmem:[#allocation7 + $0x3a0] ss:$16 sps:$4 sm:$0xff]   ;;  %v8239_v41 = vld [vmem:[#allocation7 + $0x184] ss:$16 sps:$4 sm:$0xff]  }
 0x4f4   : > { %5089 = vmatprep.subr.bf16.mxu0 %v8173_v43  ;;  %5130 = vmatprep.subr.bf16.mxu1 %v8176_v42  ;;  %v8237_v43 = vld [vmem:[#allocation7 + $0x180] ss:$16 sps:$4 sm:$0xff]  }
 0x4f5   : > { %v8240_v42 = vld [vmem:[#allocation7 + $0x380] ss:$16 sps:$4 sm:$0xff]  }
 0x4f6   : > { %4400 = vmatmul.mubr.bf16.vlgmr.msra.gmra.mxu0 %v9214_v44  ;;  %4441 = vmatmul.mubr.bf16.vlgmr.msra.gmra.mxu1 %v9216_v9  ;;  %v8273_v9 = vld [vmem:[#allocation7 + $0xc8] ss:$16 sps:$4 sm:$0xff]  }
 0x4f7   : > { %5090 = vmatpush1.bf16.msra.mxu0 %v8171_v49  ;;  %5121 = vmatprep.mubr.bf16.mxu0 %v9272_v55  ;;  %v8248_v49 = vld [vmem:[#allocation7 + $0x364] ss:$16 sps:$4 sm:$0xff]  }
 0x4f8   : > { %5131 = vmatpush1.bf16.msra.mxu1 %v8174_v50  ;;  %5162 = vmatprep.mubr.bf16.mxu1 %v9277_v1  ;;  %v8246_v50 = vld [vmem:[#allocation7 + $0x360] ss:$16 sps:$4 sm:$0xff]  }
 0x4f9   : > { %5091 = vmatprep.subr.bf16.mxu0 %v8179_v52  ;;  %5132 = vmatprep.subr.bf16.mxu1 %v8182_v53  ;;  %v8251_v52 = vld [vmem:[#allocation7 + $0x144] ss:$16 sps:$4 sm:$0xff]  }
 0x4fa   : > { %v8254_v53 = vld [vmem:[#allocation7 + $0x344] ss:$16 sps:$4 sm:$0xff]  }
 0x4fb   : > { %5092 = vmatpush1.bf16.msra.mxu0 %v8177_v54  ;;  %v8249_v54 = vld [vmem:[#allocation7 + $0x140] ss:$16 sps:$4 sm:$0xff]  }
 0x4fc   : > { %5133 = vmatpush1.bf16.msra.mxu1 %v8180_v14  ;;  %5093 = vmatprep.subr.bf16.mxu0 %v8185_v46  ;;  %v8252_v14 = vld [vmem:[#allocation7 + $0x340] ss:$16 sps:$4 sm:$0xff]   ;;  %v8257_v46 = vld [vmem:[#allocation7 + $0x124] ss:$16 sps:$4 sm:$0xff]  }
 0x4fd   : > { %5134 = vmatprep.subr.bf16.mxu1 %v8188_v7  ;;  %v8260_v7 = vld [vmem:[#allocation7 + $0x324] ss:$16 sps:$4 sm:$0xff]  }
 0x4ff   : > { %5094 = vmatpush1.bf16.msra.mxu0 %v8183_v56  ;;  %v8255_v56 = vld [vmem:[#allocation7 + $0x120] ss:$16 sps:$4 sm:$0xff]  }
 0x500   : > { %5135 = vmatpush1.bf16.msra.mxu1 %v8186_v57  ;;  %5095 = vmatprep.subr.bf16.mxu0 %v8191_v2  ;;  %v8258_v57 = vld [vmem:[#allocation7 + $0x320] ss:$16 sps:$4 sm:$0xff]   ;;  %v8263_v2 = vld [vmem:[#allocation7 + $0x104] ss:$16 sps:$4 sm:$0xff]  }
 0x501   : > { %5136 = vmatprep.subr.bf16.mxu1 %v8194_v18  ;;  %v8266_v18 = vld [vmem:[#allocation7 + $0x304] ss:$16 sps:$4 sm:$0xff]  }
 0x503   : > { %5096 = vmatpush1.bf16.msra.mxu0 %v8189_v3  ;;  %v3339_v3 = vrot.slane %v3337_v63, 7  ;;  %v8270_v63 = vld [vmem:[#allocation7 + $0x2e8] ss:$16 sps:$4 sm:$0xff]  }
 0x504   : > { %5137 = vmatpush1.bf16.msra.mxu1 %v8192_v59  ;;  %5097 = vmatprep.subr.bf16.mxu0 %v8197_v60  ;;  %v3353_v59 = vrot.slane %v3351_v26, 7  ;;  %v8261_v60 = vld [vmem:[#allocation7 + $0x100] ss:$16 sps:$4 sm:$0xff]  }
 0x505   : > { %5138 = vmatprep.subr.bf16.mxu1 %v8200_v61  ;;  %v8264_v61 = vld [vmem:[#allocation7 + $0x300] ss:$16 sps:$4 sm:$0xff]  }
 0x507   : > { %5098 = vmatpush1.bf16.msra.mxu0 %v8195_v36  ;;  %v8269_v36 = vld [vmem:[#allocation7 + $0xec] ss:$16 sps:$4 sm:$0xff]  }
 0x508   : > { %5139 = vmatpush1.bf16.msra.mxu1 %v8198_v10  ;;  %5099 = vmatprep.subr.bf16.mxu0 %v8203_v28  ;;  %v3342_v10 = vor.u32 %v3340_v58, %v3339_v3  ;;  %v8272_v28 = vld [vmem:[#allocation7 + $0x2ec] ss:$16 sps:$4 sm:$0xff]  }
 0x509   : > { %5140 = vmatprep.subr.bf16.mxu1 %v8206_v62  ;;  %v3356_v62 = vor.u32 %v3354_v47, %v3353_v59  ;;  %v8278_v58 = vld [vmem:[#allocation7 + $0x2cc] ss:$16 sps:$4 sm:$0xff]   ;;  %v8276_v47 = vld [vmem:[#allocation7 + $0x2c8] ss:$16 sps:$4 sm:$0xff]  }
 0x50a   : > { %v9290_v26 = vsel %vm8906_vm2, 0, %v3342_v10  ;;  %v8344_v3 = vld [vmem:[#allocation7 + $0x36c] ss:$16 sps:$4 sm:$0xff]   ;;  %v8339_v59 = vld [vmem:[#allocation7 + $0x168] ss:$16 sps:$4 sm:$0xff]  }
 0x50b   : > { %5100 = vmatpush1.bf16.msra.mxu0 %v8201_v12  ;;  %v8267_v12 = vld [vmem:[#allocation7 + $0xe8] ss:$16 sps:$4 sm:$0xff]   ;;  %v9295_v44 = vsel %vm8906_vm2, 0, %v3356_v62  ;;  %v8353_v62 = vld [vmem:[#allocation7 + $0x12c] ss:$16 sps:$4 sm:$0xff]  }
 0x50c   : > { %5141 = vmatpush1.bf16.msra.mxu1 %v8204_v8  ;;  %5101 = vmatprep.subr.bf16.mxu0 %v8209_v51  ;;  %v8275_v8 = vld [vmem:[#allocation7 + $0xcc] ss:$16 sps:$4 sm:$0xff]   ;;  %v8345_v10 = vld [vmem:[#allocation7 + $0x148] ss:$16 sps:$4 sm:$0xff]  }
 0x50d   : > { %5142 = vmatprep.subr.bf16.mxu1 %v8212_v39  ;;  %v8281_v51 = vld [vmem:[#allocation7 + $0xac] ss:$16 sps:$4 sm:$0xff]  }
 0x50e   : > { %v8284_v39 = vld [vmem:[#allocation7 + $0x2ac] ss:$16 sps:$4 sm:$0xff]  }
 0x50f   : > { %5102 = vmatpush1.bf16.msra.mxu0 %v8207_v45  ;;  %v8279_v45 = vld [vmem:[#allocation7 + $0xa8] ss:$16 sps:$4 sm:$0xff]  }
 0x510   : > { %5143 = vmatpush1.bf16.msra.mxu1 %v8210_v16  ;;  %5103 = vmatprep.subr.bf16.mxu0 %v8215_v17  ;;  %v8287_v16 = vld [vmem:[#allocation7 + $0x8c] ss:$16 sps:$4 sm:$0xff]  }
 0x511   : > { %5144 = vmatprep.subr.bf16.mxu1 %v8218_v22  ;;  %v8290_v17 = vld [vmem:[#allocation7 + $0x28c] ss:$16 sps:$4 sm:$0xff]   ;;  %v8285_v22 = vld [vmem:[#allocation7 + $0x88] ss:$16 sps:$4 sm:$0xff]  }
 0x513   : > { %5104 = vmatpush1.bf16.msra.mxu0 %v8213_v35  ;;  %v8293_v35 = vld [vmem:[#allocation7 + $0x6c] ss:$16 sps:$4 sm:$0xff]  }
 0x514   : > { %5145 = vmatpush1.bf16.msra.mxu1 %v8216_v15  ;;  %5105 = vmatprep.subr.bf16.mxu0 %v8221_v27  ;;  %v8296_v15 = vld [vmem:[#allocation7 + $0x26c] ss:$16 sps:$4 sm:$0xff]   ;;  %v8294_v27 = vld [vmem:[#allocation7 + $0x268] ss:$16 sps:$4 sm:$0xff]  }
 0x515   : > { %5146 = vmatprep.subr.bf16.mxu1 %v8224_v25  ;;  %v8299_v25 = vld [vmem:[#allocation7 + $0x4c] ss:$16 sps:$4 sm:$0xff]  }
 0x517   : > { %5106 = vmatpush2.bf16.msra.mxu0 %v8219_v32  ;;  %v8302_v32 = vld [vmem:[#allocation7 + $0x24c] ss:$16 sps:$4 sm:$0xff]  }
 0x518   : > { %5147 = vmatpush2.bf16.msra.mxu1 %v8222_v33  ;;  %5107 = vmatprep.subr.bf16.mxu0 %v8227_v5  ;;  %v8297_v33 = vld [vmem:[#allocation7 + $0x48] ss:$16 sps:$4 sm:$0xff]  }
 0x519   : > { %5148 = vmatprep.subr.bf16.mxu1 %v8230_v6  ;;  %v8300_v5 = vld [vmem:[#allocation7 + $0x248] ss:$16 sps:$4 sm:$0xff]   ;;  %v8305_v6 = vld [vmem:[#allocation7 + $0x2c] ss:$16 sps:$4 sm:$0xff]  }
 0x51b   : > { %5108 = vmatpush2.bf16.msra.mxu0 %v8225_v4  ;;  %v8308_v4 = vld [vmem:[#allocation7 + $0x22c] ss:$16 sps:$4 sm:$0xff]  }
 0x51c   : > { %5149 = vmatpush2.bf16.msra.mxu1 %v8228_v19  ;;  %5109 = vmatprep.subr.bf16.mxu0 %v8233_v0  ;;  %v8303_v19 = vld [vmem:[#allocation7 + $0x28] ss:$16 sps:$4 sm:$0xff]  }
 0x51d   : > { %5150 = vmatprep.subr.bf16.mxu1 %v8236_v24  ;;  %v8306_v0 = vld [vmem:[#allocation7 + $0x228] ss:$16 sps:$4 sm:$0xff]   ;;  %v8311_v24 = vld [vmem:[#allocation7 + $0xc] ss:$16 sps:$4 sm:$0xff]  }
 0x51f   : > { %5110 = vmatpush2.bf16.msra.mxu0 %v8231_v37  ;;  %v8314_v37 = vld [vmem:[#allocation7 + $0x20c] ss:$16 sps:$4 sm:$0xff]  }
 0x520   : > { %5151 = vmatpush2.bf16.msra.mxu1 %v8234_v38  ;;  %5111 = vmatprep.subr.bf16.mxu0 %v8239_v41  ;;  %v8309_v38 = vld [vmem:[#allocation7 + $0x8] ss:$16 sps:$4 sm:$0xff]  }
 0x521   : > { %5152 = vmatprep.subr.bf16.mxu1 %v8242_v40  ;;  %v8312_v41 = vld [vmem:[#allocation7 + $0x208] ss:$16 sps:$4 sm:$0xff]   ;;  %v8317_v40 = vld [vmem:[#allocation7 + $0x1ec] ss:$16 sps:$4 sm:$0xff]  }
 0x523   : > { %5112 = vmatpush2.bf16.msra.mxu0 %v8237_v43  ;;  %v8320_v43 = vld [vmem:[#allocation7 + $0x3ec] ss:$16 sps:$4 sm:$0xff]  }
 0x524   : > { %5153 = vmatpush2.bf16.msra.mxu1 %v8240_v42  ;;  %5113 = vmatprep.subr.bf16.mxu0 %v8245_v48  ;;  %v8315_v42 = vld [vmem:[#allocation7 + $0x1e8] ss:$16 sps:$4 sm:$0xff]  }
 0x525   : > { %5154 = vmatprep.subr.bf16.mxu1 %v8248_v49  ;;  %v8318_v48 = vld [vmem:[#allocation7 + $0x3e8] ss:$16 sps:$4 sm:$0xff]   ;;  %v8323_v49 = vld [vmem:[#allocation7 + $0x1cc] ss:$16 sps:$4 sm:$0xff]  }
 0x527   : > { %5114 = vmatpush2.bf16.msra.mxu0 %v8243_v21  ;;  %v8326_v21 = vld [vmem:[#allocation7 + $0x3cc] ss:$16 sps:$4 sm:$0xff]  }
 0x528   : > { %5155 = vmatpush2.bf16.msra.mxu1 %v8246_v50  ;;  %5115 = vmatprep.subr.bf16.mxu0 %v8251_v52  ;;  %v8321_v50 = vld [vmem:[#allocation7 + $0x1c8] ss:$16 sps:$4 sm:$0xff]  }
 0x529   : > { %5156 = vmatprep.subr.bf16.mxu1 %v8254_v53  ;;  %v8324_v52 = vld [vmem:[#allocation7 + $0x3c8] ss:$16 sps:$4 sm:$0xff]   ;;  %v8329_v53 = vld [vmem:[#allocation7 + $0x1ac] ss:$16 sps:$4 sm:$0xff]  }
 0x52b   : > { %5116 = vmatpush2.bf16.msra.mxu0 %v8249_v54  ;;  %v8332_v54 = vld [vmem:[#allocation7 + $0x3ac] ss:$16 sps:$4 sm:$0xff]  }
 0x52c   : > { %5157 = vmatpush2.bf16.msra.mxu1 %v8252_v14  ;;  %5117 = vmatprep.subr.bf16.mxu0 %v8257_v46  ;;  %v8327_v14 = vld [vmem:[#allocation7 + $0x1a8] ss:$16 sps:$4 sm:$0xff]  }
 0x52d   : > { %5158 = vmatprep.subr.bf16.mxu1 %v8260_v7  ;;  %v8330_v46 = vld [vmem:[#allocation7 + $0x3a8] ss:$16 sps:$4 sm:$0xff]   ;;  %v8335_v7 = vld [vmem:[#allocation7 + $0x18c] ss:$16 sps:$4 sm:$0xff]  }
 0x52f   : > { %5118 = vmatpush2.bf16.msra.mxu0 %v8255_v56  ;;  %v8338_v56 = vld [vmem:[#allocation7 + $0x38c] ss:$16 sps:$4 sm:$0xff]  }
 0x530   : > { %5159 = vmatpush2.bf16.msra.mxu1 %v8258_v57  ;;  %5119 = vmatprep.subr.bf16.mxu0 %v8263_v2  ;;  %v8333_v57 = vld [vmem:[#allocation7 + $0x188] ss:$16 sps:$4 sm:$0xff]  }
 0x531   : > { %5160 = vmatprep.subr.bf16.mxu1 %v8266_v18  ;;  %v8336_v2 = vld [vmem:[#allocation7 + $0x388] ss:$16 sps:$4 sm:$0xff]   ;;  %v8341_v18 = vld [vmem:[#allocation7 + $0x16c] ss:$16 sps:$4 sm:$0xff]  }
 0x533   : > { %5120 = vmatpush2.bf16.msra.mxu0 %v8261_v60  ;;  %v8342_v60 = vld [vmem:[#allocation7 + $0x368] ss:$16 sps:$4 sm:$0xff]  }
 0x534   : > { %5161 = vmatpush2.bf16.msra.mxu1 %v8264_v61  ;;  %5171 = vmatprep.subr.bf16.mxu0 %v8269_v36  ;;  %v8347_v61 = vld [vmem:[#allocation7 + $0x14c] ss:$16 sps:$4 sm:$0xff]  }
 0x535   : > { %5212 = vmatprep.subr.bf16.mxu1 %v8272_v28  ;;  %v8350_v36 = vld [vmem:[#allocation7 + $0x34c] ss:$16 sps:$4 sm:$0xff]   ;;  %v8348_v28 = vld [vmem:[#allocation7 + $0x348] ss:$16 sps:$4 sm:$0xff]  }
 0x536   : > { %5122 = vmatmul.mubr.bf16.vlgmr.msra.gmra.mxu0 %v9290_v26 }
 0x537   : > { %5163 = vmatmul.mubr.bf16.vlgmr.msra.gmra.mxu1 %v9295_v44  ;;  %5172 = vmatpush1.bf16.msra.mxu0 %v8267_v12  ;;  %v8356_v12 = vld [vmem:[#allocation7 + $0x32c] ss:$16 sps:$4 sm:$0xff]  }
 0x538   : > { %5203 = vmatprep.mubr.bf16.mxu0 %v9272_v55  ;;  %5213 = vmatpush1.bf16.msra.mxu1 %v8270_v63  ;;  %v8288_v55 = vld [vmem:[#allocation7 + $0x288] ss:$16 sps:$4 sm:$0xff]  }
 0x539   : > { %5244 = vmatprep.mubr.bf16.mxu1 %v9277_v1  ;;  %5173 = vmatprep.subr.bf16.mxu0 %v8275_v8  ;;  %v8291_v1 = vld [vmem:[#allocation7 + $0x68] ss:$16 sps:$4 sm:$0xff]  }
 0x53a   : > { %5214 = vmatprep.subr.bf16.mxu1 %v8278_v58  ;;  %v8351_v63 = vld [vmem:[#allocation7 + $0x128] ss:$16 sps:$4 sm:$0xff]   ;;  %v8359_v58 = vld [vmem:[#allocation7 + $0x10c] ss:$16 sps:$4 sm:$0xff]  }
 0x53b   : > { %5174 = vmatpush1.bf16.msra.mxu0 %v8273_v9  ;;  %v8354_v8 = vld [vmem:[#allocation7 + $0x328] ss:$16 sps:$4 sm:$0xff]   ;;  %v8362_v9 = vld [vmem:[#allocation7 + $0x30c] ss:$16 sps:$4 sm:$0xff]  }
 0x53c   : > { %5215 = vmatpush1.bf16.msra.mxu1 %v8276_v47  ;;  %5175 = vmatprep.subr.bf16.mxu0 %v8281_v51  ;;  %v8357_v47 = vld [vmem:[#allocation7 + $0x108] ss:$16 sps:$4 sm:$0xff]  }
 0x53d   : > { %5216 = vmatprep.subr.bf16.mxu1 %v8284_v39  ;;  %v8360_v51 = vld [vmem:[#allocation7 + $0x308] ss:$16 sps:$4 sm:$0xff]   ;;  %v8365_v39 = vld [vmem:[#allocation7 + $0x8e4] ss:$16 sps:$4 sm:$0xff]  }
 0x53f   : > { %5176 = vmatpush1.bf16.msra.mxu0 %v8279_v45  ;;  %v8368_v45 = vld [vmem:[#allocation7 + $0xae4] ss:$16 sps:$4 sm:$0xff]  }
 0x540   : > { %5217 = vmatpush1.bf16.msra.mxu1 %v8282_v23  ;;  %5177 = vmatprep.subr.bf16.mxu0 %v8287_v16  ;;  %v8363_v23 = vld [vmem:[#allocation7 + $0x8e0] ss:$16 sps:$4 sm:$0xff]  }
 0x541   : > { %5218 = vmatprep.subr.bf16.mxu1 %v8290_v17  ;;  %v8366_v16 = vld [vmem:[#allocation7 + $0xae0] ss:$16 sps:$4 sm:$0xff]   ;;  %v8371_v17 = vld [vmem:[#allocation7 + $0x8c4] ss:$16 sps:$4 sm:$0xff]  }
 0x543   : > { %5178 = vmatpush1.bf16.msra.mxu0 %v8285_v22 }
 0x544   : > { %5219 = vmatpush1.bf16.msra.mxu1 %v8288_v55  ;;  %5179 = vmatprep.subr.bf16.mxu0 %v8293_v35  ;;  %v8374_v35 = vld [vmem:[#allocation7 + $0xac4] ss:$16 sps:$4 sm:$0xff]  }
 0x545   : > { %5220 = vmatprep.subr.bf16.mxu1 %v8296_v15 }
 0x547   : > { %5180 = vmatpush1.bf16.msra.mxu0 %v8291_v1  ;;  %v9307_v1 = vsel %vm8954_vm5, %v9246_v29, 0  ;;  %v8380_v29 = vld [vmem:[#allocation7 + $0xaa4] ss:$16 sps:$4 sm:$0xff]  }
 0x548   : > { %5221 = vmatpush1.bf16.msra.mxu1 %v8294_v27  ;;  %5181 = vmatprep.subr.bf16.mxu0 %v8299_v25  ;;  %v8369_v27 = vld [vmem:[#allocation7 + $0x8c0] ss:$16 sps:$4 sm:$0xff]  }
 0x549   : > { %5222 = vmatprep.subr.bf16.mxu1 %v8302_v32 }
 0x54b   : > { %5182 = vmatpush1.bf16.msra.mxu0 %v8297_v33  ;;  %v8377_v33 = vld [vmem:[#allocation7 + $0x8a4] ss:$16 sps:$4 sm:$0xff]  }
 0x54c   : > { %5223 = vmatpush1.bf16.msra.mxu1 %v8300_v5  ;;  %5183 = vmatprep.subr.bf16.mxu0 %v8305_v6 }
 0x54d   : > { %5224 = vmatprep.subr.bf16.mxu1 %v8308_v4 }
 0x54f   : > { %5184 = vmatpush1.bf16.msra.mxu0 %v8303_v19  ;;  %v8375_v19 = vld [vmem:[#allocation7 + $0x8a0] ss:$16 sps:$4 sm:$0xff]  }
 0x550   : > { %5225 = vmatpush1.bf16.msra.mxu1 %v8306_v0  ;;  %5185 = vmatprep.subr.bf16.mxu0 %v8311_v24 }
 0x551   : > { %5226 = vmatprep.subr.bf16.mxu1 %v8314_v37  ;;  %v8383_v37 = vld [vmem:[#allocation7 + $0x884] ss:$16 sps:$4 sm:$0xff]  }
 0x553   : > { %5186 = vmatpush1.bf16.msra.mxu0 %v8309_v38  ;;  %v8386_v38 = vld [vmem:[#allocation7 + $0xa84] ss:$16 sps:$4 sm:$0xff]  }
 0x554   : > { %5227 = vmatpush1.bf16.msra.mxu1 %v8312_v41  ;;  %5187 = vmatprep.subr.bf16.mxu0 %v8317_v40  ;;  %v8381_v41 = vld [vmem:[#allocation7 + $0x880] ss:$16 sps:$4 sm:$0xff]  }
 0x555   : > { %5228 = vmatprep.subr.bf16.mxu1 %v8320_v43  ;;  %v8384_v40 = vld [vmem:[#allocation7 + $0xa80] ss:$16 sps:$4 sm:$0xff]   ;;  %v8389_v43 = vld [vmem:[#allocation7 + $0x864] ss:$16 sps:$4 sm:$0xff]  }
 0x557   : > { %5188 = vmatpush2.bf16.msra.mxu0 %v8315_v42  ;;  %v8392_v42 = vld [vmem:[#allocation7 + $0xa64] ss:$16 sps:$4 sm:$0xff]  }
 0x558   : > { %5229 = vmatpush2.bf16.msra.mxu1 %v8318_v48  ;;  %5189 = vmatprep.subr.bf16.mxu0 %v8323_v49  ;;  %v8387_v48 = vld [vmem:[#allocation7 + $0x860] ss:$16 sps:$4 sm:$0xff]  }
 0x559   : > { %5230 = vmatprep.subr.bf16.mxu1 %v8326_v21  ;;  %v8390_v49 = vld [vmem:[#allocation7 + $0xa60] ss:$16 sps:$4 sm:$0xff]   ;;  %v8395_v21 = vld [vmem:[#allocation7 + $0x844] ss:$16 sps:$4 sm:$0xff]  }
 0x55b   : > { %5190 = vmatpush2.bf16.msra.mxu0 %v8321_v50  ;;  %v8398_v50 = vld [vmem:[#allocation7 + $0xa44] ss:$16 sps:$4 sm:$0xff]  }
 0x55c   : > { %5231 = vmatpush2.bf16.msra.mxu1 %v8324_v52  ;;  %5191 = vmatprep.subr.bf16.mxu0 %v8329_v53  ;;  %v8393_v52 = vld [vmem:[#allocation7 + $0x840] ss:$16 sps:$4 sm:$0xff]  }
 0x55d   : > { %5232 = vmatprep.subr.bf16.mxu1 %v8332_v54  ;;  %v8396_v53 = vld [vmem:[#allocation7 + $0xa40] ss:$16 sps:$4 sm:$0xff]   ;;  %v8401_v54 = vld [vmem:[#allocation7 + $0x824] ss:$16 sps:$4 sm:$0xff]  }
 0x55f   : > { %5192 = vmatpush2.bf16.msra.mxu0 %v8327_v14  ;;  %v8404_v14 = vld [vmem:[#allocation7 + $0xa24] ss:$16 sps:$4 sm:$0xff]  }
 0x560   : > { %5233 = vmatpush2.bf16.msra.mxu1 %v8330_v46  ;;  %5193 = vmatprep.subr.bf16.mxu0 %v8335_v7  ;;  %v8399_v46 = vld [vmem:[#allocation7 + $0x820] ss:$16 sps:$4 sm:$0xff]  }
 0x561   : > { %5234 = vmatprep.subr.bf16.mxu1 %v8338_v56  ;;  %v8402_v7 = vld [vmem:[#allocation7 + $0xa20] ss:$16 sps:$4 sm:$0xff]   ;;  %v8407_v56 = vld [vmem:[#allocation7 + $0x804] ss:$16 sps:$4 sm:$0xff]  }
 0x563   : > { %5194 = vmatpush2.bf16.msra.mxu0 %v8333_v57  ;;  %v8410_v57 = vld [vmem:[#allocation7 + $0xa04] ss:$16 sps:$4 sm:$0xff]  }
 0x564   : > { %5235 = vmatpush2.bf16.msra.mxu1 %v8336_v2  ;;  %5195 = vmatprep.subr.bf16.mxu0 %v8341_v18  ;;  %v8405_v2 = vld [vmem:[#allocation7 + $0x800] ss:$16 sps:$4 sm:$0xff]  }
 0x565   : > { %5236 = vmatprep.subr.bf16.mxu1 %v8344_v3  ;;  %v8408_v18 = vld [vmem:[#allocation7 + $0xa00] ss:$16 sps:$4 sm:$0xff]   ;;  %v8413_v3 = vld [vmem:[#allocation7 + $0x9e4] ss:$16 sps:$4 sm:$0xff]  }
 0x567   : > { %5196 = vmatpush2.bf16.msra.mxu0 %v8339_v59  ;;  %v8416_v59 = vld [vmem:[#allocation7 + $0xbe4] ss:$16 sps:$4 sm:$0xff]  }
 0x568   : > { %5237 = vmatpush2.bf16.msra.mxu1 %v8342_v60  ;;  %5197 = vmatprep.subr.bf16.mxu0 %v8347_v61  ;;  %v8411_v60 = vld [vmem:[#allocation7 + $0x9e0] ss:$16 sps:$4 sm:$0xff]  }
 0x569   : > { %5238 = vmatprep.subr.bf16.mxu1 %v8350_v36  ;;  %v8414_v61 = vld [vmem:[#allocation7 + $0xbe0] ss:$16 sps:$4 sm:$0xff]   ;;  %v8419_v36 = vld [vmem:[#allocation7 + $0x9c4] ss:$16 sps:$4 sm:$0xff]  }
 0x56b   : > { %5198 = vmatpush2.bf16.msra.mxu0 %v8345_v10  ;;  %v8422_v10 = vld [vmem:[#allocation7 + $0xbc4] ss:$16 sps:$4 sm:$0xff]  }
 0x56c   : > { %5239 = vmatpush2.bf16.msra.mxu1 %v8348_v28  ;;  %5199 = vmatprep.subr.bf16.mxu0 %v8353_v62  ;;  %v8417_v28 = vld [vmem:[#allocation7 + $0x9c0] ss:$16 sps:$4 sm:$0xff]  }
 0x56d   : > { %5240 = vmatprep.subr.bf16.mxu1 %v8356_v12  ;;  %v8420_v62 = vld [vmem:[#allocation7 + $0xbc0] ss:$16 sps:$4 sm:$0xff]   ;;  %v8425_v12 = vld [vmem:[#allocation7 + $0x9a4] ss:$16 sps:$4 sm:$0xff]  }
 0x56f   : > { %5200 = vmatpush2.bf16.msra.mxu0 %v8351_v63  ;;  %v8428_v63 = vld [vmem:[#allocation7 + $0xba4] ss:$16 sps:$4 sm:$0xff]  }
 0x570   : > { %5241 = vmatpush2.bf16.msra.mxu1 %v8354_v8  ;;  %5201 = vmatprep.subr.bf16.mxu0 %v8359_v58  ;;  %v8423_v8 = vld [vmem:[#allocation7 + $0x9a0] ss:$16 sps:$4 sm:$0xff]  }
 0x571   : > { %5242 = vmatprep.subr.bf16.mxu1 %v8362_v9  ;;  %v8426_v58 = vld [vmem:[#allocation7 + $0xba0] ss:$16 sps:$4 sm:$0xff]   ;;  %v8431_v9 = vld [vmem:[#allocation7 + $0x984] ss:$16 sps:$4 sm:$0xff]  }
 0x573   : > { %5202 = vmatpush2.bf16.msra.mxu0 %v8357_v47  ;;  %v8434_v47 = vld [vmem:[#allocation7 + $0xb84] ss:$16 sps:$4 sm:$0xff]  }
 0x574   : > { %5243 = vmatpush2.bf16.msra.mxu1 %v8360_v51  ;;  %6022 = vmatprep.subr.bf16.mxu0 %v8365_v39  ;;  %v8429_v51 = vld [vmem:[#allocation7 + $0x980] ss:$16 sps:$4 sm:$0xff]  }
 0x575   : > { %6063 = vmatprep.subr.bf16.mxu1 %v8368_v45  ;;  %v8432_v39 = vld [vmem:[#allocation7 + $0xb80] ss:$16 sps:$4 sm:$0xff]   ;;  %v8437_v45 = vld [vmem:[#allocation7 + $0x964] ss:$16 sps:$4 sm:$0xff]  }
 0x576   : > { %5204 = vmatmul.mubr.bf16.vlgmr.msra.gmra.mxu0 %v9290_v26  ;;  %v4319_v22 = vpop.f32.mrf.mxu0  ;;  %v4360_v55 = vpop.f32.mrf.mxu1  ;;  %v9313_v26 = vsel %vm8954_vm5, %v9250_v30, 0  ;;  %v8378_v30 = vld [vmem:[#allocation7 + $0xaa0] ss:$16 sps:$4 sm:$0xff]  }
 0x577   : > { %5245 = vmatmul.mubr.bf16.vlgmr.msra.gmra.mxu1 %v9295_v44  ;;  %v9302_v15 = vadd.f32 %v4360_v55, %v4319_v22  ;;  %6023 = vmatpush1.bf16.msra.mxu0 %v8363_v23  ;;  %v8372_v44 = vld [vmem:[#allocation7 + $0xac0] ss:$16 sps:$4 sm:$0xff]   ;;  %v8440_v23 = vld [vmem:[#allocation7 + $0xb64] ss:$16 sps:$4 sm:$0xff]  }
 0x578   : > { %6054 = vmatprep.mubr.bf16.mxu0 %v9307_v1  ;;  %6064 = vmatpush1.bf16.msra.mxu1 %v8366_v16  ;;  %v4321_v25 = vpop.f32.mrf.mxu0  ;;  %v4362_v32 = vpop.f32.mrf.mxu1  ;;  %v8435_v16 = vld [vmem:[#allocation7 + $0x960] ss:$16 sps:$4 sm:$0xff]   ;;  %v8443_v22 = vld [vmem:[#allocation7 + $0x944] ss:$16 sps:$4 sm:$0xff]  }
 0x579   : > { %6095 = vmatprep.mubr.bf16.mxu1 %v9313_v26  ;;  %v9316_v5 = vadd.f32 %v4362_v32, %v4321_v25  ;;  %6024 = vmatprep.subr.bf16.mxu0 %v8371_v17  ;;  %v8438_v17 = vld [vmem:[#allocation7 + $0xb60] ss:$16 sps:$4 sm:$0xff]   ;;  %v8446_v55 = vld [vmem:[#allocation7 + $0xb44] ss:$16 sps:$4 sm:$0xff]  }
 0x57a   : > { %6065 = vmatprep.subr.bf16.mxu1 %v8374_v35  ;;  %v4323_v6 = vpop.f32.mrf.mxu0  ;;  %v4364_v4 = vpop.f32.mrf.mxu1  ;;  %v8441_v35 = vld [vmem:[#allocation7 + $0x940] ss:$16 sps:$4 sm:$0xff]   ;;  %v8449_v25 = vld [vmem:[#allocation7 + $0x924] ss:$16 sps:$4 sm:$0xff]  }
 0x57b   : > { %6025 = vmatpush1.bf16.msra.mxu0 %v8369_v27  ;;  %v8444_v27 = vld [vmem:[#allocation7 + $0xb40] ss:$16 sps:$4 sm:$0xff]   ;;  %v8452_v32 = vld [vmem:[#allocation7 + $0xb24] ss:$16 sps:$4 sm:$0xff]  }
 0x57c   : > { %6066 = vmatpush1.bf16.msra.mxu1 %v8372_v44  ;;  %v4324_v0 = vpop.f32.mrf.mxu0  ;;  %v4365_v24 = vpop.f32.mrf.mxu1  ;;  %6026 = vmatprep.subr.bf16.mxu0 %v8377_v33  ;;  %v8447_v44 = vld [vmem:[#allocation7 + $0x920] ss:$16 sps:$4 sm:$0xff]   ;;  %v8458_v6 = vld [vmem:[#allocation7 + $0xb04] ss:$16 sps:$4 sm:$0xff]  }
 0x57d   : > { %6067 = vmatprep.subr.bf16.mxu1 %v8380_v29  ;;  %v8450_v33 = vld [vmem:[#allocation7 + $0xb20] ss:$16 sps:$4 sm:$0xff]   ;;  %v8455_v29 = vld [vmem:[#allocation7 + $0x904] ss:$16 sps:$4 sm:$0xff]   ;;  %v8461_v0 = vld [vmem:[#allocation7 + $0x8ec] ss:$16 sps:$4 sm:$0xff]  }
 0x57e   : > { %v8453_v4 = vld [vmem:[#allocation7 + $0x900] ss:$16 sps:$4 sm:$0xff]   ;;  %v8464_v24 = vld [vmem:[#allocation7 + $0xaec] ss:$16 sps:$4 sm:$0xff]  }
 0x57f   : > { %6027 = vmatpush1.bf16.msra.mxu0 %v8375_v19  ;;  %v8456_v19 = vld [vmem:[#allocation7 + $0xb00] ss:$16 sps:$4 sm:$0xff]  }
 0x580   : > { %6068 = vmatpush1.bf16.msra.mxu1 %v8378_v30  ;;  %6028 = vmatprep.subr.bf16.mxu0 %v8383_v37  ;;  %v8459_v30 = vld [vmem:[#allocation7 + $0x8e8] ss:$16 sps:$4 sm:$0xff]  }
 0x581   : > { %6069 = vmatprep.subr.bf16.mxu1 %v8386_v38  ;;  %v8462_v37 = vld [vmem:[#allocation7 + $0xae8] ss:$16 sps:$4 sm:$0xff]   ;;  %v9321_v38 = vsel %vm8954_vm5, %v9254_v31, 0 }
 0x583   : > { %6029 = vmatpush1.bf16.msra.mxu0 %v8381_v41  ;;  %v8467_v41 = vld [vmem:[#allocation7 + $0x8cc] ss:$16 sps:$4 sm:$0xff]  }
 0x584   : > { %6070 = vmatpush1.bf16.msra.mxu1 %v8384_v40  ;;  %6030 = vmatprep.subr.bf16.mxu0 %v8389_v43 }
 0x585   : > { %6071 = vmatprep.subr.bf16.mxu1 %v8392_v42  ;;  %v9327_v42 = vsel %vm8954_vm5, %v9258_v34, 0 }
 0x587   : > { %6031 = vmatpush1.bf16.msra.mxu0 %v8387_v48  ;;  %v8470_v48 = vld [vmem:[#allocation7 + $0xacc] ss:$16 sps:$4 sm:$0xff]  }
 0x588   : > { %6072 = vmatpush1.bf16.msra.mxu1 %v8390_v49  ;;  %6032 = vmatprep.subr.bf16.mxu0 %v8395_v21  ;;  %v8465_v21 = vld [vmem:[#allocation7 + $0x8c8] ss:$16 sps:$4 sm:$0xff]  }
 0x589   : > { %6073 = vmatprep.subr.bf16.mxu1 %v8398_v50 }
 0x58b   : > { %6033 = vmatpush1.bf16.msra.mxu0 %v8393_v52  ;;  %v8468_v52 = vld [vmem:[#allocation7 + $0xac8] ss:$16 sps:$4 sm:$0xff]  }
 0x58c   : > { %6074 = vmatpush1.bf16.msra.mxu1 %v8396_v53  ;;  %6034 = vmatprep.subr.bf16.mxu0 %v8401_v54  ;;  %v8473_v53 = vld [vmem:[#allocation7 + $0x8ac] ss:$16 sps:$4 sm:$0xff]  }
 0x58d   : > { %6075 = vmatprep.subr.bf16.mxu1 %v8404_v14 }
 0x58f   : > { %6035 = vmatpush1.bf16.msra.mxu0 %v8399_v46  ;;  %v8471_v46 = vld [vmem:[#allocation7 + $0x8a8] ss:$16 sps:$4 sm:$0xff]  }
 0x590   : > { %6076 = vmatpush1.bf16.msra.mxu1 %v8402_v7  ;;  %6036 = vmatprep.subr.bf16.mxu0 %v8407_v56 }
 0x591   : > { %6077 = vmatprep.subr.bf16.mxu1 %v8410_v57  ;;  %v8479_v57 = vld [vmem:[#allocation7 + $0x88c] ss:$16 sps:$4 sm:$0xff]  }
 0x593   : > { %6037 = vmatpush1.bf16.msra.mxu0 %v8405_v2  ;;  %v8482_v2 = vld [vmem:[#allocation7 + $0xa8c] ss:$16 sps:$4 sm:$0xff]  }
 0x594   : > { %6078 = vmatpush1.bf16.msra.mxu1 %v8408_v18  ;;  %6038 = vmatprep.subr.bf16.mxu0 %v8413_v3  ;;  %v8477_v18 = vld [vmem:[#allocation7 + $0x888] ss:$16 sps:$4 sm:$0xff]   ;;  %v8485_v3 = vld [vmem:[#allocation7 + $0x86c] ss:$16 sps:$4 sm:$0xff]  }
 0x595   : > { %6079 = vmatprep.subr.bf16.mxu1 %v8416_v59  ;;  %v8488_v59 = vld [vmem:[#allocation7 + $0xa6c] ss:$16 sps:$4 sm:$0xff]  }
 0x597   : > { %6039 = vmatpush2.bf16.msra.mxu0 %v8411_v60  ;;  %v8483_v60 = vld [vmem:[#allocation7 + $0x868] ss:$16 sps:$4 sm:$0xff]  }
 0x598   : > { %6080 = vmatpush2.bf16.msra.mxu1 %v8414_v61  ;;  %6040 = vmatprep.subr.bf16.mxu0 %v8419_v36  ;;  %v8486_v61 = vld [vmem:[#allocation7 + $0xa68] ss:$16 sps:$4 sm:$0xff]   ;;  %v8491_v36 = vld [vmem:[#allocation7 + $0x84c] ss:$16 sps:$4 sm:$0xff]  }
 0x599   : > { %6081 = vmatprep.subr.bf16.mxu1 %v8422_v10  ;;  %v8494_v10 = vld [vmem:[#allocation7 + $0xa4c] ss:$16 sps:$4 sm:$0xff]  }
 0x59b   : > { %6041 = vmatpush2.bf16.msra.mxu0 %v8417_v28  ;;  %v8489_v28 = vld [vmem:[#allocation7 + $0x848] ss:$16 sps:$4 sm:$0xff]  }
 0x59c   : > { %6082 = vmatpush2.bf16.msra.mxu1 %v8420_v62  ;;  %6042 = vmatprep.subr.bf16.mxu0 %v8425_v12  ;;  %v8492_v62 = vld [vmem:[#allocation7 + $0xa48] ss:$16 sps:$4 sm:$0xff]   ;;  %v8497_v12 = vld [vmem:[#allocation7 + $0x82c] ss:$16 sps:$4 sm:$0xff]  }
 0x59d   : > { %6083 = vmatprep.subr.bf16.mxu1 %v8428_v63  ;;  %v8500_v63 = vld [vmem:[#allocation7 + $0xa2c] ss:$16 sps:$4 sm:$0xff]  }
 0x59f   : > { %6043 = vmatpush2.bf16.msra.mxu0 %v8423_v8  ;;  %v8495_v8 = vld [vmem:[#allocation7 + $0x828] ss:$16 sps:$4 sm:$0xff]  }
 0x5a0   : > { %6084 = vmatpush2.bf16.msra.mxu1 %v8426_v58  ;;  %6044 = vmatprep.subr.bf16.mxu0 %v8431_v9  ;;  %v8498_v58 = vld [vmem:[#allocation7 + $0xa28] ss:$16 sps:$4 sm:$0xff]   ;;  %v8503_v9 = vld [vmem:[#allocation7 + $0x80c] ss:$16 sps:$4 sm:$0xff]  }
 0x5a1   : > { %6085 = vmatprep.subr.bf16.mxu1 %v8434_v47  ;;  %v8506_v47 = vld [vmem:[#allocation7 + $0xa0c] ss:$16 sps:$4 sm:$0xff]  }
 0x5a3   : > { %6045 = vmatpush2.bf16.msra.mxu0 %v8429_v51  ;;  %v8501_v51 = vld [vmem:[#allocation7 + $0x808] ss:$16 sps:$4 sm:$0xff]  }
 0x5a4   : > { %6086 = vmatpush2.bf16.msra.mxu1 %v8432_v39  ;;  %6046 = vmatprep.subr.bf16.mxu0 %v8437_v45  ;;  %v8504_v39 = vld [vmem:[#allocation7 + $0xa08] ss:$16 sps:$4 sm:$0xff]   ;;  %v8509_v45 = vld [vmem:[#allocation7 + $0x9ec] ss:$16 sps:$4 sm:$0xff]  }
 0x5a5   : > { %6087 = vmatprep.subr.bf16.mxu1 %v8440_v23  ;;  %v8512_v23 = vld [vmem:[#allocation7 + $0xbec] ss:$16 sps:$4 sm:$0xff]  }
 0x5a7   : > { %6047 = vmatpush2.bf16.msra.mxu0 %v8435_v16  ;;  %v8507_v16 = vld [vmem:[#allocation7 + $0x9e8] ss:$16 sps:$4 sm:$0xff]  }
 0x5a8   : > { %6088 = vmatpush2.bf16.msra.mxu1 %v8438_v17  ;;  %6048 = vmatprep.subr.bf16.mxu0 %v8443_v22  ;;  %v8510_v17 = vld [vmem:[#allocation7 + $0xbe8] ss:$16 sps:$4 sm:$0xff]   ;;  %v8515_v22 = vld [vmem:[#allocation7 + $0x9cc] ss:$16 sps:$4 sm:$0xff]  }
 0x5a9   : > { %6089 = vmatprep.subr.bf16.mxu1 %v8446_v55  ;;  %v8518_v55 = vld [vmem:[#allocation7 + $0xbcc] ss:$16 sps:$4 sm:$0xff]  }
 0x5ab   : > { %6049 = vmatpush2.bf16.msra.mxu0 %v8441_v35  ;;  %v8513_v35 = vld [vmem:[#allocation7 + $0x9c8] ss:$16 sps:$4 sm:$0xff]  }
 0x5ac   : > { %6090 = vmatpush2.bf16.msra.mxu1 %v8444_v27  ;;  %6050 = vmatprep.subr.bf16.mxu0 %v8449_v25  ;;  %v8516_v27 = vld [vmem:[#allocation7 + $0xbc8] ss:$16 sps:$4 sm:$0xff]   ;;  %v8521_v25 = vld [vmem:[#allocation7 + $0x9ac] ss:$16 sps:$4 sm:$0xff]  }
 0x5ad   : > { %6091 = vmatprep.subr.bf16.mxu1 %v8452_v32  ;;  %v8524_v32 = vld [vmem:[#allocation7 + $0xbac] ss:$16 sps:$4 sm:$0xff]  }
 0x5af   : > { %6051 = vmatpush2.bf16.msra.mxu0 %v8447_v44  ;;  %v8519_v44 = vld [vmem:[#allocation7 + $0x9a8] ss:$16 sps:$4 sm:$0xff]  }
 0x5b0   : > { %6092 = vmatpush2.bf16.msra.mxu1 %v8450_v33  ;;  %6052 = vmatprep.subr.bf16.mxu0 %v8455_v29  ;;  %v8522_v33 = vld [vmem:[#allocation7 + $0xba8] ss:$16 sps:$4 sm:$0xff]   ;;  %v8527_v29 = vld [vmem:[#allocation7 + $0x98c] ss:$16 sps:$4 sm:$0xff]  }
 0x5b1   : > { %6093 = vmatprep.subr.bf16.mxu1 %v8458_v6  ;;  %v8530_v6 = vld [vmem:[#allocation7 + $0xb8c] ss:$16 sps:$4 sm:$0xff]  }
 0x5b3   : > { %6053 = vmatpush2.bf16.msra.mxu0 %v8453_v4  ;;  %v8525_v4 = vld [vmem:[#allocation7 + $0x988] ss:$16 sps:$4 sm:$0xff]  }
 0x5b4   : > { %6094 = vmatpush2.bf16.msra.mxu1 %v8456_v19  ;;  %6104 = vmatprep.subr.bf16.mxu0 %v8461_v0  ;;  %v8528_v19 = vld [vmem:[#allocation7 + $0xb88] ss:$16 sps:$4 sm:$0xff]   ;;  %v8533_v0 = vld [vmem:[#allocation7 + $0x96c] ss:$16 sps:$4 sm:$0xff]  }
 0x5b5   : > { %6145 = vmatprep.subr.bf16.mxu1 %v8464_v24  ;;  %v8536_v24 = vld [vmem:[#allocation7 + $0xb6c] ss:$16 sps:$4 sm:$0xff]  }
 0x5b6   : > { %v4401_v40 = vpop.f32.mrf.mxu0  ;;  %v4442_v43 = vpop.f32.mrf.mxu1  ;;  %6055 = vmatmul.mubr.bf16.vlgmr.msra.gmra.mxu0 %v9321_v38 }
 0x5b7   : > { %v9329_v49 = vadd.f32 %v4442_v43, %v4401_v40  ;;  %6096 = vmatmul.mubr.bf16.vlgmr.msra.gmra.mxu1 %v9327_v42  ;;  %6105 = vmatpush1.bf16.msra.mxu0 %v8459_v30  ;;  %v8531_v30 = vld [vmem:[#allocation7 + $0x968] ss:$16 sps:$4 sm:$0xff]   ;;  %v8542_v40 = vld [vmem:[#allocation7 + $0xb4c] ss:$16 sps:$4 sm:$0xff]  }
 0x5b8   : > { %6136 = vmatprep.mubr.bf16.mxu0 %v9307_v1  ;;  %6146 = vmatpush1.bf16.msra.mxu1 %v8462_v37  ;;  %v4403_v31 = vpop.f32.mrf.mxu0  ;;  %v4444_v50 = vpop.f32.mrf.mxu1  ;;  %v8474_v1 = vld [vmem:[#allocation7 + $0xaa8] ss:$16 sps:$4 sm:$0xff]  }
 0x5b9   : > { %6177 = vmatprep.mubr.bf16.mxu1 %v9313_v26  ;;  %v9334_v54 = vadd.f32 %v4444_v50, %v4403_v31  ;;  %6106 = vmatprep.subr.bf16.mxu0 %v8467_v41  ;;  %v8480_v26 = vld [vmem:[#allocation7 + $0xa88] ss:$16 sps:$4 sm:$0xff]   ;;  %v8539_v41 = vld [vmem:[#allocation7 + $0x94c] ss:$16 sps:$4 sm:$0xff]  }
 0x5ba   : > { %v4405_v34 = vpop.f32.mrf.mxu0  ;;  %v4446_v14 = vpop.f32.mrf.mxu1  ;;  %6147 = vmatprep.subr.bf16.mxu1 %v8470_v48  ;;  %v8534_v37 = vld [vmem:[#allocation7 + $0xb68] ss:$16 sps:$4 sm:$0xff]   ;;  %v8548_v31 = vld [vmem:[#allocation7 + $0xb2c] ss:$16 sps:$4 sm:$0xff]  }
 0x5bb   : > { %6107 = vmatpush1.bf16.msra.mxu0 %v8465_v21  ;;  %v8537_v43 = vld [vmem:[#allocation7 + $0x948] ss:$16 sps:$4 sm:$0xff]   ;;  %v8545_v21 = vld [vmem:[#allocation7 + $0x92c] ss:$16 sps:$4 sm:$0xff]  }
 0x5bc   : > { %6148 = vmatpush1.bf16.msra.mxu1 %v8468_v52  ;;  %v4406_v7 = vpop.f32.mrf.mxu0  ;;  %v4447_v56 = vpop.f32.mrf.mxu1  ;;  %6108 = vmatprep.subr.bf16.mxu0 %v8473_v53  ;;  %v8540_v48 = vld [vmem:[#allocation7 + $0xb48] ss:$16 sps:$4 sm:$0xff]   ;;  %v8551_v53 = vld [vmem:[#allocation7 + $0x90c] ss:$16 sps:$4 sm:$0xff]  }
 0x5bd   : > { %6149 = vmatprep.subr.bf16.mxu1 %v8476_v13  ;;  %v8543_v50 = vld [vmem:[#allocation7 + $0x928] ss:$16 sps:$4 sm:$0xff]   ;;  %v8554_v13 = vld [vmem:[#allocation7 + $0xb0c] ss:$16 sps:$4 sm:$0xff]  }
 0x5be   : > { %v8546_v52 = vld [vmem:[#allocation7 + $0xb28] ss:$16 sps:$4 sm:$0xff]  }
 0x5bf   : > { %6109 = vmatpush1.bf16.msra.mxu0 %v8471_v46  ;;  %v8549_v34 = vld [vmem:[#allocation7 + $0x908] ss:$16 sps:$4 sm:$0xff]  }
 0x5c0   : > { %6150 = vmatpush1.bf16.msra.mxu1 %v8474_v1  ;;  %6110 = vmatprep.subr.bf16.mxu0 %v8479_v57  ;;  %v8552_v14 = vld [vmem:[#allocation7 + $0xb08] ss:$16 sps:$4 sm:$0xff]  }
 0x5c1   : > { %6151 = vmatprep.subr.bf16.mxu1 %v8482_v2 }
 0x5c3   : > { %6111 = vmatpush1.bf16.msra.mxu0 %v8477_v18 }
 0x5c4   : > { %6152 = vmatpush1.bf16.msra.mxu1 %v8480_v26  ;;  %6112 = vmatprep.subr.bf16.mxu0 %v8485_v3 }
 0x5c5   : > { %6153 = vmatprep.subr.bf16.mxu1 %v8488_v59 }
 0x5c7   : > { %6113 = vmatpush1.bf16.msra.mxu0 %v8483_v60 }
 0x5c8   : > { %6154 = vmatpush1.bf16.msra.mxu1 %v8486_v61  ;;  %6114 = vmatprep.subr.bf16.mxu0 %v8491_v36 }
 0x5c9   : > { %6155 = vmatprep.subr.bf16.mxu1 %v8494_v10 }
 0x5cb   : > { %6115 = vmatpush1.bf16.msra.mxu0 %v8489_v28 }
 0x5cc   : > { %6156 = vmatpush1.bf16.msra.mxu1 %v8492_v62  ;;  %6116 = vmatprep.subr.bf16.mxu0 %v8497_v12 }
 0x5cd   : > { %6157 = vmatprep.subr.bf16.mxu1 %v8500_v63 }
 0x5cf   : > { %6117 = vmatpush1.bf16.msra.mxu0 %v8495_v8 }
 0x5d0   : > { %6158 = vmatpush1.bf16.msra.mxu1 %v8498_v58  ;;  %6118 = vmatprep.subr.bf16.mxu0 %v8503_v9 }
 0x5d1   : > { %6159 = vmatprep.subr.bf16.mxu1 %v8506_v47 }
 0x5d3   : > { %6119 = vmatpush1.bf16.msra.mxu0 %v8501_v51 }
 0x5d4   : > { %6160 = vmatpush1.bf16.msra.mxu1 %v8504_v39  ;;  %6120 = vmatprep.subr.bf16.mxu0 %v8509_v45 }
 0x5d5   : > { %6161 = vmatprep.subr.bf16.mxu1 %v8512_v23 }
 0x5d7   : > { %6121 = vmatpush2.bf16.msra.mxu0 %v8507_v16 }
 0x5d8   : > { %6162 = vmatpush2.bf16.msra.mxu1 %v8510_v17  ;;  %6122 = vmatprep.subr.bf16.mxu0 %v8515_v22 }
 0x5d9   : > { %6163 = vmatprep.subr.bf16.mxu1 %v8518_v55 }
 0x5db   : > { %6123 = vmatpush2.bf16.msra.mxu0 %v8513_v35 }
 0x5dc   : > { %6164 = vmatpush2.bf16.msra.mxu1 %v8516_v27  ;;  %6124 = vmatprep.subr.bf16.mxu0 %v8521_v25 }
 0x5dd   : > { %6165 = vmatprep.subr.bf16.mxu1 %v8524_v32 }
 0x5df   : > { %6125 = vmatpush2.bf16.msra.mxu0 %v8519_v44 }
 0x5e0   : > { %6166 = vmatpush2.bf16.msra.mxu1 %v8522_v33  ;;  %6126 = vmatprep.subr.bf16.mxu0 %v8527_v29 }
 0x5e1   : > { %6167 = vmatprep.subr.bf16.mxu1 %v8530_v6 }
 0x5e3   : > { %6127 = vmatpush2.bf16.msra.mxu0 %v8525_v4 }
 0x5e4   : > { %6168 = vmatpush2.bf16.msra.mxu1 %v8528_v19  ;;  %6128 = vmatprep.subr.bf16.mxu0 %v8533_v0 }
 0x5e5   : > { %6169 = vmatprep.subr.bf16.mxu1 %v8536_v24 }
 0x5e7   : > { %6129 = vmatpush2.bf16.msra.mxu0 %v8531_v30 }
 0x5e8   : > { %6170 = vmatpush2.bf16.msra.mxu1 %v8534_v37  ;;  %6130 = vmatprep.subr.bf16.mxu0 %v8539_v41 }
 0x5e9   : > { %6171 = vmatprep.subr.bf16.mxu1 %v8542_v40 }
 0x5eb   : > { %6131 = vmatpush2.bf16.msra.mxu0 %v8537_v43 }
 0x5ec   : > { %6172 = vmatpush2.bf16.msra.mxu1 %v8540_v48  ;;  %6132 = vmatprep.subr.bf16.mxu0 %v8545_v21 }
 0x5ed   : > { %6173 = vmatprep.subr.bf16.mxu1 %v8548_v31 }
 0x5ef   : > { %6133 = vmatpush2.bf16.msra.mxu0 %v8543_v50 }
 0x5f0   : > { %6174 = vmatpush2.bf16.msra.mxu1 %v8546_v52  ;;  %6134 = vmatprep.subr.bf16.mxu0 %v8551_v53 }
 0x5f1   : > { %6175 = vmatprep.subr.bf16.mxu1 %v8554_v13 }
 0x5f3   : > { %6135 = vmatpush2.bf16.msra.mxu0 %v8549_v34 }
 0x5f4   : > { %6176 = vmatpush2.bf16.msra.mxu1 %v8552_v14 }
 0x5f6   : > { %v5123_v46 = vpop.f32.mrf.mxu0  ;;  %6137 = vmatmul.mubr.bf16.vlgmr.msra.gmra.mxu0 %v9321_v38 }
 0x5f7   : > { %v5124_v7 = vadd.f32 %v5123_v46, %v9302_v15  ;;  %v5164_v56 = vpop.f32.mrf.mxu1  ;;  %6178 = vmatmul.mubr.bf16.vlgmr.msra.gmra.mxu1 %v9327_v42 }
 0x5f8   : > { %v5125_v1 = vpop.f32.mrf.mxu0 }
 0x5f9   : > { %v5165_v57 = vadd.f32 %v5164_v56, %v5124_v7  ;;  %v5126_v2 = vadd.f32 %v5125_v1, %v9316_v5  ;;  %v5166_v18 = vpop.f32.mrf.mxu1 }
 0x5fa   : > { %v5127_v26 = vpop.f32.mrf.mxu0 }
 0x5fb   : > { %v5167_v3 = vadd.f32 %v5166_v18, %v5126_v2  ;;  %v5168_v59 = vpop.f32.mrf.mxu1 }
 0x5fc   : > { %v5128_v60 = vpop.f32.mrf.mxu0 }
 0x5fd   : > { %v5169_v61 = vpop.f32.mrf.mxu1 }
 0x636   : > { %v5205_v36 = vpop.f32.mrf.mxu0 }
 0x637   : > { %v5206_v10 = vadd.f32 %v5205_v36, %v9329_v49  ;;  %v5246_v28 = vpop.f32.mrf.mxu1 }
 0x638   : > { %v5207_v38 = vpop.f32.mrf.mxu0 }
 0x639   : > { %v5247_v62 = vadd.f32 %v5246_v28, %v5206_v10  ;;  %v5208_v15 = vadd.f32 %v5207_v38, %v9334_v54  ;;  %v5248_v12 = vpop.f32.mrf.mxu1 }
 0x63a   : > { %v5209_v42 = vpop.f32.mrf.mxu0 }
 0x63b   : > { %v5249_v63 = vadd.f32 %v5248_v12, %v5208_v15  ;;  %v5250_v8 = vpop.f32.mrf.mxu1 }
 0x63c   : > { %v5210_v58 = vpop.f32.mrf.mxu0 }
 0x63d   : > { %v5251_v5 = vpop.f32.mrf.mxu1 }
 0x676   : > { %v6056_v9 = vpop.f32.mrf.mxu0 }
 0x677   : > { %v6097_v47 = vpop.f32.mrf.mxu1 }
 0x678   : > { %v6098_v51 = vadd.f32 %v6097_v47, %v6056_v9  ;;  %v6058_v39 = vpop.f32.mrf.mxu0 }
 0x679   : > { %v6099_v45 = vpop.f32.mrf.mxu1 }
 0x67a   : > { %v9342_v23 = vadd.f32 %v6098_v51, %v5165_v57  ;;  %v6100_v16 = vadd.f32 %v6099_v45, %v6058_v39  ;;  %v6060_v49 = vpop.f32.mrf.mxu0 }
 0x67b   : > { %v6101_v17 = vpop.f32.mrf.mxu1 }
 0x67c   : > { %v9344_v22 = vadd.f32 %v6100_v16, %v5167_v3  ;;  %v6061_v55 = vpop.f32.mrf.mxu0  ;;  %v6190_v54 = vrot.slane %v9342_v23, 4  ;;  %v6284_v35 = vmul.f32 %v9342_v23, %v9342_v23 }
 0x67d   : > { %v6102_v27 = vpop.f32.mrf.mxu1 }
 0x67e   : > { %v6191_v25 = vadd.f32 %v6190_v54, %v9342_v23  ;;  %v6196_v32 = vrot.slane %v9344_v22, 4  ;;  %v6288_v44 = vrot.slane %v6284_v35, 4  ;;  %v6285_v33 = vmul.f32 %v9344_v22, %v9344_v22 }
 0x680   : > { %v6192_v29 = vrot.slane %v6191_v25, 2  ;;  %v6197_v6 = vadd.f32 %v6196_v32, %v9344_v22  ;;  %v6289_v4 = vadd.f32 %v6288_v44, %v6284_v35  ;;  %v6294_v19 = vrot.slane %v6285_v33, 4 }
 0x682   : > { %v6193_v0 = vadd.f32 %v6192_v29, %v6191_v25  ;;  %v6198_v24 = vrot.slane %v6197_v6, 2  ;;  %v6290_v30 = vrot.slane %v6289_v4, 2  ;;  %v6295_v37 = vadd.f32 %v6294_v19, %v6285_v33 }
 0x684   : > { %v6194_v41 = vrot.slane %v6193_v0, 1  ;;  %v6199_v40 = vadd.f32 %v6198_v24, %v6197_v6  ;;  %v6291_v43 = vadd.f32 %v6290_v30, %v6289_v4  ;;  %v6296_v48 = vrot.slane %v6295_v37, 2 }
 0x686   : > { %v9354_v21 = vadd.f32 %v6194_v41, %v6193_v0  ;;  %v6200_v31 = vrot.slane %v6199_v40, 1  ;;  %v6292_v50 = vrot.slane %v6291_v43, 1  ;;  %v6297_v52 = vadd.f32 %v6296_v48, %v6295_v37 }
 0x688   : > { %6214 = vrot.lane.b32.xlu0 %v9354_v21, %s8720_s18  ;;  %v6201_v53 = vadd.f32 %v6200_v31, %v6199_v40  ;;  %v6298_v13 = vrot.slane %v6297_v52, 1  ;;  %v9359_v34 = vadd.f32 %v6292_v50, %v6291_v43 }
 0x68a   : > { %6216 = vrot.lane.b32.xlu1 %v6201_v53, %s8720_s18  ;;  %v6299_v14 = vadd.f32 %v6298_v13, %v6297_v52 }
 0x68c   : > { %6312 = vrot.lane.b32.xlu0 %v9359_v34, %s8720_s18 }
 0x68e   : > { %6314 = vrot.lane.b32.xlu1 %v6299_v14, %s8720_s18 }
 0x6b6   : > { %v6138_v46 = vpop.f32.mrf.mxu0 }
 0x6b7   : > { %v6179_v7 = vpop.f32.mrf.mxu1 }
 0x6b8   : > { %v6180_v56 = vadd.f32 %v6179_v7, %v6138_v46  ;;  %v6140_v1 = vpop.f32.mrf.mxu0 }
 0x6b9   : > { %v6181_v57 = vpop.f32.mrf.mxu1 }
 0x6ba   : > { %v9364_v2 = vadd.f32 %v6180_v56, %v5247_v62  ;;  %v6182_v18 = vadd.f32 %v6181_v57, %v6140_v1  ;;  %v6142_v26 = vpop.f32.mrf.mxu0 }
 0x6bb   : > { %v6183_v3 = vpop.f32.mrf.mxu1 }
 0x6bc   : > { %v9366_v59 = vadd.f32 %v6182_v18, %v5249_v63  ;;  %v6143_v60 = vpop.f32.mrf.mxu0  ;;  %v6202_v61 = vrot.slane %v9364_v2, 4  ;;  %v6286_v36 = vmul.f32 %v9364_v2, %v9364_v2 }
 0x6bd   : > { %v6184_v10 = vpop.f32.mrf.mxu1 }
 0x6be   : > { %v6203_v28 = vadd.f32 %v6202_v61, %v9364_v2  ;;  %v6208_v38 = vrot.slane %v9366_v59, 4  ;;  %v6300_v15 = vrot.slane %v6286_v36, 4  ;;  %v6287_v62 = vmul.f32 %v9366_v59, %v9366_v59 }
 0x6c0   : > { %v6204_v12 = vrot.slane %v6203_v28, 2  ;;  %v6209_v42 = vadd.f32 %v6208_v38, %v9366_v59  ;;  %v6301_v63 = vadd.f32 %v6300_v15, %v6286_v36  ;;  %v6306_v8 = vrot.slane %v6287_v62, 4 }
 0x6c2   : > { %v6205_v58 = vadd.f32 %v6204_v12, %v6203_v28  ;;  %v6210_v5 = vrot.slane %v6209_v42, 2  ;;  %v6302_v9 = vrot.slane %v6301_v63, 2  ;;  %v6307_v47 = vadd.f32 %v6306_v8, %v6287_v62 }
 0x6c4   : > { %v6206_v51 = vrot.slane %v6205_v58, 1  ;;  %v6211_v39 = vadd.f32 %v6210_v5, %v6209_v42  ;;  %v6303_v45 = vadd.f32 %v6302_v9, %v6301_v63  ;;  %v6308_v16 = vrot.slane %v6307_v47, 2 }
 0x6c6   : > { %v6207_v49 = vadd.f32 %v6206_v51, %v6205_v58  ;;  %v6212_v17 = vrot.slane %v6211_v39, 1  ;;  %v6304_v55 = vrot.slane %v6303_v45, 1  ;;  %v6309_v54 = vadd.f32 %v6308_v16, %v6307_v47 }
 0x6c8   : > { %6218 = vrot.lane.b32.xlu0 %v6207_v49, %s8720_s18  ;;  %v6213_v35 = vadd.f32 %v6212_v17, %v6211_v39  ;;  %v6310_v27 = vrot.slane %v6309_v54, 1  ;;  %v6305_v25 = vadd.f32 %v6304_v55, %v6303_v45 }
 0x6ca   : > { %6220 = vrot.lane.b32.xlu1 %v6213_v35, %s8720_s18  ;;  %v6311_v32 = vadd.f32 %v6310_v27, %v6309_v54 }
 0x6cc   : > { %6316 = vrot.lane.b32.xlu0 %v6305_v25, %s8720_s18 }
 0x6ce   : > { %6318 = vrot.lane.b32.xlu1 %v6311_v32, %s8720_s18 }
 0x6fa   : > { %v6215_v44 = vpop.permute.xlu0 %6214 }
 0x6fc   : > { %v6217_v33 = vpop.permute.xlu1 %6216 }
 0x6fd   : > { %v6224_v29 = vsel %vm3127_vm6, %v6215_v44, %v6217_v33 }
 0x6fe   : > { %v6227_v6 = vadd.f32 %v6224_v29, %v6201_v53  ;;  %v6313_v4 = vpop.permute.xlu0 %6312 }
 0x700   : > { %v6315_v19 = vpop.permute.xlu1 %6314  ;;  %6232 = vrot.lane.b32.xlu1 %v6227_v6, %s8721_s20 }
 0x701   : > { %v6322_v0 = vsel %vm3127_vm6, %v6313_v4, %v6315_v19 }
 0x702   : > { %v6325_v24 = vadd.f32 %v6322_v0, %v6299_v14 }
 0x704   : > { %6330 = vrot.lane.b32.xlu1 %v6325_v24, %s8721_s20 }
 0x73a   : > { %v6219_v30 = vpop.permute.xlu0 %6218 }
 0x73b   : > { %v6223_v37 = vsel %vm3127_vm6, %v6217_v33, %v6219_v30 }
 0x73c   : > { %v6228_v41 = vadd.f32 %v6223_v37, %v6207_v49  ;;  %v6221_v40 = vpop.permute.xlu1 %6220 }
 0x73d   : > { %v6222_v43 = vsel %vm3127_vm6, %v6219_v30, %v6221_v40  ;;  %v6225_v48 = vsel %vm3127_vm6, %v6221_v40, %v6215_v44 }
 0x73e   : > { %v6229_v31 = vadd.f32 %v6222_v43, %v6213_v35  ;;  %6234 = vrot.lane.b32.xlu0 %v6228_v41, %s8721_s20  ;;  %v6226_v50 = vadd.f32 %v6225_v48, %v9354_v21  ;;  %v6317_v52 = vpop.permute.xlu0 %6316 }
 0x73f   : > { %v6321_v21 = vsel %vm3127_vm6, %v6315_v19, %v6317_v52 }
 0x740   : > { %v6319_v53 = vpop.permute.xlu1 %6318  ;;  %6236 = vrot.lane.b32.xlu1 %v6229_v31, %s8721_s20  ;;  %v6326_v56 = vadd.f32 %v6321_v21, %v6305_v25 }
 0x741   : > { %v6320_v13 = vsel %vm3127_vm6, %v6317_v52, %v6319_v53  ;;  %v6323_v14 = vsel %vm3127_vm6, %v6319_v53, %v6313_v4 }
 0x742   : > { %v6327_v46 = vadd.f32 %v6320_v13, %v6311_v32  ;;  %6230 = vrot.lane.b32.xlu0 %v6226_v50, %s8721_s20  ;;  %v6324_v7 = vadd.f32 %v6323_v14, %v9359_v34 }
 0x744   : > { %6334 = vrot.lane.b32.xlu1 %v6327_v46, %s8721_s20 }
 0x746   : > { %6328 = vrot.lane.b32.xlu0 %v6324_v7, %s8721_s20 }
 0x74a   : > { %6332 = vrot.lane.b32.xlu0 %v6326_v56, %s8721_s20 }
 0x772   : > { %v6233_v1 = vpop.permute.xlu1 %6232 }
 0x776   : > { %v6331_v57 = vpop.permute.xlu1 %6330 }
 0x7b0   : > { %v6235_v18 = vpop.permute.xlu0 %6234 }
 0x7b1   : > { %v6239_v26 = vsel %vm3144_vm7, %v6233_v1, %v6235_v18 }
 0x7b2   : > { %v6244_v3 = vadd.f32 %v6239_v26, %v6228_v41  ;;  %v6237_v60 = vpop.permute.xlu1 %6236 }
 0x7b3   : > { %v6238_v38 = vsel %vm3144_vm7, %v6235_v18, %v6237_v60 }
 0x7b4   : > { %6250 = vrot.lane.b32.xlu0 %v6244_v3, %s8722_s25  ;;  %v6231_v34 = vpop.permute.xlu0 %6230  ;;  %v6245_v42 = vadd.f32 %v6238_v38, %v6229_v31 }
 0x7b5   : > { %v6240_v61 = vsel %vm3144_vm7, %v6231_v34, %v6233_v1  ;;  %v6241_v36 = vsel %vm3144_vm7, %v6237_v60, %v6231_v34 }
 0x7b6   : > { %v6242_v10 = vadd.f32 %v6241_v36, %v6226_v50  ;;  %v6243_v28 = vadd.f32 %v6240_v61, %v6227_v6  ;;  %v6335_v15 = vpop.permute.xlu1 %6334 }
 0x7b8   : > { %6246 = vrot.lane.b32.xlu0 %v6242_v10, %s8722_s25  ;;  %6248 = vrot.lane.b32.xlu1 %v6243_v28, %s8722_s25  ;;  %v6329_v62 = vpop.permute.xlu0 %6328 }
 0x7b9   : > { %v6339_v12 = vsel %vm3144_vm7, %v6335_v15, %v6329_v62  ;;  %v6338_v8 = vsel %vm3144_vm7, %v6329_v62, %v6331_v57 }
 0x7ba   : > { %v6340_v63 = vadd.f32 %v6339_v12, %v6324_v7  ;;  %v6341_v9 = vadd.f32 %v6338_v8, %v6325_v24 }
 0x7bc   : > { %6252 = vrot.lane.b32.xlu1 %v6245_v42, %s8722_s25  ;;  %6344 = vrot.lane.b32.xlu0 %v6340_v63, %s8722_s25  ;;  %v6333_v58 = vpop.permute.xlu0 %6332 }
 0x7bd   : > { %v6337_v5 = vsel %vm3144_vm7, %v6331_v57, %v6333_v58  ;;  %v6336_v51 = vsel %vm3144_vm7, %v6333_v58, %v6335_v15 }
 0x7be   : > { %v6342_v47 = vadd.f32 %v6337_v5, %v6326_v56  ;;  %v6343_v39 = vadd.f32 %v6336_v51, %v6327_v46 }
 0x7c0   : > { %6346 = vrot.lane.b32.xlu1 %v6341_v9, %s8722_s25  ;;  %6348 = vrot.lane.b32.xlu0 %v6342_v47, %s8722_s25 }
 0x7c4   : > { %6350 = vrot.lane.b32.xlu1 %v6343_v39, %s8722_s25 }
 0x826   : > { %v6251_v45 = vpop.permute.xlu0 %6250 }
 0x82a   : > { %v6249_v16 = vpop.permute.xlu1 %6248  ;;  %v6247_v49 = vpop.permute.xlu0 %6246 }
 0x82b   : > { %v6256_v17 = vsel %vm3161_vm8, %v6247_v49, %v6249_v16  ;;  %v6255_v33 = vsel %vm3161_vm8, %v6249_v16, %v6251_v45 }
 0x82c   : > { %v6259_v55 = vadd.f32 %v6256_v17, %v6243_v28  ;;  %v6260_v4 = vadd.f32 %v6255_v33, %v6244_v3 }
 0x82e   : > { %v6253_v54 = vpop.permute.xlu1 %6252  ;;  %6264 = vrot.lane.b32.xlu1 %v6259_v55, %s8723_s27  ;;  %v6345_v44 = vpop.permute.xlu0 %6344 }
 0x82f   : > { %v6254_v35 = vsel %vm3161_vm8, %v6251_v45, %v6253_v54  ;;  %v6257_v27 = vsel %vm3161_vm8, %v6253_v54, %v6247_v49 }
 0x830   : > { %v6258_v25 = vadd.f32 %v6257_v27, %v6242_v10  ;;  %v6261_v32 = vadd.f32 %v6254_v35, %v6245_v42 }
 0x832   : > { %v6347_v29 = vpop.permute.xlu1 %6346  ;;  %6262 = vrot.lane.b32.xlu0 %v6258_v25, %s8723_s27  ;;  %6268 = vrot.lane.b32.xlu1 %v6261_v32, %s8723_s27  ;;  %v6349_v0 = vpop.permute.xlu0 %6348 }
 0x833   : > { %v6354_v6 = vsel %vm3161_vm8, %v6345_v44, %v6347_v29  ;;  %v6353_v43 = vsel %vm3161_vm8, %v6347_v29, %v6349_v0 }
 0x834   : > { %v6357_v19 = vadd.f32 %v6354_v6, %v6341_v9  ;;  %v6358_v48 = vadd.f32 %v6353_v43, %v6342_v47 }
 0x836   : > { %v6351_v24 = vpop.permute.xlu1 %6350  ;;  %6266 = vrot.lane.b32.xlu0 %v6260_v4, %s8723_s27  ;;  %6362 = vrot.lane.b32.xlu1 %v6357_v19, %s8723_s27 }
 0x837   : > { %v6352_v30 = vsel %vm3161_vm8, %v6349_v0, %v6351_v24  ;;  %v6355_v37 = vsel %vm3161_vm8, %v6351_v24, %v6345_v44 }
 0x838   : > { %v6356_v41 = vadd.f32 %v6355_v37, %v6340_v63  ;;  %v6359_v40 = vadd.f32 %v6352_v30, %v6343_v39  ;;  %v8564_v30 = vld [vmem:[%s8867_s4 + $0x8] sm:$0xff] }
 0x839   : > { %v6420_v37 = vunpack.c.l.bf16 %v8564_v30 }
 0x83a   : > { %6360 = vrot.lane.b32.xlu0 %v6356_v41, %s8723_s27  ;;  %6366 = vrot.lane.b32.xlu1 %v6359_v40, %s8723_s27 }
 0x83e   : > { %6364 = vrot.lane.b32.xlu0 %v6358_v48, %s8723_s27 }
 0x8a0   : > { %v6265_v31 = vpop.permute.xlu1 %6264 }
 0x8a4   : > { %v6269_v50 = vpop.permute.xlu1 %6268  ;;  %v6263_v52 = vpop.permute.xlu0 %6262 }
 0x8a5   : > { %v6272_v53 = vsel %vm3178_vm9, %v6263_v52, %v6265_v31  ;;  %v6273_v13 = vsel %vm3178_vm9, %v6269_v50, %v6263_v52 }
 0x8a6   : > { %v6274_v56 = vadd.f32 %v6273_v13, %v6258_v25  ;;  %v6275_v1 = vadd.f32 %v6272_v53, %v6259_v55 }
 0x8a8   : > { %v6363_v14 = vpop.permute.xlu1 %6362  ;;  %v6267_v46 = vpop.permute.xlu0 %6266  ;;  %v6279_v36 = vadd.f32 %v6275_v1, %v6274_v56 }
 0x8a9   : > { %v6270_v7 = vsel %vm3178_vm9, %v6267_v46, %v6269_v50  ;;  %v6271_v21 = vsel %vm3178_vm9, %v6265_v31, %v6267_v46 }
 0x8aa   : > { %v6276_v57 = vadd.f32 %v6271_v21, %v6260_v4  ;;  %v6277_v18 = vadd.f32 %v6270_v7, %v6261_v32  ;;  %v8563_v4 = vld [vmem:[%s8867_s4] sm:$0xff] }
 0x8ab   : > { %v6419_v0 = vunpack.c.h.bf16 %v8563_v4 }
 0x8ac   : > { %v6278_v26 = vadd.f32 %v6277_v18, %v6274_v56  ;;  %v6280_v3 = vadd.f32 %v6276_v57, %v6275_v1  ;;  %v6281_v60 = vadd.f32 %v6277_v18, %v6276_v57  ;;  %v6367_v34 = vpop.permute.xlu1 %6366  ;;  %v6361_v61 = vpop.permute.xlu0 %6360 }
 0x8ad   : > { %v6370_v10 = vsel %vm3178_vm9, %v6361_v61, %v6363_v14  ;;  %v6371_v28 = vsel %vm3178_vm9, %v6367_v34, %v6361_v61 }
 0x8ae   : > { %v6282_v38 = vadd.f32 %v6280_v3, %v6278_v26  ;;  %v6283_v15 = vadd.f32 %v6281_v60, %v6279_v36  ;;  %v6372_v12 = vadd.f32 %v6371_v28, %v6356_v41  ;;  %v6373_v42 = vadd.f32 %v6370_v10, %v6357_v19 }
 0x8af   : > { %v6418_v19 = vunpack.c.l.bf16 %v8563_v4 }
 0x8b0   : > { %v6365_v62 = vpop.permute.xlu0 %6364  ;;  %v6382_v9 = vmul.f32 0.001953125, %v6282_v38  ;;  %v6383_v47 = vmul.f32 0.001953125, %v6283_v15  ;;  %v6377_v51 = vadd.f32 %v6373_v42, %v6372_v12 }
 0x8b1   : > { %v6368_v63 = vsel %vm3178_vm9, %v6365_v62, %v6367_v34  ;;  %v6369_v8 = vsel %vm3178_vm9, %v6363_v14, %v6365_v62 }
 0x8b2   : > { %v6374_v58 = vadd.f32 %v6369_v8, %v6358_v48  ;;  %v6375_v5 = vadd.f32 %v6368_v63, %v6359_v40  ;;  %v6386_v55 = vmul.f32 %v6382_v9, %v6382_v9  ;;  %v6387_v54 = vmul.f32 %v6383_v47, %v6383_v47 }
 0x8b3   : > { %v6397_v33 = vrot.slane %v6382_v9, %v9204_v11  ;;  %v6401_v29 = vrot.slane %v6383_v47, %v9204_v11  ;;  %v6421_v48 = vunpack.c.h.bf16 %v8564_v30 }
 0x8b4   : > { %v6376_v39 = vadd.f32 %v6375_v5, %v6372_v12  ;;  %v6378_v45 = vadd.f32 %v6374_v58, %v6373_v42  ;;  %v6379_v16 = vadd.f32 %v6375_v5, %v6374_v58 }
 0x8b5   : > { %v6402_v41 = vsub.f32 %v9342_v23, %v6397_v33  ;;  %v6404_v40 = vsub.f32 %v9364_v2, %v6397_v33  ;;  %v6403_v31 = vsub.f32 %v9344_v22, %v6401_v29  ;;  %v6405_v50 = vsub.f32 %v9366_v59, %v6401_v29 }
 0x8b6   : > { %v6380_v49 = vadd.f32 %v6378_v45, %v6376_v39  ;;  %v6381_v17 = vadd.f32 %v6379_v16, %v6377_v51 }
 0x8b8   : > { %v6384_v35 = vmul.f32 0.001953125, %v6380_v49  ;;  %v6385_v27 = vmul.f32 0.001953125, %v6381_v17 }
 0x8ba   : > { %v6388_v25 = vsub.f32 %v6384_v35, %v6386_v55  ;;  %v6389_v20 = vsub.f32 %v6385_v27, %v6387_v54 }
 0x8bc   : > { %v6390_v32 = vadd.f32 1e-05, %v6388_v25  ;;  %v6391_v44 = vadd.f32 1e-05, %v6389_v20 }
 0x8be   : > { %8559 = vrsqrt.f32 %v6390_v32 }
 0x8bf   : > { %8561 = vrsqrt.f32 %v6391_v44 }
 0x8cb   : > { %v8560_v6 = vpop.eup %8559 }
 0x8cc   : > { %v8562_v24 = vpop.eup %8561  ;;  %v6409_v43 = vrot.slane %v8560_v6, %v9204_v11 }
 0x8cd   : > { %v6413_v52 = vrot.slane %v8562_v24, %v9204_v11 }
 0x8ce   : > { %v6414_v53 = vmul.f32 %v6409_v43, %v6402_v41  ;;  %v6416_v13 = vmul.f32 %v6409_v43, %v6404_v40 }
 0x8cf   : > { %v6415_v14 = vmul.f32 %v6413_v52, %v6403_v31  ;;  %v6417_v23 = vmul.f32 %v6413_v52, %v6405_v50 }
 0x8d0   : > { %v6422_v46 = vadd.f32 %v6418_v19, %v6414_v53  ;;  %v6424_v2 = vadd.f32 %v6420_v37, %v6416_v13 }
 0x8d1   : > { %v6423_v7 = vadd.f32 %v6419_v0, %v6415_v14  ;;  %v6425_v21 = vadd.f32 %v6421_v48, %v6417_v23 }
 0x8d2   : > { %6426 = vst [vmem:[%s215_s5] sm:$0xff] %v6422_v46  ;;  %6428 = vst [vmem:[%s215_s5 + $0x10] sm:$0xff] %v6424_v2 }
 0x8d3   : > { %6427 = vst [vmem:[%s215_s5 + $0x8] sm:$0xff] %v6423_v7  ;;  %6429 = vst [vmem:[%s215_s5 + $0x18] sm:$0xff] %v6425_v21 }
 0x8d4   : > { %8658 = shalt.err (!%p8655_p9)
}
 0x8d5   : > { %s8659_s30 = scalar_lea.hbm %s9485_s21, 512  ;;  %s8663_s18 = scalar_lea.hbm %s9531_s3, 1024 }
 0x8d6   : > { %p8660_p13 = scmp.ne.s32.totalorder %s9485_s21, %s8659_s30  ;;  %p8664_p0 = scmp.lt.s32.totalorder %s9485_s21, %s9531_s3 }
 0x8d7   : > { %p8665_p4 = scmp.lt.s32.totalorder %s8663_s18, %s8659_s30 }
 0x8d8   : > { %p8661_p5 = pnand %p8660_p13, %p9551_p11 }
 0x8d9   : > { %p8666_p8 = por %p8665_p4, %p8664_p0 }
 0x8da   : > { %p8662_p10 = pneg %p8661_p5 }
 0x8dc   : > { %p8667_p3 = pnand %p8666_p8, %p8662_p10 }
 0x8de   : > { %8670 = shalt.err (!%p8667_p3)
}
 0x8df   : > { %7336 = dma.vmem_to_hbm [thread:$0]  (%p9551_p11), %s9487_s6, 512, %s9485_s21, %s6431_s16  }
 0x8e0 PF: > { %s6457_s27 = sand.u32 1, %s8701_s12   ;;  %p9552_p1 = scmp.ne.s32.totalorder %s9537_s19, 0 }
 0x8e1   : > { %p9553_p2 = scmp.ge.s32.totalorder %s8713_s15, 2  ;;  %s6458_s28 = scalar_lea.sflag [#allocation4], %s6457_s27 }
 0x8e3   : > { %p7350_p6 = pnand %p9553_p2, %p9552_p1 }
 0x8e5   : > { %p7351_p12 = pneg %p7350_p6 }
 0x8e7   : > { %8696 = dma.done.wait (%p7351_p12), %s6458_s28, 512  }
 0x8e8   : > { %8698 = vsyncadd (%p7351_p12), %s6458_s28, 4294966784  ;;  %p17_p7 = scmp.ge.s32.totalorder %s8817_s7, 4   ;;  %s9554_s12 = smov %s8705_s13 }
 0x8e9   : > { %s9555_s13 = smov %s8709_s14  ;;  %s9556_s14 = smov %s8833_s11 }
 0x8ea   : > { %s9557_s15 = smov %s8817_s7  ;;  %19 = sbr.rel (!%p17_p7) target bundleno = 6 (0x6), region = 89 }
 0x8ef   :  { %6463 = vsyncpa [#allocation3], 1 }
 0x8f0   :  { %6465 = vsyncpa [#allocation3 + $0x1], 1 }
 0x8f1   :  { %6466 = vsyncpa [#allocation6], 1 }
 0x8f2   :  { %6467 = vsyncpa [#allocation4], 1 }
 0x8f3   :  { %6469 = vsyncpa [#allocation4 + $0x1], 1 }

</bundles_post_ra>
